<compile_context>
chip_gen: v7x
topology: tpu7x:2x2x1
jax: 0.10.0
libtpu: 0.0.40
codegen_flags: <defaults>
</compile_context>

<pallas_src>
import functools
import math

import jax
import jax.numpy as jnp
from jax import lax
from jax.experimental import pallas as pl
from jax.experimental.pallas import tpu as pltpu

KSIZE = 9
HIDDEN = 32
ALPHABET = 4
NUM_STACKS = 1
NUM_LAYERS = 5 * NUM_STACKS
INP_SIZE = ALPHABET * 2          # expanded simplex input (mode == 'dirichlet')
DILATIONS = [1, 1, 4, 16, 64]    # per base conv layer (PyTorch layer order)


# ------------------------------ fused kernel ------------------------------- #

def _cnn_fused_kernel(seq_ref, tproj_ref, in_w_ref, in_b_ref,
                      cw0_ref, cw1_ref, cw2_ref, cw3_ref, cw4_ref,
                      cv_b_ref, ln_g_ref, ln_b_ref,
                      f1_w_ref, f1_b_ref, f2_w_ref, f2_b_ref,
                      o_ref, hpad_ref, *, padw, in_taps, layer_taps):
    """One grid step == one batch sample; everything resident in VMEM/vregs.

    hpad_ref layout: [ left pad (padw) | data window (L) | right pad (padw) ].

    INVARIANTS (keep when editing):
      * The pad columns are zeroed once below and never written again -- they
        supply every conv's "same" zero padding for free.
      * After the input-conv write, data-window rows INP_SIZE..HIDDEN-1 hold
        stale values.  This is safe ONLY because the input conv reads just
        rows 0..INP_SIZE-1 and layer 0 rewrites all HIDDEN rows before any
        full-height read.
      * Every tap kept in `*_taps` has |offset| < L, so padw >= max|offset| is
        guaranteed by the wrapper and every im2col slice is in-bounds.
    """
    L = o_ref.shape[-1]
    cw_refs = (cw0_ref, cw1_ref, cw2_ref, cw3_ref, cw4_ref)

    zeros_pad = jnp.zeros((HIDDEN, padw), hpad_ref.dtype)
    hpad_ref[pl.ds(0, HIDDEN), pl.ds(0, padw)] = zeros_pad          # left pad
    hpad_ref[pl.ds(0, HIDDEN), pl.ds(padw + L, padw)] = zeros_pad   # right pad

    def conv(w_ref, n_in, taps, dilation):
        # im2col: stack the shifted bf16 slices along the sublane axis and do
        # ONE (HIDDEN, n_taps*n_in) @ (n_taps*n_in, L) MXU matmul, f32 accum.
        parts = [hpad_ref[pl.ds(0, n_in),
                          pl.ds(padw + (k - KSIZE // 2) * dilation, L)]
                 for k in taps]
        x = parts[0] if len(parts) == 1 else jnp.concatenate(parts, axis=0)
        return jnp.dot(w_ref[...], x, preferred_element_type=jnp.float32)

    # feat = relu(Conv1d(inp_size, hidden, k=9, pad=4)(seq))
    hpad_ref[pl.ds(0, INP_SIZE), pl.ds(padw, L)] = seq_ref[0]
    feat = jnp.maximum(conv(in_w_ref, INP_SIZE, in_taps, 1) + in_b_ref[...], 0.0)

    # TODO(synk): nn.Dropout is the identity here (args.dropout = 0.0 / eval).
    for i in range(NUM_LAYERS):
        d = DILATIONS[i // NUM_STACKS]
        # h = feat + time_layers[i](time_emb)[:, :, None]   (broadcast over L)
        h = feat + tproj_ref[0, i]                          # (32, L) + (32, 1)
        # LayerNorm over the channel dim (eps=1e-5, biased variance), one pass.
        mu = jnp.mean(h, axis=0, keepdims=True)
        ex2 = jnp.mean(h * h, axis=0, keepdims=True)
        hn = (h - mu) * lax.rsqrt(ex2 - mu * mu + 1e-5)
        hn = hn * ln_g_ref[i] + ln_b_ref[i]
        # feat = relu(convs[i](h)) + feat
        hpad_ref[pl.ds(0, HIDDEN), pl.ds(padw, L)] = hn.astype(hpad_ref.dtype)
        feat = jnp.maximum(conv(cw_refs[i], HIDDEN, layer_taps[i], d)
                           + cv_b_ref[i], 0.0) + feat

    # final_conv: Conv1d(h,h,1) -> ReLU -> Conv1d(h,alphabet,1)  (1x1 == matmul)
    h = jnp.maximum(
        jnp.dot(f1_w_ref[...], feat.astype(jnp.bfloat16),
                preferred_element_type=jnp.float32) + f1_b_ref[...], 0.0)
    y = jnp.dot(f2_w_ref[...], h.astype(jnp.bfloat16),
                preferred_element_type=jnp.float32) + f2_b_ref[...]
    o_ref[0] = y.astype(o_ref.dtype)                        # (4, L) lane-dense


# ------------------------------ parameters --------------------------------- #

def init_params(key):
    ks = iter(jax.random.split(key, 16))

    def w(shape, fan_in):
        return jax.random.normal(next(ks), shape, jnp.float32) / math.sqrt(fan_in)

    p = {}
    # GaussianFourierProjection: W = randn(hidden//2) * 30  (non-trainable)
    p["gfp_W"] = jax.random.normal(next(ks), (HIDDEN // 2,), jnp.float32) * 30.0
    # time_embedder Linear(hidden, hidden), stored input-major (x @ W + b)
    p["time_w"] = w((HIDDEN, HIDDEN), HIDDEN)
    p["time_b"] = jnp.zeros((HIDDEN,), jnp.float32)
    # 5 per-layer Dense(hidden, hidden) stacked into ONE (hidden, 5*hidden) matmul
    p["tl_w"] = w((HIDDEN, NUM_LAYERS * HIDDEN), HIDDEN)
    p["tl_b"] = jnp.zeros((NUM_LAYERS * HIDDEN,), jnp.float32)
    # input conv: weight[k] = (Cout, Cin)
    p["in_w"] = w((KSIZE, HIDDEN, INP_SIZE), KSIZE * INP_SIZE)
    p["in_b"] = jnp.zeros((HIDDEN, 1), jnp.float32)
    # 5 dilated convs: weight[i, k] = (Cout, Cin)
    p["cv_w"] = w((NUM_LAYERS, KSIZE, HIDDEN, HIDDEN), KSIZE * HIDDEN)
    p["cv_b"] = jnp.zeros((NUM_LAYERS, HIDDEN, 1), jnp.float32)
    # per-layer LayerNorm affine params (per-channel columns)
    p["ln_g"] = jnp.ones((NUM_LAYERS, HIDDEN, 1), jnp.float32)
    p["ln_b"] = jnp.zeros((NUM_LAYERS, HIDDEN, 1), jnp.float32)
    # final 1x1 convs
    p["f1_w"] = w((HIDDEN, HIDDEN), HIDDEN)
    p["f1_b"] = jnp.zeros((HIDDEN, 1), jnp.float32)
    p["f2_w"] = w((ALPHABET, HIDDEN), HIDDEN)
    p["f2_b"] = jnp.zeros((ALPHABET, 1), jnp.float32)
    return p


# -------------------------------- forward ----------------------------------- #

def _valid_taps(dilation, seq_len):
    # Taps whose offset still overlaps real data at this seq_len; all other taps
    # read only PyTorch's zero padding and contribute exactly zero -> skipped.
    return tuple(k for k in range(KSIZE)
                 if abs((k - KSIZE // 2) * dilation) < seq_len)


def _flatten_conv_weight(w_kco_ci, taps):
    # (K, Cout, Cin) -> (Cout, n_taps*Cin): taps outer, channels inner (matches
    # the kernel's sublane-stacked im2col operand), cast to bf16 for the MXU.
    w = jnp.take(w_kco_ci, jnp.array(taps), axis=0)        # (n, Cout, Cin)
    n, co, ci = w.shape
    return jnp.transpose(w, (1, 0, 2)).reshape(co, n * ci).astype(jnp.bfloat16)


def cnn_model_forward(params, seq, t):
    """seq: (B, L, INP_SIZE) expanded-simplex features, t: (B,) timesteps.
       Returns logits (B, L, ALPHABET)."""
    B, L, _ = seq.shape

    # Tiny time path (glue): GaussianFourierProjection -> Linear -> ReLU, then
    # all NUM_LAYERS per-layer Dense projections as ONE stacked matmul.
    xp = t[:, None] * params["gfp_W"][None, :] * (2.0 * math.pi)
    fourier = jnp.concatenate([jnp.sin(xp), jnp.cos(xp)], axis=-1)          # (B, H)
    time_emb = jax.nn.relu(fourier @ params["time_w"] + params["time_b"])   # (B, H)
    tproj = (time_emb @ params["tl_w"] + params["tl_b"]).reshape(
        B, NUM_LAYERS, HIDDEN, 1)

    # Statically valid taps per conv and the pad width (multiple of 128 so the
    # per-layer data-window store stays lane-aligned -- do NOT shrink to 64).
    in_taps = _valid_taps(1, L)
    layer_taps = tuple(_valid_taps(DILATIONS[i // NUM_STACKS], L)
                       for i in range(NUM_LAYERS))
    max_off = max([abs((k - KSIZE // 2) * DILATIONS[i // NUM_STACKS])
                   for i in range(NUM_LAYERS) for k in layer_taps[i]]
                  + [abs(k - KSIZE // 2) for k in in_taps])
    padw = max(128, -(-max_off // 128) * 128)
    assert padw >= max_off  # every kept tap's im2col slice is in-bounds

    # bf16 matmul operands; biases / LayerNorm params / time proj stay f32.
    seq_ncl = jnp.transpose(seq, (0, 2, 1)).astype(jnp.bfloat16)            # (B,C,L)
    in_w_flat = _flatten_conv_weight(params["in_w"], in_taps)               # (32,72)
    cv_w_flat = [_flatten_conv_weight(params["cv_w"][i], layer_taps[i])
                 for i in range(NUM_LAYERS)]                                # (32,288|96)
    f1_w = params["f1_w"].astype(jnp.bfloat16)
    f2_w = params["f2_w"].astype(jnp.bfloat16)

    def full(a):  # whole-array block, resident across the grid
        return pl.BlockSpec(a.shape, lambda b, nd=a.ndim: (0,) * nd)

    out_ncl = pl.pallas_call(
        functools.partial(_cnn_fused_kernel, padw=padw,
                          in_taps=in_taps, layer_taps=layer_taps),
        out_shape=jax.ShapeDtypeStruct((B, ALPHABET, L), jnp.float32),
        grid=(B,),
        in_specs=[
            pl.BlockSpec((1, INP_SIZE, L), lambda b: (b, 0, 0)),
            pl.BlockSpec((1, NUM_LAYERS, HIDDEN, 1), lambda b: (b, 0, 0, 0)),
            full(in_w_flat), full(params["in_b"]),
            *[full(w) for w in cv_w_flat],
            full(params["cv_b"]), full(params["ln_g"]), full(params["ln_b"]),
            full(f1_w), full(params["f1_b"]), full(f2_w), full(params["f2_b"]),
        ],
        out_specs=pl.BlockSpec((1, ALPHABET, L), lambda b: (b, 0, 0)),
        scratch_shapes=[pltpu.VMEM((HIDDEN, L + 2 * padw), jnp.bfloat16)],
        compiler_params=pltpu.CompilerParams(dimension_semantics=("parallel",)),
    )(seq_ncl, tproj, in_w_flat, params["in_b"], *cv_w_flat,
      params["cv_b"], params["ln_g"], params["ln_b"],
      f1_w, params["f1_b"], f2_w, params["f2_b"])

    # back to (B, L, alphabet), matching the PyTorch module's final permute
    return jnp.transpose(out_ncl, (0, 2, 1))


# ---------------------------------- main ------------------------------------ #

if __name__ == "__main__":
    key = jax.random.PRNGKey(0)
    pkey, skey, tkey = jax.random.split(key, 3)
    params = init_params(pkey)

    B, L = 2, 128
    seq = jax.nn.softmax(jax.random.normal(skey, (B, L, INP_SIZE), jnp.float32),
                         axis=-1)
    t = jax.random.uniform(tkey, (B,), jnp.float32)

    fwd = jax.jit(cnn_model_forward)
    out = fwd(params, seq, t)
    jax.block_until_ready(out)
    assert out.shape == (B, L, ALPHABET), out.shape
    assert out.dtype == jnp.float32
    assert bool(jnp.isfinite(out).all())
    print("KERNEL_OK")
</pallas_src>

<mosaic_0001>
module attributes {stable_mosaic.version = 11 : i64} {
  func.func @_cnn_fused_kernel(%arg0: i32, %arg1: memref<1x8x128xbf16, #tpu.memory_space<vmem>>, %arg2: memref<1x5x32x1xf32, #tpu.memory_space<vmem>>, %arg3: memref<32x72xbf16, #tpu.memory_space<vmem>>, %arg4: memref<32x1xf32, #tpu.memory_space<vmem>>, %arg5: memref<32x288xbf16, #tpu.memory_space<vmem>>, %arg6: memref<32x288xbf16, #tpu.memory_space<vmem>>, %arg7: memref<32x288xbf16, #tpu.memory_space<vmem>>, %arg8: memref<32x288xbf16, #tpu.memory_space<vmem>>, %arg9: memref<32x96xbf16, #tpu.memory_space<vmem>>, %arg10: memref<5x32x1xf32, #tpu.memory_space<vmem>>, %arg11: memref<5x32x1xf32, #tpu.memory_space<vmem>>, %arg12: memref<5x32x1xf32, #tpu.memory_space<vmem>>, %arg13: memref<32x32xbf16, #tpu.memory_space<vmem>>, %arg14: memref<32x1xf32, #tpu.memory_space<vmem>>, %arg15: memref<4x32xbf16, #tpu.memory_space<vmem>>, %arg16: memref<4x1xf32, #tpu.memory_space<vmem>>, %arg17: memref<1x4x128xf32, #tpu.memory_space<vmem>>, %arg18: memref<32x384xbf16, #tpu.memory_space<vmem>>) attributes {dimension_semantics = [#tpu.dimension_semantics<parallel>], iteration_bounds = array<i64: 2>, scalar_prefetch = 0 : i64, scratch_operands = 1 : i64, tpu.core_type = #tpu.core_type<tc>, window_params = [{transform_indices = @transform_0, window_bounds = array<i64: 1, 8, 128>}, {transform_indices = @transform_1, window_bounds = array<i64: 1, 5, 32, 1>}, {pipeline_mode = #tpu.pipeline_mode<synchronous>, transform_indices = @transform_2, window_bounds = array<i64: 32, 72>}, {pipeline_mode = #tpu.pipeline_mode<synchronous>, transform_indices = @transform_3, window_bounds = array<i64: 32, 1>}, {pipeline_mode = #tpu.pipeline_mode<synchronous>, transform_indices = @transform_4, window_bounds = array<i64: 32, 288>}, {pipeline_mode = #tpu.pipeline_mode<synchronous>, transform_indices = @transform_5, window_bounds = array<i64: 32, 288>}, {pipeline_mode = #tpu.pipeline_mode<synchronous>, transform_indices = @transform_6, window_bounds = array<i64: 32, 288>}, {pipeline_mode = #tpu.pipeline_mode<synchronous>, transform_indices = @transform_7, window_bounds = array<i64: 32, 288>}, {pipeline_mode = #tpu.pipeline_mode<synchronous>, transform_indices = @transform_8, window_bounds = array<i64: 32, 96>}, {pipeline_mode = #tpu.pipeline_mode<synchronous>, transform_indices = @transform_9, window_bounds = array<i64: 5, 32, 1>}, {pipeline_mode = #tpu.pipeline_mode<synchronous>, transform_indices = @transform_10, window_bounds = array<i64: 5, 32, 1>}, {pipeline_mode = #tpu.pipeline_mode<synchronous>, transform_indices = @transform_11, window_bounds = array<i64: 5, 32, 1>}, {pipeline_mode = #tpu.pipeline_mode<synchronous>, transform_indices = @transform_12, window_bounds = array<i64: 32, 32>}, {pipeline_mode = #tpu.pipeline_mode<synchronous>, transform_indices = @transform_13, window_bounds = array<i64: 32, 1>}, {pipeline_mode = #tpu.pipeline_mode<synchronous>, transform_indices = @transform_14, window_bounds = array<i64: 4, 32>}, {pipeline_mode = #tpu.pipeline_mode<synchronous>, transform_indices = @transform_15, window_bounds = array<i64: 4, 1>}, {transform_indices = @transform_16, window_bounds = array<i64: 1, 4, 128>}]} {
    %cst = arith.constant 0.000000e+00 : bf16
    %0 = vector.broadcast %cst : bf16 to vector<32x128xbf16>
    %c0 = arith.constant 0 : index
    %c0_0 = arith.constant 0 : index
    %1 = vector.load %arg18[%c0, %c0_0] : memref<32x384xbf16, #tpu.memory_space<vmem>>, vector<32x128xbf16>
    tpu.vector_store %arg18[%c0, %c0_0], %0 {strides = array<i32>} : memref<32x384xbf16, #tpu.memory_space<vmem>>, vector<32x128xbf16>,
    %c0_1 = arith.constant 0 : index
    %c256 = arith.constant 256 : index
    %2 = vector.load %arg18[%c0_1, %c256] : memref<32x384xbf16, #tpu.memory_space<vmem>>, vector<32x128xbf16>
    tpu.vector_store %arg18[%c0_1, %c256], %0 {strides = array<i32>} : memref<32x384xbf16, #tpu.memory_space<vmem>>, vector<32x128xbf16>,
    %c0_2 = arith.constant 0 : index
    %c0_3 = arith.constant 0 : index
    %c0_4 = arith.constant 0 : index
    %3 = vector.load %arg1[%c0_2, %c0_3, %c0_4] : memref<1x8x128xbf16, #tpu.memory_space<vmem>>, vector<1x8x128xbf16>
    %4 = vector.shape_cast %3 : vector<1x8x128xbf16> to vector<8x128xbf16>
    %c0_5 = arith.constant 0 : index
    %c128 = arith.constant 128 : index
    %5 = vector.load %arg18[%c0_5, %c128] : memref<32x384xbf16, #tpu.memory_space<vmem>>, vector<8x128xbf16>
    tpu.vector_store %arg18[%c0_5, %c128], %4 {strides = array<i32>} : memref<32x384xbf16, #tpu.memory_space<vmem>>, vector<8x128xbf16>,
    %c0_6 = arith.constant 0 : index
    %c124 = arith.constant 124 : index
    %6 = vector.load %arg18[%c0_6, %c124] : memref<32x384xbf16, #tpu.memory_space<vmem>>, vector<8x128xbf16>
    %c0_7 = arith.constant 0 : index
    %c125 = arith.constant 125 : index
    %7 = vector.load %arg18[%c0_7, %c125] : memref<32x384xbf16, #tpu.memory_space<vmem>>, vector<8x128xbf16>
    %c0_8 = arith.constant 0 : index
    %c126 = arith.constant 126 : index
    %8 = vector.load %arg18[%c0_8, %c126] : memref<32x384xbf16, #tpu.memory_space<vmem>>, vector<8x128xbf16>
    %c0_9 = arith.constant 0 : index
    %c127 = arith.constant 127 : index
    %9 = vector.load %arg18[%c0_9, %c127] : memref<32x384xbf16, #tpu.memory_space<vmem>>, vector<8x128xbf16>
    %c0_10 = arith.constant 0 : index
    %c128_11 = arith.constant 128 : index
    %10 = vector.load %arg18[%c0_10, %c128_11] : memref<32x384xbf16, #tpu.memory_space<vmem>>, vector<8x128xbf16>
    %c0_12 = arith.constant 0 : index
    %c129 = arith.constant 129 : index
    %11 = vector.load %arg18[%c0_12, %c129] : memref<32x384xbf16, #tpu.memory_space<vmem>>, vector<8x128xbf16>
    %c0_13 = arith.constant 0 : index
    %c130 = arith.constant 130 : index
    %12 = vector.load %arg18[%c0_13, %c130] : memref<32x384xbf16, #tpu.memory_space<vmem>>, vector<8x128xbf16>
    %c0_14 = arith.constant 0 : index
    %c131 = arith.constant 131 : index
    %13 = vector.load %arg18[%c0_14, %c131] : memref<32x384xbf16, #tpu.memory_space<vmem>>, vector<8x128xbf16>
    %c0_15 = arith.constant 0 : index
    %c132 = arith.constant 132 : index
    %14 = vector.load %arg18[%c0_15, %c132] : memref<32x384xbf16, #tpu.memory_space<vmem>>, vector<8x128xbf16>
    %15 = tpu.concatenate %6, %7, %8, %9, %10, %11, %12, %13, %14 in 0 : vector<8x128xbf16>, vector<8x128xbf16>, vector<8x128xbf16>, vector<8x128xbf16>, vector<8x128xbf16>, vector<8x128xbf16>, vector<8x128xbf16>, vector<8x128xbf16>, vector<8x128xbf16> -> vector<72x128xbf16>
    %c0_16 = arith.constant 0 : index
    %c0_17 = arith.constant 0 : index
    %16 = vector.load %arg3[%c0_16, %c0_17] : memref<32x72xbf16, #tpu.memory_space<vmem>>, vector<32x72xbf16>
    %cst_18 = arith.constant dense<0.000000e+00> : vector<32x128xf32>
    %17 = tpu.matmul %16, %15, %cst_18 {dimension_numbers = #tpu.dot_dimension_numbers<[1], [0], [0], [1], [0, 0, 1, 1], [], []>} : vector<32x72xbf16>, vector<72x128xbf16>, vector<32x128xf32> -> vector<32x128xf32>
    %c0_19 = arith.constant 0 : index
    %c0_20 = arith.constant 0 : index
    %18 = vector.load %arg4[%c0_19, %c0_20] : memref<32x1xf32, #tpu.memory_space<vmem>>, vector<32x1xf32>
    %19 = vector.broadcast %18 : vector<32x1xf32> to vector<32x128xf32>
    %20 = arith.addf %17, %19 : vector<32x128xf32>
    %cst_21 = arith.constant 0.000000e+00 : f32
    %21 = vector.broadcast %cst_21 : f32 to vector<32x128xf32>
    %22 = arith.maximumf %20, %21 : vector<32x128xf32>
    %c0_22 = arith.constant 0 : index
    %c0_23 = arith.constant 0 : index
    %c0_24 = arith.constant 0 : index
    %c0_25 = arith.constant 0 : index
    %23 = vector.load %arg2[%c0_22, %c0_23, %c0_24, %c0_25] : memref<1x5x32x1xf32, #tpu.memory_space<vmem>>, vector<1x1x32x1xf32>
    %24 = vector.shape_cast %23 : vector<1x1x32x1xf32> to vector<32x1xf32>
    %25 = vector.broadcast %24 : vector<32x1xf32> to vector<32x128xf32>
    %26 = arith.addf %22, %25 : vector<32x128xf32>
    %cst_26 = arith.constant dense<0.000000e+00> : vector<128xf32>
    %27 = vector.multi_reduction <add>, %26, %cst_26 [0] : vector<32x128xf32> to vector<128xf32>
    %28 = vector.shape_cast %27 : vector<128xf32> to vector<1x128xf32>
    %cst_27 = arith.constant 3.200000e+01 : f32
    %29 = vector.broadcast %cst_27 : f32 to vector<1x128xf32>
    %30 = arith.divf %28, %29 : vector<1x128xf32>
    %31 = arith.mulf %26, %26 : vector<32x128xf32>
    %cst_28 = arith.constant dense<0.000000e+00> : vector<128xf32>
    %32 = vector.multi_reduction <add>, %31, %cst_28 [0] : vector<32x128xf32> to vector<128xf32>
    %33 = vector.shape_cast %32 : vector<128xf32> to vector<1x128xf32>
    %cst_29 = arith.constant 3.200000e+01 : f32
    %34 = vector.broadcast %cst_29 : f32 to vector<1x128xf32>
    %35 = arith.divf %33, %34 : vector<1x128xf32>
    %36 = vector.broadcast %30 : vector<1x128xf32> to vector<32x128xf32>
    %37 = arith.subf %26, %36 : vector<32x128xf32>
    %38 = arith.mulf %30, %30 : vector<1x128xf32>
    %39 = arith.subf %35, %38 : vector<1x128xf32>
    %cst_30 = arith.constant 9.99999974E-6 : f32
    %40 = vector.broadcast %cst_30 : f32 to vector<1x128xf32>
    %41 = arith.addf %39, %40 : vector<1x128xf32>
    %42 = math.rsqrt %41 : vector<1x128xf32>
    %43 = vector.broadcast %42 : vector<1x128xf32> to vector<32x128xf32>
    %44 = arith.mulf %37, %43 : vector<32x128xf32>
    %c0_31 = arith.constant 0 : index
    %c0_32 = arith.constant 0 : index
    %c0_33 = arith.constant 0 : index
    %45 = vector.load %arg11[%c0_31, %c0_32, %c0_33] : memref<5x32x1xf32, #tpu.memory_space<vmem>>, vector<1x32x1xf32>
    %46 = vector.shape_cast %45 : vector<1x32x1xf32> to vector<32x1xf32>
    %47 = vector.broadcast %46 : vector<32x1xf32> to vector<32x128xf32>
    %48 = arith.mulf %44, %47 : vector<32x128xf32>
    %c0_34 = arith.constant 0 : index
    %c0_35 = arith.constant 0 : index
    %c0_36 = arith.constant 0 : index
    %49 = vector.load %arg12[%c0_34, %c0_35, %c0_36] : memref<5x32x1xf32, #tpu.memory_space<vmem>>, vector<1x32x1xf32>
    %50 = vector.shape_cast %49 : vector<1x32x1xf32> to vector<32x1xf32>
    %51 = vector.broadcast %50 : vector<32x1xf32> to vector<32x128xf32>
    %52 = arith.addf %48, %51 : vector<32x128xf32>
    %53 = arith.truncf %52 : vector<32x128xf32> to vector<32x128xbf16>
    %c0_37 = arith.constant 0 : index
    %c128_38 = arith.constant 128 : index
    %54 = vector.load %arg18[%c0_37, %c128_38] : memref<32x384xbf16, #tpu.memory_space<vmem>>, vector<32x128xbf16>
    tpu.vector_store %arg18[%c0_37, %c128_38], %53 {strides = array<i32>} : memref<32x384xbf16, #tpu.memory_space<vmem>>, vector<32x128xbf16>,
    %c0_39 = arith.constant 0 : index
    %c124_40 = arith.constant 124 : index
    %55 = vector.load %arg18[%c0_39, %c124_40] : memref<32x384xbf16, #tpu.memory_space<vmem>>, vector<32x128xbf16>
    %c0_41 = arith.constant 0 : index
    %c125_42 = arith.constant 125 : index
    %56 = vector.load %arg18[%c0_41, %c125_42] : memref<32x384xbf16, #tpu.memory_space<vmem>>, vector<32x128xbf16>
    %c0_43 = arith.constant 0 : index
    %c126_44 = arith.constant 126 : index
    %57 = vector.load %arg18[%c0_43, %c126_44] : memref<32x384xbf16, #tpu.memory_space<vmem>>, vector<32x128xbf16>
    %c0_45 = arith.constant 0 : index
    %c127_46 = arith.constant 127 : index
    %58 = vector.load %arg18[%c0_45, %c127_46] : memref<32x384xbf16, #tpu.memory_space<vmem>>, vector<32x128xbf16>
    %c0_47 = arith.constant 0 : index
    %c128_48 = arith.constant 128 : index
    %59 = vector.load %arg18[%c0_47, %c128_48] : memref<32x384xbf16, #tpu.memory_space<vmem>>, vector<32x128xbf16>
    %c0_49 = arith.constant 0 : index
    %c129_50 = arith.constant 129 : index
    %60 = vector.load %arg18[%c0_49, %c129_50] : memref<32x384xbf16, #tpu.memory_space<vmem>>, vector<32x128xbf16>
    %c0_51 = arith.constant 0 : index
    %c130_52 = arith.constant 130 : index
    %61 = vector.load %arg18[%c0_51, %c130_52] : memref<32x384xbf16, #tpu.memory_space<vmem>>, vector<32x128xbf16>
    %c0_53 = arith.constant 0 : index
    %c131_54 = arith.constant 131 : index
    %62 = vector.load %arg18[%c0_53, %c131_54] : memref<32x384xbf16, #tpu.memory_space<vmem>>, vector<32x128xbf16>
    %c0_55 = arith.constant 0 : index
    %c132_56 = arith.constant 132 : index
    %63 = vector.load %arg18[%c0_55, %c132_56] : memref<32x384xbf16, #tpu.memory_space<vmem>>, vector<32x128xbf16>
    %64 = tpu.concatenate %55, %56, %57, %58, %59, %60, %61, %62, %63 in 0 : vector<32x128xbf16>, vector<32x128xbf16>, vector<32x128xbf16>, vector<32x128xbf16>, vector<32x128xbf16>, vector<32x128xbf16>, vector<32x128xbf16>, vector<32x128xbf16>, vector<32x128xbf16> -> vector<288x128xbf16>
    %c0_57 = arith.constant 0 : index
    %c0_58 = arith.constant 0 : index
    %65 = vector.load %arg5[%c0_57, %c0_58] : memref<32x288xbf16, #tpu.memory_space<vmem>>, vector<32x288xbf16>
    %cst_59 = arith.constant dense<0.000000e+00> : vector<32x128xf32>
    %66 = tpu.matmul %65, %64, %cst_59 {dimension_numbers = #tpu.dot_dimension_numbers<[1], [0], [0], [1], [0, 0, 1, 1], [], []>} : vector<32x288xbf16>, vector<288x128xbf16>, vector<32x128xf32> -> vector<32x128xf32>
    %c0_60 = arith.constant 0 : index
    %c0_61 = arith.constant 0 : index
    %c0_62 = arith.constant 0 : index
    %67 = vector.load %arg10[%c0_60, %c0_61, %c0_62] : memref<5x32x1xf32, #tpu.memory_space<vmem>>, vector<1x32x1xf32>
    %68 = vector.shape_cast %67 : vector<1x32x1xf32> to vector<32x1xf32>
    %69 = vector.broadcast %68 : vector<32x1xf32> to vector<32x128xf32>
    %70 = arith.addf %66, %69 : vector<32x128xf32>
    %cst_63 = arith.constant 0.000000e+00 : f32
    %71 = vector.broadcast %cst_63 : f32 to vector<32x128xf32>
    %72 = arith.maximumf %70, %71 : vector<32x128xf32>
    %73 = arith.addf %72, %22 : vector<32x128xf32>
    %c0_64 = arith.constant 0 : index
    %c1 = arith.constant 1 : index
    %c0_65 = arith.constant 0 : index
    %c0_66 = arith.constant 0 : index
    %74 = vector.load %arg2[%c0_64, %c1, %c0_65, %c0_66] : memref<1x5x32x1xf32, #tpu.memory_space<vmem>>, vector<1x1x32x1xf32>
    %75 = vector.shape_cast %74 : vector<1x1x32x1xf32> to vector<32x1xf32>
    %76 = vector.broadcast %75 : vector<32x1xf32> to vector<32x128xf32>
    %77 = arith.addf %73, %76 : vector<32x128xf32>
    %cst_67 = arith.constant dense<0.000000e+00> : vector<128xf32>
    %78 = vector.multi_reduction <add>, %77, %cst_67 [0] : vector<32x128xf32> to vector<128xf32>
    %79 = vector.shape_cast %78 : vector<128xf32> to vector<1x128xf32>
    %cst_68 = arith.constant 3.200000e+01 : f32
    %80 = vector.broadcast %cst_68 : f32 to vector<1x128xf32>
    %81 = arith.divf %79, %80 : vector<1x128xf32>
    %82 = arith.mulf %77, %77 : vector<32x128xf32>
    %cst_69 = arith.constant dense<0.000000e+00> : vector<128xf32>
    %83 = vector.multi_reduction <add>, %82, %cst_69 [0] : vector<32x128xf32> to vector<128xf32>
    %84 = vector.shape_cast %83 : vector<128xf32> to vector<1x128xf32>
    %cst_70 = arith.constant 3.200000e+01 : f32
    %85 = vector.broadcast %cst_70 : f32 to vector<1x128xf32>
    %86 = arith.divf %84, %85 : vector<1x128xf32>
    %87 = vector.broadcast %81 : vector<1x128xf32> to vector<32x128xf32>
    %88 = arith.subf %77, %87 : vector<32x128xf32>
    %89 = arith.mulf %81, %81 : vector<1x128xf32>
    %90 = arith.subf %86, %89 : vector<1x128xf32>
    %cst_71 = arith.constant 9.99999974E-6 : f32
    %91 = vector.broadcast %cst_71 : f32 to vector<1x128xf32>
    %92 = arith.addf %90, %91 : vector<1x128xf32>
    %93 = math.rsqrt %92 : vector<1x128xf32>
    %94 = vector.broadcast %93 : vector<1x128xf32> to vector<32x128xf32>
    %95 = arith.mulf %88, %94 : vector<32x128xf32>
    %c1_72 = arith.constant 1 : index
    %c0_73 = arith.constant 0 : index
    %c0_74 = arith.constant 0 : index
    %96 = vector.load %arg11[%c1_72, %c0_73, %c0_74] : memref<5x32x1xf32, #tpu.memory_space<vmem>>, vector<1x32x1xf32>
    %97 = vector.shape_cast %96 : vector<1x32x1xf32> to vector<32x1xf32>
    %98 = vector.broadcast %97 : vector<32x1xf32> to vector<32x128xf32>
    %99 = arith.mulf %95, %98 : vector<32x128xf32>
    %c1_75 = arith.constant 1 : index
    %c0_76 = arith.constant 0 : index
    %c0_77 = arith.constant 0 : index
    %100 = vector.load %arg12[%c1_75, %c0_76, %c0_77] : memref<5x32x1xf32, #tpu.memory_space<vmem>>, vector<1x32x1xf32>
    %101 = vector.shape_cast %100 : vector<1x32x1xf32> to vector<32x1xf32>
    %102 = vector.broadcast %101 : vector<32x1xf32> to vector<32x128xf32>
    %103 = arith.addf %99, %102 : vector<32x128xf32>
    %104 = arith.truncf %103 : vector<32x128xf32> to vector<32x128xbf16>
    %c0_78 = arith.constant 0 : index
    %c128_79 = arith.constant 128 : index
    %105 = vector.load %arg18[%c0_78, %c128_79] : memref<32x384xbf16, #tpu.memory_space<vmem>>, vector<32x128xbf16>
    tpu.vector_store %arg18[%c0_78, %c128_79], %104 {strides = array<i32>} : memref<32x384xbf16, #tpu.memory_space<vmem>>, vector<32x128xbf16>,
    %c0_80 = arith.constant 0 : index
    %c124_81 = arith.constant 124 : index
    %106 = vector.load %arg18[%c0_80, %c124_81] : memref<32x384xbf16, #tpu.memory_space<vmem>>, vector<32x128xbf16>
    %c0_82 = arith.constant 0 : index
    %c125_83 = arith.constant 125 : index
    %107 = vector.load %arg18[%c0_82, %c125_83] : memref<32x384xbf16, #tpu.memory_space<vmem>>, vector<32x128xbf16>
    %c0_84 = arith.constant 0 : index
    %c126_85 = arith.constant 126 : index
    %108 = vector.load %arg18[%c0_84, %c126_85] : memref<32x384xbf16, #tpu.memory_space<vmem>>, vector<32x128xbf16>
    %c0_86 = arith.constant 0 : index
    %c127_87 = arith.constant 127 : index
    %109 = vector.load %arg18[%c0_86, %c127_87] : memref<32x384xbf16, #tpu.memory_space<vmem>>, vector<32x128xbf16>
    %c0_88 = arith.constant 0 : index
    %c128_89 = arith.constant 128 : index
    %110 = vector.load %arg18[%c0_88, %c128_89] : memref<32x384xbf16, #tpu.memory_space<vmem>>, vector<32x128xbf16>
    %c0_90 = arith.constant 0 : index
    %c129_91 = arith.constant 129 : index
    %111 = vector.load %arg18[%c0_90, %c129_91] : memref<32x384xbf16, #tpu.memory_space<vmem>>, vector<32x128xbf16>
    %c0_92 = arith.constant 0 : index
    %c130_93 = arith.constant 130 : index
    %112 = vector.load %arg18[%c0_92, %c130_93] : memref<32x384xbf16, #tpu.memory_space<vmem>>, vector<32x128xbf16>
    %c0_94 = arith.constant 0 : index
    %c131_95 = arith.constant 131 : index
    %113 = vector.load %arg18[%c0_94, %c131_95] : memref<32x384xbf16, #tpu.memory_space<vmem>>, vector<32x128xbf16>
    %c0_96 = arith.constant 0 : index
    %c132_97 = arith.constant 132 : index
    %114 = vector.load %arg18[%c0_96, %c132_97] : memref<32x384xbf16, #tpu.memory_space<vmem>>, vector<32x128xbf16>
    %115 = tpu.concatenate %106, %107, %108, %109, %110, %111, %112, %113, %114 in 0 : vector<32x128xbf16>, vector<32x128xbf16>, vector<32x128xbf16>, vector<32x128xbf16>, vector<32x128xbf16>, vector<32x128xbf16>, vector<32x128xbf16>, vector<32x128xbf16>, vector<32x128xbf16> -> vector<288x128xbf16>
    %c0_98 = arith.constant 0 : index
    %c0_99 = arith.constant 0 : index
    %116 = vector.load %arg6[%c0_98, %c0_99] : memref<32x288xbf16, #tpu.memory_space<vmem>>, vector<32x288xbf16>
    %cst_100 = arith.constant dense<0.000000e+00> : vector<32x128xf32>
    %117 = tpu.matmul %116, %115, %cst_100 {dimension_numbers = #tpu.dot_dimension_numbers<[1], [0], [0], [1], [0, 0, 1, 1], [], []>} : vector<32x288xbf16>, vector<288x128xbf16>, vector<32x128xf32> -> vector<32x128xf32>
    %c1_101 = arith.constant 1 : index
    %c0_102 = arith.constant 0 : index
    %c0_103 = arith.constant 0 : index
    %118 = vector.load %arg10[%c1_101, %c0_102, %c0_103] : memref<5x32x1xf32, #tpu.memory_space<vmem>>, vector<1x32x1xf32>
    %119 = vector.shape_cast %118 : vector<1x32x1xf32> to vector<32x1xf32>
    %120 = vector.broadcast %119 : vector<32x1xf32> to vector<32x128xf32>
    %121 = arith.addf %117, %120 : vector<32x128xf32>
    %cst_104 = arith.constant 0.000000e+00 : f32
    %122 = vector.broadcast %cst_104 : f32 to vector<32x128xf32>
    %123 = arith.maximumf %121, %122 : vector<32x128xf32>
    %124 = arith.addf %123, %73 : vector<32x128xf32>
    %c0_105 = arith.constant 0 : index
    %c2 = arith.constant 2 : index
    %c0_106 = arith.constant 0 : index
    %c0_107 = arith.constant 0 : index
    %125 = vector.load %arg2[%c0_105, %c2, %c0_106, %c0_107] : memref<1x5x32x1xf32, #tpu.memory_space<vmem>>, vector<1x1x32x1xf32>
    %126 = vector.shape_cast %125 : vector<1x1x32x1xf32> to vector<32x1xf32>
    %127 = vector.broadcast %126 : vector<32x1xf32> to vector<32x128xf32>
    %128 = arith.addf %124, %127 : vector<32x128xf32>
    %cst_108 = arith.constant dense<0.000000e+00> : vector<128xf32>
    %129 = vector.multi_reduction <add>, %128, %cst_108 [0] : vector<32x128xf32> to vector<128xf32>
    %130 = vector.shape_cast %129 : vector<128xf32> to vector<1x128xf32>
    %cst_109 = arith.constant 3.200000e+01 : f32
    %131 = vector.broadcast %cst_109 : f32 to vector<1x128xf32>
    %132 = arith.divf %130, %131 : vector<1x128xf32>
    %133 = arith.mulf %128, %128 : vector<32x128xf32>
    %cst_110 = arith.constant dense<0.000000e+00> : vector<128xf32>
    %134 = vector.multi_reduction <add>, %133, %cst_110 [0] : vector<32x128xf32> to vector<128xf32>
    %135 = vector.shape_cast %134 : vector<128xf32> to vector<1x128xf32>
    %cst_111 = arith.constant 3.200000e+01 : f32
    %136 = vector.broadcast %cst_111 : f32 to vector<1x128xf32>
    %137 = arith.divf %135, %136 : vector<1x128xf32>
    %138 = vector.broadcast %132 : vector<1x128xf32> to vector<32x128xf32>
    %139 = arith.subf %128, %138 : vector<32x128xf32>
    %140 = arith.mulf %132, %132 : vector<1x128xf32>
    %141 = arith.subf %137, %140 : vector<1x128xf32>
    %cst_112 = arith.constant 9.99999974E-6 : f32
    %142 = vector.broadcast %cst_112 : f32 to vector<1x128xf32>
    %143 = arith.addf %141, %142 : vector<1x128xf32>
    %144 = math.rsqrt %143 : vector<1x128xf32>
    %145 = vector.broadcast %144 : vector<1x128xf32> to vector<32x128xf32>
    %146 = arith.mulf %139, %145 : vector<32x128xf32>
    %c2_113 = arith.constant 2 : index
    %c0_114 = arith.constant 0 : index
    %c0_115 = arith.constant 0 : index
    %147 = vector.load %arg11[%c2_113, %c0_114, %c0_115] : memref<5x32x1xf32, #tpu.memory_space<vmem>>, vector<1x32x1xf32>
    %148 = vector.shape_cast %147 : vector<1x32x1xf32> to vector<32x1xf32>
    %149 = vector.broadcast %148 : vector<32x1xf32> to vector<32x128xf32>
    %150 = arith.mulf %146, %149 : vector<32x128xf32>
    %c2_116 = arith.constant 2 : index
    %c0_117 = arith.constant 0 : index
    %c0_118 = arith.constant 0 : index
    %151 = vector.load %arg12[%c2_116, %c0_117, %c0_118] : memref<5x32x1xf32, #tpu.memory_space<vmem>>, vector<1x32x1xf32>
    %152 = vector.shape_cast %151 : vector<1x32x1xf32> to vector<32x1xf32>
    %153 = vector.broadcast %152 : vector<32x1xf32> to vector<32x128xf32>
    %154 = arith.addf %150, %153 : vector<32x128xf32>
    %155 = arith.truncf %154 : vector<32x128xf32> to vector<32x128xbf16>
    %c0_119 = arith.constant 0 : index
    %c128_120 = arith.constant 128 : index
    %156 = vector.load %arg18[%c0_119, %c128_120] : memref<32x384xbf16, #tpu.memory_space<vmem>>, vector<32x128xbf16>
    tpu.vector_store %arg18[%c0_119, %c128_120], %155 {strides = array<i32>} : memref<32x384xbf16, #tpu.memory_space<vmem>>, vector<32x128xbf16>,
    %c0_121 = arith.constant 0 : index
    %c112 = arith.constant 112 : index
    %157 = vector.load %arg18[%c0_121, %c112] : memref<32x384xbf16, #tpu.memory_space<vmem>>, vector<32x128xbf16>
    %c0_122 = arith.constant 0 : index
    %c116 = arith.constant 116 : index
    %158 = vector.load %arg18[%c0_122, %c116] : memref<32x384xbf16, #tpu.memory_space<vmem>>, vector<32x128xbf16>
    %c0_123 = arith.constant 0 : index
    %c120 = arith.constant 120 : index
    %159 = vector.load %arg18[%c0_123, %c120] : memref<32x384xbf16, #tpu.memory_space<vmem>>, vector<32x128xbf16>
    %c0_124 = arith.constant 0 : index
    %c124_125 = arith.constant 124 : index
    %160 = vector.load %arg18[%c0_124, %c124_125] : memref<32x384xbf16, #tpu.memory_space<vmem>>, vector<32x128xbf16>
    %c0_126 = arith.constant 0 : index
    %c128_127 = arith.constant 128 : index
    %161 = vector.load %arg18[%c0_126, %c128_127] : memref<32x384xbf16, #tpu.memory_space<vmem>>, vector<32x128xbf16>
    %c0_128 = arith.constant 0 : index
    %c132_129 = arith.constant 132 : index
    %162 = vector.load %arg18[%c0_128, %c132_129] : memref<32x384xbf16, #tpu.memory_space<vmem>>, vector<32x128xbf16>
    %c0_130 = arith.constant 0 : index
    %c136 = arith.constant 136 : index
    %163 = vector.load %arg18[%c0_130, %c136] : memref<32x384xbf16, #tpu.memory_space<vmem>>, vector<32x128xbf16>
    %c0_131 = arith.constant 0 : index
    %c140 = arith.constant 140 : index
    %164 = vector.load %arg18[%c0_131, %c140] : memref<32x384xbf16, #tpu.memory_space<vmem>>, vector<32x128xbf16>
    %c0_132 = arith.constant 0 : index
    %c144 = arith.constant 144 : index
    %165 = vector.load %arg18[%c0_132, %c144] : memref<32x384xbf16, #tpu.memory_space<vmem>>, vector<32x128xbf16>
    %166 = tpu.concatenate %157, %158, %159, %160, %161, %162, %163, %164, %165 in 0 : vector<32x128xbf16>, vector<32x128xbf16>, vector<32x128xbf16>, vector<32x128xbf16>, vector<32x128xbf16>, vector<32x128xbf16>, vector<32x128xbf16>, vector<32x128xbf16>, vector<32x128xbf16> -> vector<288x128xbf16>
    %c0_133 = arith.constant 0 : index
    %c0_134 = arith.constant 0 : index
    %167 = vector.load %arg7[%c0_133, %c0_134] : memref<32x288xbf16, #tpu.memory_space<vmem>>, vector<32x288xbf16>
    %cst_135 = arith.constant dense<0.000000e+00> : vector<32x128xf32>
    %168 = tpu.matmul %167, %166, %cst_135 {dimension_numbers = #tpu.dot_dimension_numbers<[1], [0], [0], [1], [0, 0, 1, 1], [], []>} : vector<32x288xbf16>, vector<288x128xbf16>, vector<32x128xf32> -> vector<32x128xf32>
    %c2_136 = arith.constant 2 : index
    %c0_137 = arith.constant 0 : index
    %c0_138 = arith.constant 0 : index
    %169 = vector.load %arg10[%c2_136, %c0_137, %c0_138] : memref<5x32x1xf32, #tpu.memory_space<vmem>>, vector<1x32x1xf32>
    %170 = vector.shape_cast %169 : vector<1x32x1xf32> to vector<32x1xf32>
    %171 = vector.broadcast %170 : vector<32x1xf32> to vector<32x128xf32>
    %172 = arith.addf %168, %171 : vector<32x128xf32>
    %cst_139 = arith.constant 0.000000e+00 : f32
    %173 = vector.broadcast %cst_139 : f32 to vector<32x128xf32>
    %174 = arith.maximumf %172, %173 : vector<32x128xf32>
    %175 = arith.addf %174, %124 : vector<32x128xf32>
    %c0_140 = arith.constant 0 : index
    %c3 = arith.constant 3 : index
    %c0_141 = arith.constant 0 : index
    %c0_142 = arith.constant 0 : index
    %176 = vector.load %arg2[%c0_140, %c3, %c0_141, %c0_142] : memref<1x5x32x1xf32, #tpu.memory_space<vmem>>, vector<1x1x32x1xf32>
    %177 = vector.shape_cast %176 : vector<1x1x32x1xf32> to vector<32x1xf32>
    %178 = vector.broadcast %177 : vector<32x1xf32> to vector<32x128xf32>
    %179 = arith.addf %175, %178 : vector<32x128xf32>
    %cst_143 = arith.constant dense<0.000000e+00> : vector<128xf32>
    %180 = vector.multi_reduction <add>, %179, %cst_143 [0] : vector<32x128xf32> to vector<128xf32>
    %181 = vector.shape_cast %180 : vector<128xf32> to vector<1x128xf32>
    %cst_144 = arith.constant 3.200000e+01 : f32
    %182 = vector.broadcast %cst_144 : f32 to vector<1x128xf32>
    %183 = arith.divf %181, %182 : vector<1x128xf32>
    %184 = arith.mulf %179, %179 : vector<32x128xf32>
    %cst_145 = arith.constant dense<0.000000e+00> : vector<128xf32>
    %185 = vector.multi_reduction <add>, %184, %cst_145 [0] : vector<32x128xf32> to vector<128xf32>
    %186 = vector.shape_cast %185 : vector<128xf32> to vector<1x128xf32>
    %cst_146 = arith.constant 3.200000e+01 : f32
    %187 = vector.broadcast %cst_146 : f32 to vector<1x128xf32>
    %188 = arith.divf %186, %187 : vector<1x128xf32>
    %189 = vector.broadcast %183 : vector<1x128xf32> to vector<32x128xf32>
    %190 = arith.subf %179, %189 : vector<32x128xf32>
    %191 = arith.mulf %183, %183 : vector<1x128xf32>
    %192 = arith.subf %188, %191 : vector<1x128xf32>
    %cst_147 = arith.constant 9.99999974E-6 : f32
    %193 = vector.broadcast %cst_147 : f32 to vector<1x128xf32>
    %194 = arith.addf %192, %193 : vector<1x128xf32>
    %195 = math.rsqrt %194 : vector<1x128xf32>
    %196 = vector.broadcast %195 : vector<1x128xf32> to vector<32x128xf32>
    %197 = arith.mulf %190, %196 : vector<32x128xf32>
    %c3_148 = arith.constant 3 : index
    %c0_149 = arith.constant 0 : index
    %c0_150 = arith.constant 0 : index
    %198 = vector.load %arg11[%c3_148, %c0_149, %c0_150] : memref<5x32x1xf32, #tpu.memory_space<vmem>>, vector<1x32x1xf32>
    %199 = vector.shape_cast %198 : vector<1x32x1xf32> to vector<32x1xf32>
    %200 = vector.broadcast %199 : vector<32x1xf32> to vector<32x128xf32>
    %201 = arith.mulf %197, %200 : vector<32x128xf32>
    %c3_151 = arith.constant 3 : index
    %c0_152 = arith.constant 0 : index
    %c0_153 = arith.constant 0 : index
    %202 = vector.load %arg12[%c3_151, %c0_152, %c0_153] : memref<5x32x1xf32, #tpu.memory_space<vmem>>, vector<1x32x1xf32>
    %203 = vector.shape_cast %202 : vector<1x32x1xf32> to vector<32x1xf32>
    %204 = vector.broadcast %203 : vector<32x1xf32> to vector<32x128xf32>
    %205 = arith.addf %201, %204 : vector<32x128xf32>
    %206 = arith.truncf %205 : vector<32x128xf32> to vector<32x128xbf16>
    %c0_154 = arith.constant 0 : index
    %c128_155 = arith.constant 128 : index
    %207 = vector.load %arg18[%c0_154, %c128_155] : memref<32x384xbf16, #tpu.memory_space<vmem>>, vector<32x128xbf16>
    tpu.vector_store %arg18[%c0_154, %c128_155], %206 {strides = array<i32>} : memref<32x384xbf16, #tpu.memory_space<vmem>>, vector<32x128xbf16>,
    %c0_156 = arith.constant 0 : index
    %c64 = arith.constant 64 : index
    %208 = vector.load %arg18[%c0_156, %c64] : memref<32x384xbf16, #tpu.memory_space<vmem>>, vector<32x128xbf16>
    %c0_157 = arith.constant 0 : index
    %c80 = arith.constant 80 : index
    %209 = vector.load %arg18[%c0_157, %c80] : memref<32x384xbf16, #tpu.memory_space<vmem>>, vector<32x128xbf16>
    %c0_158 = arith.constant 0 : index
    %c96 = arith.constant 96 : index
    %210 = vector.load %arg18[%c0_158, %c96] : memref<32x384xbf16, #tpu.memory_space<vmem>>, vector<32x128xbf16>
    %c0_159 = arith.constant 0 : index
    %c112_160 = arith.constant 112 : index
    %211 = vector.load %arg18[%c0_159, %c112_160] : memref<32x384xbf16, #tpu.memory_space<vmem>>, vector<32x128xbf16>
    %c0_161 = arith.constant 0 : index
    %c128_162 = arith.constant 128 : index
    %212 = vector.load %arg18[%c0_161, %c128_162] : memref<32x384xbf16, #tpu.memory_space<vmem>>, vector<32x128xbf16>
    %c0_163 = arith.constant 0 : index
    %c144_164 = arith.constant 144 : index
    %213 = vector.load %arg18[%c0_163, %c144_164] : memref<32x384xbf16, #tpu.memory_space<vmem>>, vector<32x128xbf16>
    %c0_165 = arith.constant 0 : index
    %c160 = arith.constant 160 : index
    %214 = vector.load %arg18[%c0_165, %c160] : memref<32x384xbf16, #tpu.memory_space<vmem>>, vector<32x128xbf16>
    %c0_166 = arith.constant 0 : index
    %c176 = arith.constant 176 : index
    %215 = vector.load %arg18[%c0_166, %c176] : memref<32x384xbf16, #tpu.memory_space<vmem>>, vector<32x128xbf16>
    %c0_167 = arith.constant 0 : index
    %c192 = arith.constant 192 : index
    %216 = vector.load %arg18[%c0_167, %c192] : memref<32x384xbf16, #tpu.memory_space<vmem>>, vector<32x128xbf16>
    %217 = tpu.concatenate %208, %209, %210, %211, %212, %213, %214, %215, %216 in 0 : vector<32x128xbf16>, vector<32x128xbf16>, vector<32x128xbf16>, vector<32x128xbf16>, vector<32x128xbf16>, vector<32x128xbf16>, vector<32x128xbf16>, vector<32x128xbf16>, vector<32x128xbf16> -> vector<288x128xbf16>
    %c0_168 = arith.constant 0 : index
    %c0_169 = arith.constant 0 : index
    %218 = vector.load %arg8[%c0_168, %c0_169] : memref<32x288xbf16, #tpu.memory_space<vmem>>, vector<32x288xbf16>
    %cst_170 = arith.constant dense<0.000000e+00> : vector<32x128xf32>
    %219 = tpu.matmul %218, %217, %cst_170 {dimension_numbers = #tpu.dot_dimension_numbers<[1], [0], [0], [1], [0, 0, 1, 1], [], []>} : vector<32x288xbf16>, vector<288x128xbf16>, vector<32x128xf32> -> vector<32x128xf32>
    %c3_171 = arith.constant 3 : index
    %c0_172 = arith.constant 0 : index
    %c0_173 = arith.constant 0 : index
    %220 = vector.load %arg10[%c3_171, %c0_172, %c0_173] : memref<5x32x1xf32, #tpu.memory_space<vmem>>, vector<1x32x1xf32>
    %221 = vector.shape_cast %220 : vector<1x32x1xf32> to vector<32x1xf32>
    %222 = vector.broadcast %221 : vector<32x1xf32> to vector<32x128xf32>
    %223 = arith.addf %219, %222 : vector<32x128xf32>
    %cst_174 = arith.constant 0.000000e+00 : f32
    %224 = vector.broadcast %cst_174 : f32 to vector<32x128xf32>
    %225 = arith.maximumf %223, %224 : vector<32x128xf32>
    %226 = arith.addf %225, %175 : vector<32x128xf32>
    %c0_175 = arith.constant 0 : index
    %c4 = arith.constant 4 : index
    %c0_176 = arith.constant 0 : index
    %c0_177 = arith.constant 0 : index
    %227 = vector.load %arg2[%c0_175, %c4, %c0_176, %c0_177] : memref<1x5x32x1xf32, #tpu.memory_space<vmem>>, vector<1x1x32x1xf32>
    %228 = vector.shape_cast %227 : vector<1x1x32x1xf32> to vector<32x1xf32>
    %229 = vector.broadcast %228 : vector<32x1xf32> to vector<32x128xf32>
    %230 = arith.addf %226, %229 : vector<32x128xf32>
    %cst_178 = arith.constant dense<0.000000e+00> : vector<128xf32>
    %231 = vector.multi_reduction <add>, %230, %cst_178 [0] : vector<32x128xf32> to vector<128xf32>
    %232 = vector.shape_cast %231 : vector<128xf32> to vector<1x128xf32>
    %cst_179 = arith.constant 3.200000e+01 : f32
    %233 = vector.broadcast %cst_179 : f32 to vector<1x128xf32>
    %234 = arith.divf %232, %233 : vector<1x128xf32>
    %235 = arith.mulf %230, %230 : vector<32x128xf32>
    %cst_180 = arith.constant dense<0.000000e+00> : vector<128xf32>
    %236 = vector.multi_reduction <add>, %235, %cst_180 [0] : vector<32x128xf32> to vector<128xf32>
    %237 = vector.shape_cast %236 : vector<128xf32> to vector<1x128xf32>
    %cst_181 = arith.constant 3.200000e+01 : f32
    %238 = vector.broadcast %cst_181 : f32 to vector<1x128xf32>
    %239 = arith.divf %237, %238 : vector<1x128xf32>
    %240 = vector.broadcast %234 : vector<1x128xf32> to vector<32x128xf32>
    %241 = arith.subf %230, %240 : vector<32x128xf32>
    %242 = arith.mulf %234, %234 : vector<1x128xf32>
    %243 = arith.subf %239, %242 : vector<1x128xf32>
    %cst_182 = arith.constant 9.99999974E-6 : f32
    %244 = vector.broadcast %cst_182 : f32 to vector<1x128xf32>
    %245 = arith.addf %243, %244 : vector<1x128xf32>
    %246 = math.rsqrt %245 : vector<1x128xf32>
    %247 = vector.broadcast %246 : vector<1x128xf32> to vector<32x128xf32>
    %248 = arith.mulf %241, %247 : vector<32x128xf32>
    %c4_183 = arith.constant 4 : index
    %c0_184 = arith.constant 0 : index
    %c0_185 = arith.constant 0 : index
    %249 = vector.load %arg11[%c4_183, %c0_184, %c0_185] : memref<5x32x1xf32, #tpu.memory_space<vmem>>, vector<1x32x1xf32>
    %250 = vector.shape_cast %249 : vector<1x32x1xf32> to vector<32x1xf32>
    %251 = vector.broadcast %250 : vector<32x1xf32> to vector<32x128xf32>
    %252 = arith.mulf %248, %251 : vector<32x128xf32>
    %c4_186 = arith.constant 4 : index
    %c0_187 = arith.constant 0 : index
    %c0_188 = arith.constant 0 : index
    %253 = vector.load %arg12[%c4_186, %c0_187, %c0_188] : memref<5x32x1xf32, #tpu.memory_space<vmem>>, vector<1x32x1xf32>
    %254 = vector.shape_cast %253 : vector<1x32x1xf32> to vector<32x1xf32>
    %255 = vector.broadcast %254 : vector<32x1xf32> to vector<32x128xf32>
    %256 = arith.addf %252, %255 : vector<32x128xf32>
    %257 = arith.truncf %256 : vector<32x128xf32> to vector<32x128xbf16>
    %c0_189 = arith.constant 0 : index
    %c128_190 = arith.constant 128 : index
    %258 = vector.load %arg18[%c0_189, %c128_190] : memref<32x384xbf16, #tpu.memory_space<vmem>>, vector<32x128xbf16>
    tpu.vector_store %arg18[%c0_189, %c128_190], %257 {strides = array<i32>} : memref<32x384xbf16, #tpu.memory_space<vmem>>, vector<32x128xbf16>,
    %c0_191 = arith.constant 0 : index
    %c64_192 = arith.constant 64 : index
    %259 = vector.load %arg18[%c0_191, %c64_192] : memref<32x384xbf16, #tpu.memory_space<vmem>>, vector<32x128xbf16>
    %c0_193 = arith.constant 0 : index
    %c128_194 = arith.constant 128 : index
    %260 = vector.load %arg18[%c0_193, %c128_194] : memref<32x384xbf16, #tpu.memory_space<vmem>>, vector<32x128xbf16>
    %c0_195 = arith.constant 0 : index
    %c192_196 = arith.constant 192 : index
    %261 = vector.load %arg18[%c0_195, %c192_196] : memref<32x384xbf16, #tpu.memory_space<vmem>>, vector<32x128xbf16>
    %262 = tpu.concatenate %259, %260, %261 in 0 : vector<32x128xbf16>, vector<32x128xbf16>, vector<32x128xbf16> -> vector<96x128xbf16>
    %c0_197 = arith.constant 0 : index
    %c0_198 = arith.constant 0 : index
    %263 = vector.load %arg9[%c0_197, %c0_198] : memref<32x96xbf16, #tpu.memory_space<vmem>>, vector<32x96xbf16>
    %cst_199 = arith.constant dense<0.000000e+00> : vector<32x128xf32>
    %264 = tpu.matmul %263, %262, %cst_199 {dimension_numbers = #tpu.dot_dimension_numbers<[1], [0], [0], [1], [0, 0, 1, 1], [], []>} : vector<32x96xbf16>, vector<96x128xbf16>, vector<32x128xf32> -> vector<32x128xf32>
    %c4_200 = arith.constant 4 : index
    %c0_201 = arith.constant 0 : index
    %c0_202 = arith.constant 0 : index
    %265 = vector.load %arg10[%c4_200, %c0_201, %c0_202] : memref<5x32x1xf32, #tpu.memory_space<vmem>>, vector<1x32x1xf32>
    %266 = vector.shape_cast %265 : vector<1x32x1xf32> to vector<32x1xf32>
    %267 = vector.broadcast %266 : vector<32x1xf32> to vector<32x128xf32>
    %268 = arith.addf %264, %267 : vector<32x128xf32>
    %cst_203 = arith.constant 0.000000e+00 : f32
    %269 = vector.broadcast %cst_203 : f32 to vector<32x128xf32>
    %270 = arith.maximumf %268, %269 : vector<32x128xf32>
    %271 = arith.addf %270, %226 : vector<32x128xf32>
    %c0_204 = arith.constant 0 : index
    %c0_205 = arith.constant 0 : index
    %272 = vector.load %arg13[%c0_204, %c0_205] : memref<32x32xbf16, #tpu.memory_space<vmem>>, vector<32x32xbf16>
    %273 = arith.truncf %271 : vector<32x128xf32> to vector<32x128xbf16>
    %cst_206 = arith.constant dense<0.000000e+00> : vector<32x128xf32>
    %274 = tpu.matmul %272, %273, %cst_206 {dimension_numbers = #tpu.dot_dimension_numbers<[1], [0], [0], [1], [0, 0, 1, 1], [], []>} : vector<32x32xbf16>, vector<32x128xbf16>, vector<32x128xf32> -> vector<32x128xf32>
    %c0_207 = arith.constant 0 : index
    %c0_208 = arith.constant 0 : index
    %275 = vector.load %arg14[%c0_207, %c0_208] : memref<32x1xf32, #tpu.memory_space<vmem>>, vector<32x1xf32>
    %276 = vector.broadcast %275 : vector<32x1xf32> to vector<32x128xf32>
    %277 = arith.addf %274, %276 : vector<32x128xf32>
    %cst_209 = arith.constant 0.000000e+00 : f32
    %278 = vector.broadcast %cst_209 : f32 to vector<32x128xf32>
    %279 = arith.maximumf %277, %278 : vector<32x128xf32>
    %c0_210 = arith.constant 0 : index
    %c0_211 = arith.constant 0 : index
    %280 = vector.load %arg15[%c0_210, %c0_211] : memref<4x32xbf16, #tpu.memory_space<vmem>>, vector<4x32xbf16>
    %281 = arith.truncf %279 : vector<32x128xf32> to vector<32x128xbf16>
    %cst_212 = arith.constant dense<0.000000e+00> : vector<4x128xf32>
    %282 = tpu.matmul %280, %281, %cst_212 {dimension_numbers = #tpu.dot_dimension_numbers<[1], [0], [0], [1], [0, 0, 1, 1], [], []>} : vector<4x32xbf16>, vector<32x128xbf16>, vector<4x128xf32> -> vector<4x128xf32>
    %c0_213 = arith.constant 0 : index
    %c0_214 = arith.constant 0 : index
    %283 = vector.load %arg16[%c0_213, %c0_214] : memref<4x1xf32, #tpu.memory_space<vmem>>, vector<4x1xf32>
    %284 = vector.broadcast %283 : vector<4x1xf32> to vector<4x128xf32>
    %285 = arith.addf %282, %284 : vector<4x128xf32>
    %c0_215 = arith.constant 0 : index
    %c0_216 = arith.constant 0 : index
    %c0_217 = arith.constant 0 : index
    %286 = vector.load %arg17[%c0_215, %c0_216, %c0_217] : memref<1x4x128xf32, #tpu.memory_space<vmem>>, vector<1x4x128xf32>
    %287 = vector.shape_cast %286 : vector<1x4x128xf32> to vector<4x128xf32>
    %288 = vector.shape_cast %285 : vector<4x128xf32> to vector<1x4x128xf32>
    tpu.vector_store %arg17[%c0_215, %c0_216, %c0_217], %288 {strides = array<i32>} : memref<1x4x128xf32, #tpu.memory_space<vmem>>, vector<1x4x128xf32>,
    return
  }
  func.func @transform_0(%arg0: i32) -> (i32, i32, i32) {
    %c0_i32 = arith.constant 0 : i32
    %c0_i32_0 = arith.constant 0 : i32
    %c0_i32_1 = arith.constant 0 : i32
    return %arg0, %c0_i32, %c0_i32_0 : i32, i32, i32
  }
  func.func @transform_1(%arg0: i32) -> (i32, i32, i32, i32) {
    %c0_i32 = arith.constant 0 : i32
    %c0_i32_0 = arith.constant 0 : i32
    %c0_i32_1 = arith.constant 0 : i32
    %c0_i32_2 = arith.constant 0 : i32
    return %arg0, %c0_i32, %c0_i32_0, %c0_i32_1 : i32, i32, i32, i32
  }
  func.func @transform_2(%arg0: i32) -> (i32, i32) {
    %c0_i32 = arith.constant 0 : i32
    %c0_i32_0 = arith.constant 0 : i32
    %c0_i32_1 = arith.constant 0 : i32
    return %c0_i32, %c0_i32_0 : i32, i32
  }
  func.func @transform_3(%arg0: i32) -> (i32, i32) {
    %c0_i32 = arith.constant 0 : i32
    %c0_i32_0 = arith.constant 0 : i32
    %c0_i32_1 = arith.constant 0 : i32
    return %c0_i32, %c0_i32_0 : i32, i32
  }
  func.func @transform_4(%arg0: i32) -> (i32, i32) {
    %c0_i32 = arith.constant 0 : i32
    %c0_i32_0 = arith.constant 0 : i32
    %c0_i32_1 = arith.constant 0 : i32
    return %c0_i32, %c0_i32_0 : i32, i32
  }
  func.func @transform_5(%arg0: i32) -> (i32, i32) {
    %c0_i32 = arith.constant 0 : i32
    %c0_i32_0 = arith.constant 0 : i32
    %c0_i32_1 = arith.constant 0 : i32
    return %c0_i32, %c0_i32_0 : i32, i32
  }
  func.func @transform_6(%arg0: i32) -> (i32, i32) {
    %c0_i32 = arith.constant 0 : i32
    %c0_i32_0 = arith.constant 0 : i32
    %c0_i32_1 = arith.constant 0 : i32
    return %c0_i32, %c0_i32_0 : i32, i32
  }
  func.func @transform_7(%arg0: i32) -> (i32, i32) {
    %c0_i32 = arith.constant 0 : i32
    %c0_i32_0 = arith.constant 0 : i32
    %c0_i32_1 = arith.constant 0 : i32
    return %c0_i32, %c0_i32_0 : i32, i32
  }
  func.func @transform_8(%arg0: i32) -> (i32, i32) {
    %c0_i32 = arith.constant 0 : i32
    %c0_i32_0 = arith.constant 0 : i32
    %c0_i32_1 = arith.constant 0 : i32
    return %c0_i32, %c0_i32_0 : i32, i32
  }
  func.func @transform_9(%arg0: i32) -> (i32, i32, i32) {
    %c0_i32 = arith.constant 0 : i32
    %c0_i32_0 = arith.constant 0 : i32
    %c0_i32_1 = arith.constant 0 : i32
    %c0_i32_2 = arith.constant 0 : i32
    return %c0_i32, %c0_i32_0, %c0_i32_1 : i32, i32, i32
  }
  func.func @transform_10(%arg0: i32) -> (i32, i32, i32) {
    %c0_i32 = arith.constant 0 : i32
    %c0_i32_0 = arith.constant 0 : i32
    %c0_i32_1 = arith.constant 0 : i32
    %c0_i32_2 = arith.constant 0 : i32
    return %c0_i32, %c0_i32_0, %c0_i32_1 : i32, i32, i32
  }
  func.func @transform_11(%arg0: i32) -> (i32, i32, i32) {
    %c0_i32 = arith.constant 0 : i32
    %c0_i32_0 = arith.constant 0 : i32
    %c0_i32_1 = arith.constant 0 : i32
    %c0_i32_2 = arith.constant 0 : i32
    return %c0_i32, %c0_i32_0, %c0_i32_1 : i32, i32, i32
  }
  func.func @transform_12(%arg0: i32) -> (i32, i32) {
    %c0_i32 = arith.constant 0 : i32
    %c0_i32_0 = arith.constant 0 : i32
    %c0_i32_1 = arith.constant 0 : i32
    return %c0_i32, %c0_i32_0 : i32, i32
  }
  func.func @transform_13(%arg0: i32) -> (i32, i32) {
    %c0_i32 = arith.constant 0 : i32
    %c0_i32_0 = arith.constant 0 : i32
    %c0_i32_1 = arith.constant 0 : i32
    return %c0_i32, %c0_i32_0 : i32, i32
  }
  func.func @transform_14(%arg0: i32) -> (i32, i32) {
    %c0_i32 = arith.constant 0 : i32
    %c0_i32_0 = arith.constant 0 : i32
    %c0_i32_1 = arith.constant 0 : i32
    return %c0_i32, %c0_i32_0 : i32, i32
  }
  func.func @transform_15(%arg0: i32) -> (i32, i32) {
    %c0_i32 = arith.constant 0 : i32
    %c0_i32_0 = arith.constant 0 : i32
    %c0_i32_1 = arith.constant 0 : i32
    return %c0_i32, %c0_i32_0 : i32, i32
  }
  func.func @transform_16(%arg0: i32) -> (i32, i32, i32) {
    %c0_i32 = arith.constant 0 : i32
    %c0_i32_0 = arith.constant 0 : i32
    %c0_i32_1 = arith.constant 0 : i32
    return %arg0, %c0_i32, %c0_i32_0 : i32, i32, i32
  }
}

</mosaic_0001>

<bundles_post_ra>
// kernel: cnn_model_forward.1
= control target key start
LH: loop header
LB: loop body
LE: loop exit
PB: predicated region body
PF: predicated region fallthrough
CT: control target
= control target key end

     0   :  { %s5073_s0 = inlined_call_operand.vmem [shape: bf16[2,8,128], index: 0, kind: input, shape index: {}]   ;;  %s5074_s1 = inlined_call_operand.vmem [shape: f32[2,5,32,1], index: 1, kind: input, shape index: {}]   ;;  %s5075_s2 = inlined_call_operand.vmem [shape: bf16[32,72], index: 2, kind: input, shape index: {}]   ;;  %s5076_s3 = inlined_call_operand.vmem [shape: f32[32,1], index: 3, kind: input, shape index: {}]   ;;  %s5077_s4 = inlined_call_operand.vmem [shape: bf16[32,288], index: 4, kind: input, shape index: {}]   ;;  %s5078_s5 = inlined_call_operand.vmem [shape: bf16[32,288], index: 5, kind: input, shape index: {}]   ;;  %s5079_s6 = inlined_call_operand.vmem [shape: bf16[32,288], index: 6, kind: input, shape index: {}]   ;;  %s5080_s7 = inlined_call_operand.vmem [shape: bf16[32,288], index: 7, kind: input, shape index: {}]   ;;  %s5081_s8 = inlined_call_operand.vmem [shape: bf16[32,96], index: 8, kind: input, shape index: {}]   ;;  %s5082_s9 = inlined_call_operand.vmem [shape: f32[5,32,1], index: 9, kind: input, shape index: {}]   ;;  %s5083_s10 = inlined_call_operand.vmem [shape: f32[5,32,1], index: 10, kind: input, shape index: {}]   ;;  %s5084_s11 = inlined_call_operand.vmem [shape: f32[5,32,1], index: 11, kind: input, shape index: {}]   ;;  %s5085_s12 = inlined_call_operand.vmem [shape: bf16[32,32], index: 12, kind: input, shape index: {}]   ;;  %s5086_s13 = inlined_call_operand.vmem [shape: f32[32,1], index: 13, kind: input, shape index: {}]   ;;  %s5087_s14 = inlined_call_operand.vmem [shape: bf16[4,32], index: 14, kind: input, shape index: {}]   ;;  %s5088_s15 = inlined_call_operand.vmem [shape: f32[4,1], index: 15, kind: input, shape index: {}]   ;;  %s5089_s16 = inlined_call_operand.hbm [shape: f32[2,4,128], index: 16, kind: output, shape index: {}]  }
   0x1   :  { %5119 = sst [smem:[#allocation15_spill]] %s5073_s0 }
   0x2   :  { %5120 = sst [smem:[#allocation16_spill]] %s5074_s1 }
   0x3   :  { %5121 = sst [smem:[#allocation17_spill]] %s5075_s2 }
   0x4   :  { %5122 = sst [smem:[#allocation18_spill]] %s5076_s3 }
   0x5   :  { %5123 = sst [smem:[#allocation19_spill]] %s5087_s14 }
   0x6   :  { %5124 = sst [smem:[#allocation20_spill]] %s5089_s16 }
   0x7   :  { %21 = vsyncpa [#allocation4], 0 }
   0x8   :  { %23 = vsyncpa [#allocation4 + $0x1], 0  ;;  %s4032_s21 = smov 0   ;;  %s4034_s22 = smov 0  }
   0x9   :  { %s4036_s23 = smov 0   ;;  %s4038_s24 = smov 0  }
   0xa LB: > { %5125 = sst [smem:[#allocation6_spill]] %s3909_s21  ;;  %s4053_s25 = sadd.s32 4294967295, %s3921_s24   ;;  %s3921_s24 = sphi %s4038_s24, %s5157_s24   ;;  %s3917_s23 = sphi %s4036_s23, %s5160_s23   ;;  %s3913_s22 = sphi %s4034_s22, %s5159_s22   ;;  %s3909_s21 = sphi %s4032_s21, %s5158_s21  }
   0xb   : > { %5126 = sst [smem:[#allocation7_spill]] %s3913_s22  ;;  %s3245_s26 = sadd.s32 4294967294, %s3921_s24  }
   0xc   : > { %5127 = sst [smem:[#allocation8_spill]] %s3917_s23  ;;  %s4057_s27 = sadd.s32 1, %s3921_s24  }
   0xd   : > { %5128 = sst [smem:[#allocation9_spill]] %s3921_s24  ;;  %s382_s28 = sadd.s32 1, %s3917_s23 }
   0xe   : > { %5129 = sst [smem:[#allocation10_spill]] %s4053_s25  ;;  %s379_s29 = ssub.s32 %s3921_s24, %s4057_s27 }
   0xf   : > { %5130 = sst [smem:[#allocation11_spill]] %s4057_s27  ;;  %p392_p0 = scmp.ne.s32.totalorder %s3917_s23, %s3913_s22 }
  0x10   : > { %p380_p1 = scmp.eq.s32.totalorder %s379_s29, 0  ;;  %p393_p2 = scmp.eq.s32.totalorder %s4053_s25, 1 }
  0x11   : > { %p398_p3 = scmp.ne.s32.totalorder %s3913_s22, %s3909_s21  ;;  %p399_p4 = scmp.eq.s32.totalorder %s3245_s26, 1 }
  0x12   : > { %s4068_s30 = scalar_select %p380_p1, %s3917_s23, %s382_s28  }
  0x13   : > { %p4070_p5 = por %p393_p2, %p392_p0  ;;  %p4074_p6 = por %p399_p4, %p398_p3 }
  0x14   : > { %5131 = sst [smem:[#allocation12_spill]] %s4068_s30  ;;  %p3248_p7 = scmp.ge.s32.totalorder %s3921_s24, 1 }
  0x15   : > { %s5132_s0 = scalar_select %p4070_p5, 1, 0 }
  0x16   : > { %s5134_s17 = scalar_select %p4074_p6, 1, 0 }
  0x17   : > { %5133 = sst [smem:[#allocation13_spill]] %s5132_s0  ;;  %p474_p8 = scmp.lt.s32.totalorder %s3921_s24, 3 }
  0x18   : > { %5135 = sst [smem:[#allocation14_spill]] %s5134_s17 }
  0x19   : > { %p475_p9 = pnand %p3248_p7, %p474_p8 }
  0x1a   : > { %v3923_v0 = vmov (!%p475_p9), 0   ;;  %p528_p10 = scmp.lt.s32.totalorder (!%p475_p9), %s4053_s25, 1  ;;  %s5136_s28 = sld [smem:[#allocation15_spill]] (!%p475_p9)  ;;  %vm555_vm0 = vcmask (!%p475_p9), 1039360   ;;  %vm597_vm1 = vcmask (!%p475_p9), 1043456   ;;  %vm567_vm2 = vcmask (!%p475_p9), 1022976  }
  0x1b   : > { %478 = sbr.rel (%p475_p9) target bundleno = 3755 (0xeab), region = 84  ;;  %538 = vst [vmem:[#allocation2] sm:$0xff] (!%p475_p9), %v3923_v0  ;;  %540 = vst [vmem:[#allocation2 + $0x10] sm:$0xff] (!%p475_p9), %v3923_v0  ;;  %3657 = vset.pattern.permute.xlu1 (!%p475_p9), %v3923_v0  ;;  %3658 = vset.pattern.permute.xlu0 (!%p475_p9), %v3923_v0  ;;  %s5102_s30 = smov (!%p475_p9), 126   ;;  %vm561_vm3 = vcmask (!%p475_p9), 1031168   ;;  %vm577_vm4 = vcmask (!%p475_p9), 1006592  }
  0x1c   : > { %s5106_s23 = smov (!%p475_p9), 127   ;;  %s5108_s27 = smov (!%p475_p9), 123   ;;  %vm697_vm5 = vcmask (!%p475_p9), 588800   ;;  %vm583_vm6 = vcmask (!%p475_p9), 998400   ;;  %vm589_vm7 = vcmask (!%p475_p9), 990208   ;;  %vm595_vm8 = vcmask (!%p475_p9), 982016  }
  0x1d   : > { %s5098_s17 = smov (!%p475_p9), 125   ;;  %s5104_s20 = smov (!%p475_p9), 122   ;;  %v825_v46 = vld [vmem:[%s5083_s10] sm:$0xff] (!%p475_p9)  ;;  %v826_v49 = vld [vmem:[%s5083_s10 + $0x8] sm:$0xff] (!%p475_p9)  ;;  %v827_v50 = vld [vmem:[%s5083_s10 + $0x10] sm:$0xff] (!%p475_p9)  ;;  %vm687_vm9 = vcmask (!%p475_p9), 31744  }
  0x1e   : > { %s5100_s26 = smov (!%p475_p9), 121   ;;  %s5137_s2 = sld [smem:[#allocation17_spill]] (!%p475_p9)  ;;  %v853_v48 = vld [vmem:[%s5084_s11] sm:$0xff] (!%p475_p9)  ;;  %v854_v51 = vld [vmem:[%s5084_s11 + $0x8] sm:$0xff] (!%p475_p9)  ;;  %v855_v52 = vld [vmem:[%s5084_s11 + $0x10] sm:$0xff] (!%p475_p9)  ;;  %vm1139_vm10 = vcmask (!%p475_p9), 261120  }
  0x1f   : > { %s5138_s3 = sld [smem:[#allocation18_spill]] (!%p475_p9)  ;;  %s5139_s1 = sld [smem:[#allocation16_spill]] (!%p475_p9)  ;;  %v828_v53 = vld [vmem:[%s5083_s10 + $0x18] sm:$0xff] (!%p475_p9)  ;;  %vm1893_vm11 = vcmask (!%p475_p9), 1014784   ;;  %vm1933_vm12 = vcmask (!%p475_p9), 883712   ;;  %vm1944_vm13 = vcmask (!%p475_p9), 850944  }
  0x20   : > { %v856_v54 = vld [vmem:[%s5084_s11 + $0x18] sm:$0xff] (!%p475_p9)  ;;  %s3937_s14 = smov (!%p475_p9), 116   ;;  %s3938_s0 = smov (!%p475_p9), 112   ;;  %vm1914_vm14 = vcmask (!%p475_p9), 949248   ;;  %vm1955_vm15 = vcmask (!%p475_p9), 818176  }
  0x21   : > { %s3939_s22 = smov (!%p475_p9), 16   ;;  %s3943_s21 = smov (!%p475_p9), 64  }
  0x22   : > { %s4086_s18 = scalar_select %p528_p10, %s4053_s25, 1  ;;  %v544_v1 = vld [vmem:[#allocation2] sm:$0xf]  ;;  %v546_v2 = vld [vmem:[#allocation2 + $0x10] sm:$0xf] }
  0x23   : > { %557 = vrot.lane.b32.xlu1 %v544_v1, %s5102_s30  ;;  %v549_v4 = vrot.slane %v544_v1, 4  ;;  %v572_v5 = vrot.slane %v546_v2, 4  ;;  %s5149_s24 = sld [smem:[#allocation7_spill]] }
  0x24   : > { %s3250_s19 = sshll.u32 %s4086_s18, 2  ;;  %v3809_v27 = vld [vmem:[%s5137_s2] sm:$0xff]  }
  0x25   : > { %s531_s29 = scalar_lea.vmem %s5136_s28, %s3250_s19  ;;  %551 = vrot.lane.b32.xlu0 %v549_v4, %s5106_s23  ;;  %s5094_s19 = smov 124   ;;  %3525 = vmatprep.mubr.msk.bf16.mxu0 %vm697_vm5, %v3809_v27  ;;  %v625_v39 = vld [vmem:[%s5138_s3] sm:$0xff]  ;;  %v626_v40 = vld [vmem:[%s5138_s3 + $0x8] sm:$0xff]  ;;  %v627_v41 = vld [vmem:[%s5138_s3 + $0x10] sm:$0xff] }
  0x26   : > { %v542_v3 = vld [vmem:[%s531_s29] sm:$0xf]  ;;  %s5096_s28 = smov 120   ;;  %s5110_s29 = smov 4   ;;  %v628_v43 = vld [vmem:[%s5138_s3 + $0x18] sm:$0xff] }
  0x27   : > { %543 = vst [vmem:[#allocation2 + $0x8] sm:$0xf] %v542_v3  ;;  %575 = vrot.lane.b32.xlu1 %v572_v5, %s5108_s27  ;;  %s3942_s3 = smov 80  }
  0x29   : > { %563 = vrot.lane.b32.xlu0 %v549_v4, %s5098_s17 }
  0x2e   : > { %v545_v6 = vld [vmem:[#allocation2 + $0x8] sm:$0xf] }
  0x2f   : > { %559 = vrot.lane.b32.xlu1 %v545_v6, %s5102_s30  ;;  %v550_v7 = vrot.slane %v545_v6, 4  ;;  %569 = vrot.lane.b32.xlu0 %v545_v6, %s5094_s19  ;;  %s3594_s19 = smul.u32 160, %s4086_s18  ;;  %s5140_s30 = smov 123  }
  0x30   : > { %s3940_s18 = smov 48  }
  0x33   : > { %565 = vrot.lane.b32.xlu1 %v550_v7, %s5098_s17  ;;  %553 = vrot.lane.b32.xlu0 %v550_v7, %s5106_s23  ;;  %s5141_s17 = smov 127   ;;  %s5142_s23 = smov 122  }
  0x37   : > { %579 = vrot.lane.b32.xlu1 %v545_v6, %s5104_s20  ;;  %573 = vrot.lane.b32.xlu0 %v550_v7, %s5108_s27  ;;  %s4146_s27 = scalar_lea.vmem %s5139_s1, %s3594_s19  ;;  %s5146_s19 = smov 120  }
  0x38   : > { %v760_v42 = vld [vmem:[%s4146_s27] sm:$0xff]  ;;  %v762_v44 = vld [vmem:[%s4146_s27 + $0x10] sm:$0xff]  ;;  %v761_v45 = vld [vmem:[%s4146_s27 + $0x8] sm:$0xff]  ;;  %s5148_s1 = smov 4  }
  0x39   : > { %v763_v47 = vld [vmem:[%s4146_s27 + $0x18] sm:$0xff] }
  0x3b   : > { %585 = vrot.lane.b32.xlu1 %v550_v7, %s5100_s26  ;;  %581 = vrot.lane.b32.xlu0 %v546_v2, %s5104_s20  ;;  %s5143_s20 = smov 126  }
  0x3f   : > { %591 = vrot.lane.b32.xlu1 %v545_v6, %s5096_s28  ;;  %587 = vrot.lane.b32.xlu0 %v572_v5, %s5100_s26  ;;  %s5144_s26 = smov 121  }
  0x43   : > { %593 = vrot.lane.b32.xlu0 %v546_v2, %s5096_s28  ;;  %s5147_s28 = smov 124  }
  0x95   : > { %v558_v8 = vpop.permute.xlu1 %557 }
  0x97   : > { %v552_v9 = vpop.permute.xlu0 %551 }
  0x99   : > { %v576_v10 = vpop.permute.xlu1 %575 }
  0x9b   : > { %v564_v11 = vpop.permute.xlu0 %563 }
  0xa1   : > { %v560_v12 = vpop.permute.xlu1 %559  ;;  %v570_v13 = vpop.permute.xlu0 %569 }
  0xa2   : > { %v562_v22 = vsel %vm561_vm3, %v558_v8, %v560_v12  ;;  %v3810_v8 = vld [vmem:[%s5137_s2 + $0x8] sm:$0xff]  }
  0xa5   : > { %v566_v14 = vpop.permute.xlu1 %565  ;;  %v554_v15 = vpop.permute.xlu0 %553 }
  0xa6   : > { %v556_v16 = vsel %vm555_vm0, %v552_v9, %v554_v15  ;;  %v603_v17 = vsel %vm597_vm1, %v545_v6, %v554_v15  ;;  %v568_v19 = vsel %vm567_vm2, %v564_v11, %v566_v14  ;;  %v609_v23 = vsel %vm597_vm1, %v560_v12, %v566_v14 }
  0xa7   : > { %669 = vrot.lane.b32.xlu0 %v603_v17, %s5110_s29  ;;  %v600_v18 = vsel %vm597_vm1, %v544_v1, %v556_v16  ;;  %v606_v25 = vsel %vm597_vm1, %v562_v22, %v568_v19 }
  0xa8   : > { %667 = vrot.lane.b32.xlu1 %v600_v18, %s5110_s29 }
  0xa9   : > { %v580_v20 = vpop.permute.xlu1 %579  ;;  %v574_v21 = vpop.permute.xlu0 %573 }
  0xaa   : > { %v578_v24 = vsel %vm577_vm4, %v574_v21, %v576_v10  ;;  %v612_v30 = vsel %vm597_vm1, %v570_v13, %v574_v21 }
  0xab   : > { %673 = vrot.lane.b32.xlu0 %v609_v23, %s5110_s29  ;;  %v614_v28 = vsel %vm597_vm1, %v570_v13, %v578_v24 }
  0xac   : > { %671 = vrot.lane.b32.xlu1 %v606_v25, %s5110_s29 }
  0xad   : > { %v582_v26 = vpop.permute.xlu0 %581  ;;  %v586_v29 = vpop.permute.xlu1 %585 }
  0xae   : > { %v584_v32 = vsel %vm583_vm6, %v580_v20, %v582_v26  ;;  %v617_v34 = vsel %vm597_vm1, %v580_v20, %v586_v29 }
  0xaf   : > { %677 = vrot.lane.b32.xlu0 %v614_v28, %s5110_s29 }
  0xb0   : > { %675 = vrot.lane.b32.xlu1 %v612_v30, %s5110_s29 }
  0xb1   : > { %v588_v31 = vpop.permute.xlu0 %587  ;;  %v592_v36 = vpop.permute.xlu1 %591 }
  0xb2   : > { %v590_v33 = vsel %vm589_vm7, %v586_v29, %v588_v31 }
  0xb3   : > { %v620_v35 = vsel %vm597_vm1, %v584_v32, %v590_v33 }
  0xb4   : > { %679 = vrot.lane.b32.xlu1 %v617_v34, %s5110_s29  ;;  %681 = vrot.lane.b32.xlu0 %v620_v35, %s5110_s29 }
  0xb5   : > { %v594_v37 = vpop.permute.xlu0 %593 }
  0xb6   : > { %v596_v38 = vsel %vm595_vm8, %v592_v36, %v594_v37 }
  0xb8   : > { %683 = vrot.lane.b32.xlu1 %v592_v36, %s5110_s29  ;;  %685 = vrot.lane.b32.xlu0 %v596_v38, %s5110_s29  ;;  %s5145_s29 = smov 125  }
  0xbc   : > { %631 = vperm.xlu1 %3657, %v625_v39   ;;  %636 = vperm.xlu0 %3658, %v626_v40  }
  0xc0   : > { %641 = vperm.xlu1 %3657, %v627_v41   ;;  %766 = vperm.xlu0 %3658, %v760_v42  }
  0xc4   : > { %646 = vperm.xlu1 %3657, %v628_v43   ;;  %776 = vperm.xlu0 %3658, %v762_v44  }
  0xc8   : > { %771 = vperm.xlu1 %3657, %v761_v45   ;;  %831 = vperm.xlu0 %3658, %v825_v46  }
  0xcc   : > { %781 = vperm.xlu1 %3657, %v763_v47   ;;  %859 = vperm.xlu0 %3658, %v853_v48  }
  0xd0   : > { %836 = vperm.xlu1 %3657, %v826_v49   ;;  %841 = vperm.xlu0 %3658, %v827_v50  }
  0xd4   : > { %864 = vperm.xlu1 %3657, %v854_v51   ;;  %869 = vperm.xlu0 %3658, %v855_v52  }
  0xd8   : > { %846 = vperm.xlu1 %3657, %v828_v53   ;;  %3665 = vrot.lane.b32.xlu0 %v3923_v0, %s5141_s17 }
  0xdc   : > { %874 = vperm.xlu1 %3657, %v856_v54   ;;  %3675 = vrot.lane.b32.xlu0 %v3923_v0, %s5143_s20 }
  0xe0   : > { %3660 = vrot.lane.b32.xlu1 %v3923_v0, %s5140_s30  ;;  %3685 = vrot.lane.b32.xlu0 %v3923_v0, %s5145_s29 }
  0xe4   : > { %3670 = vrot.lane.b32.xlu1 %v3923_v0, %s5142_s23 }
  0xe8   : > { %3680 = vrot.lane.b32.xlu1 %v3923_v0, %s5144_s26 }
  0xec   : > { %3690 = vrot.lane.b32.xlu1 %v3923_v0, %s5146_s19 }
 0x119   : > { %v670_v55 = vpop.permute.xlu0 %669 }
 0x11a   : > { %v668_v56 = vpop.permute.xlu1 %667 }
 0x11b   : > { %v688_v57 = vsel %vm687_vm9, %v668_v56, %v670_v55 }
 0x11c   : > { %3515 = vmatprep.subr.bf16.mxu0 %v688_v57 }
 0x11d   : > { %3516 = vmatpush3.bf16.msra.mxu0 %v688_v57  ;;  %v674_v58 = vpop.permute.xlu0 %673 }
 0x11e   : > { %v672_v59 = vpop.permute.xlu1 %671 }
 0x11f   : > { %v689_v60 = vsel %vm687_vm9, %v672_v59, %v674_v58 }
 0x120   : > { %3517 = vmatprep.subr.bf16.mxu0 %v689_v60 }
 0x121   : > { %3518 = vmatpush3.bf16.msra.mxu0 %v689_v60  ;;  %v678_v61 = vpop.permute.xlu0 %677 }
 0x122   : > { %v676_v62 = vpop.permute.xlu1 %675 }
 0x123   : > { %v690_v63 = vsel %vm687_vm9, %v676_v62, %v678_v61 }
 0x124   : > { %3519 = vmatprep.subr.bf16.mxu0 %v690_v63 }
 0x125   : > { %3520 = vmatpush3.bf16.msra.mxu0 %v690_v63 }
 0x126   : > { %v680_v1 = vpop.permute.xlu1 %679  ;;  %v682_v2 = vpop.permute.xlu0 %681 }
 0x127   : > { %v691_v3 = vsel %vm687_vm9, %v680_v1, %v682_v2 }
 0x128   : > { %3521 = vmatprep.subr.bf16.mxu0 %v691_v3 }
 0x129   : > { %3522 = vmatpush3.bf16.msra.mxu0 %v691_v3 }
 0x12a   : > { %v684_v4 = vpop.permute.xlu1 %683  ;;  %v686_v5 = vpop.permute.xlu0 %685 }
 0x12b   : > { %v692_v6 = vsel %vm687_vm9, %v684_v4, %v686_v5 }
 0x12c   : > { %3593 = vmatprep.subr.msk.bf16.mxu0 %vm597_vm1, %v692_v6  ;;  %v705_v7 = vsel %vm597_vm1, %v692_v6, 0  ;;  %vm2100_vm1 = vcmask 130048  }
 0x12d   : > { %3524 = vmatpush3.bf16.msra.mxu0 %v705_v7 }
 0x130   : > { %3526 = vmatmul.mubr.msk.bf16.vlgmr.msra.gmra.mrb[0].mxu0 %vm697_vm5, %v3810_v8  ;;  %vm2585_vm5 = vcmask 523264  }
 0x13b   : > { %v632_v9 = vpop.permute.xlu1 %631  ;;  %v637_v11 = vpop.permute.xlu0 %636 }
 0x13f   : > { %v642_v10 = vpop.permute.xlu1 %641  ;;  %v767_v14 = vpop.permute.xlu0 %766 }
 0x143   : > { %v647_v12 = vpop.permute.xlu1 %646  ;;  %v777_v28 = vpop.permute.xlu0 %776 }
 0x147   : > { %v772_v19 = vpop.permute.xlu1 %771  ;;  %v832_v59 = vpop.permute.xlu0 %831 }
 0x14b   : > { %v782_v31 = vpop.permute.xlu1 %781  ;;  %v860_v63 = vpop.permute.xlu0 %859 }
 0x14f   : > { %v837_v58 = vpop.permute.xlu1 %836  ;;  %v842_v2 = vpop.permute.xlu0 %841 }
 0x153   : > { %v865_v62 = vpop.permute.xlu1 %864 }
 0x157   : > { %v847_v1 = vpop.permute.xlu1 %846 }
 0x203   : > { %v3527_v13 = vpop.f32.mrb[0].mxu0 }
 0x204   : > { %v4207_v15 = vadd.f32 %v3527_v13, %v642_v10  ;;  %v741_v16 = vpop.f32.mrb[1].mxu0 }
 0x205   : > { %v4209_v17 = vadd.f32 %v741_v16, %v632_v9  ;;  %v3528_v18 = vpop.f32.mrb[2].mxu0 }
 0x206   : > { %v4211_v20 = vadd.f32 %v3528_v18, %v647_v12  ;;  %v744_v21 = vpop.f32.mrb[3].mxu0  ;;  %v758_v22 = vmax.f32 %v4207_v15, 0.0  ;;  %v875_v18 = vpop.permute.xlu1 %874 }
 0x207   : > { %v756_v23 = vmax.f32 %v4209_v17, 0.0  ;;  %v4215_v24 = vadd.f32 %v744_v21, %v637_v11 }
 0x208   : > { %v759_v26 = vmax.f32 %v4211_v20, 0.0  ;;  %v786_v29 = vadd.f32 %v777_v28, %v758_v22 }
 0x209   : > { %v784_v25 = vadd.f32 %v767_v14, %v756_v23  ;;  %v757_v27 = vmax.f32 %v4215_v24, 0.0 }
 0x20a   : > { %v787_v33 = vadd.f32 %v782_v31, %v759_v26  ;;  %v801_v36 = vmul.f32 %v786_v29, %v786_v29 }
 0x20b   : > { %v785_v30 = vadd.f32 %v772_v19, %v757_v27  ;;  %v799_v32 = vmul.f32 %v784_v25, %v784_v25  ;;  %v870_v19 = vpop.permute.xlu0 %869 }
 0x20c   : > { %v802_v39 = vmul.f32 %v787_v33, %v787_v33 }
 0x20d   : > { %v788_v34 = vadd.f32 %v785_v30, %v784_v25  ;;  %v800_v35 = vmul.f32 %v785_v30, %v785_v30 }
 0x20f   : > { %v789_v37 = vadd.f32 %v788_v34, %v786_v29  ;;  %v803_v38 = vadd.f32 %v800_v35, %v799_v32 }
 0x211   : > { %v790_v40 = vadd.f32 %v789_v37, %v787_v33  ;;  %v804_v41 = vadd.f32 %v803_v38, %v801_v36 }
 0x213   : > { %v791_v42 = vrot.slane %v790_v40, 4  ;;  %v805_v43 = vadd.f32 %v804_v41, %v802_v39 }
 0x215   : > { %v792_v44 = vadd.f32 %v791_v42, %v790_v40  ;;  %v806_v45 = vrot.slane %v805_v43, 4 }
 0x217   : > { %v793_v46 = vrot.slane %v792_v44, 2  ;;  %v807_v47 = vadd.f32 %v806_v45, %v805_v43 }
 0x219   : > { %v794_v48 = vadd.f32 %v793_v46, %v792_v44  ;;  %v808_v49 = vrot.slane %v807_v47, 2 }
 0x21b   : > { %v795_v50 = vrot.slane %v794_v48, 1  ;;  %v809_v51 = vadd.f32 %v808_v49, %v807_v47 }
 0x21d   : > { %v796_v52 = vadd.f32 %v795_v50, %v794_v48  ;;  %v810_v53 = vrot.slane %v809_v51, 1 }
 0x21f   : > { %v798_v54 = vmul.f32 0.03125, %v796_v52  ;;  %v811_v55 = vadd.f32 %v810_v53, %v809_v51 }
 0x221   : > { %v812_v56 = vmul.f32 0.03125, %v811_v55  ;;  %v817_v57 = vmul.f32 %v798_v54, %v798_v54  ;;  %v813_v3 = vsub.f32 %v784_v25, %v798_v54  ;;  %v814_v4 = vsub.f32 %v785_v30, %v798_v54 }
 0x222   : > { %v815_v5 = vsub.f32 %v786_v29, %v798_v54  ;;  %v816_v6 = vsub.f32 %v787_v33, %v798_v54  ;;  %v3661_v29 = vpop.permute.xlu1 %3660  ;;  %v3666_v33 = vpop.permute.xlu0 %3665 }
 0x223   : > { %v818_v60 = vsub.f32 %v812_v56, %v817_v57  ;;  %v3667_v52 = vunpack.i.l.bf16 %v3666_v33  ;;  %v3662_v55 = vunpack.i.l.bf16 %v3661_v29  ;;  %v3668_v56 = vunpack.i.h.bf16 %v3666_v33  ;;  %v3264_v33 = vld [vmem:[%s4146_s27 + $0x20] sm:$0xff] }
 0x225   : > { %v819_v61 = vadd.f32 1e-05, %v818_v60 }
 0x226   : > { %v3671_v30 = vpop.permute.xlu1 %3670  ;;  %v3676_v36 = vpop.permute.xlu0 %3675 }
 0x227   : > { %3847 = vrsqrt.f32 %v819_v61  ;;  %v3677_v60 = vunpack.i.l.bf16 %v3676_v36 }
 0x22a   : > { %v4247_v35 = vpop.permute.xlu1 %3680  ;;  %v4251_v38 = vpop.permute.xlu0 %3685 }
 0x22e   : > { %v4249_v37 = vpop.permute.xlu1 %3690 }
 0x231   : > { %v3848_v7 = vpop.eup %3847 }
 0x232   : > { %v821_v8 = vmul.f32 %v3848_v7, %v813_v3  ;;  %v822_v9 = vmul.f32 %v3848_v7, %v814_v4  ;;  %v823_v10 = vmul.f32 %v3848_v7, %v815_v5  ;;  %v824_v11 = vmul.f32 %v3848_v7, %v816_v6  ;;  %v3813_v6 = vld [vmem:[%s5077_s4 + $0x4] ss:$12 sps:$4 sm:$0xff]  }
 0x233   : > { %v3673_v4 = vunpack.i.h.bf16 %v3671_v30  ;;  %v3687_v5 = vunpack.i.l.bf16 %v4251_v38  ;;  %1178 = vmatprep.mubr.bf16.mxu1 %v3813_v6 }
 0x234   : > { %v849_v12 = vmul.f32 %v832_v59, %v821_v8  ;;  %v850_v13 = vmul.f32 %v837_v58, %v822_v9  ;;  %v851_v14 = vmul.f32 %v842_v2, %v823_v10  ;;  %v852_v16 = vmul.f32 %v847_v1, %v824_v11 }
 0x235   : > { %v3663_v59 = vunpack.i.h.bf16 %v3661_v29  ;;  %v3678_v1 = vunpack.i.h.bf16 %v3676_v36  ;;  %v3682_v9 = vunpack.i.l.bf16 %v4247_v35  ;;  %v3688_v10 = vunpack.i.h.bf16 %v4251_v38  ;;  %v985_v29 = vld [vmem:[%s5082_s9 + $0x10] sm:$0xff]  ;;  %v3268_v38 = vld [vmem:[%s5083_s10 + $0x20] sm:$0xff] }
 0x236   : > { %v877_v21 = vadd.f32 %v860_v63, %v849_v12  ;;  %v878_v28 = vadd.f32 %v865_v62, %v850_v13  ;;  %v879_v31 = vadd.f32 %v870_v19, %v851_v14  ;;  %v880_v32 = vadd.f32 %v875_v18, %v852_v16  ;;  %v3816_v16 = vld [vmem:[%s5077_s4 + $0x8] ss:$12 sps:$4 sm:$0xff]  }
 0x237   : > { %v3672_v63 = vunpack.i.l.bf16 %v3671_v30  ;;  %v3683_v13 = vunpack.i.h.bf16 %v4247_v35  ;;  %3533 = vmatprep.mubr.msk.bf16.mxu0 %vm1139_vm10, %v3816_v16  ;;  %v3692_v19 = vunpack.i.l.bf16 %v4249_v37  ;;  %v986_v30 = vld [vmem:[%s5082_s9 + $0x18] sm:$0xff]  ;;  %v3265_v35 = vld [vmem:[%s4146_s27 + $0x28] sm:$0xff]  ;;  %v3266_v36 = vld [vmem:[%s4146_s27 + $0x30] sm:$0xff] }
 0x238   : > { %v881_v34 = vpack.c.bf16 %v878_v28, %v877_v21  ;;  %v882_v25 = vpack.c.bf16 %v880_v32, %v879_v31  ;;  %v3693_v31 = vunpack.i.h.bf16 %v4249_v37  ;;  %v983_v32 = vld [vmem:[%s5082_s9] sm:$0xff]  ;;  %v3267_v37 = vld [vmem:[%s4146_s27 + $0x38] sm:$0xff] }
 0x23a   : > { %927 = vrot.lane.b32.xlu0 %v881_v34, %s5147_s28  ;;  %929 = vrot.lane.b32.xlu1 %v882_v25, %s5147_s28 }
 0x23e   : > { %935 = vrot.lane.b32.xlu0 %v881_v34, %s5140_s30  ;;  %899 = vrot.lane.b32.xlu1 %v881_v34, %s5141_s17 }
 0x242   : > { %939 = vrot.lane.b32.xlu0 %v882_v25, %s5140_s30  ;;  %903 = vrot.lane.b32.xlu1 %v882_v25, %s5141_s17 }
 0x246   : > { %945 = vrot.lane.b32.xlu0 %v881_v34, %s5142_s23  ;;  %909 = vrot.lane.b32.xlu1 %v881_v34, %s5143_s20 }
 0x24a   : > { %949 = vrot.lane.b32.xlu0 %v882_v25, %s5142_s23  ;;  %913 = vrot.lane.b32.xlu1 %v882_v25, %s5143_s20 }
 0x24e   : > { %955 = vrot.lane.b32.xlu0 %v881_v34, %s5144_s26  ;;  %919 = vrot.lane.b32.xlu1 %v881_v34, %s5145_s29 }
 0x252   : > { %959 = vrot.lane.b32.xlu0 %v882_v25, %s5144_s26  ;;  %923 = vrot.lane.b32.xlu1 %v882_v25, %s5145_s29 }
 0x256   : > { %965 = vrot.lane.b32.xlu0 %v881_v34, %s5146_s19  ;;  %3695 = vrot.lane.b32.xlu1 %v3923_v0, %s5148_s1 }
 0x25a   : > { %969 = vrot.lane.b32.xlu0 %v882_v25, %s5146_s19 }
 0x25e   : > { %1039 = vrot.lane.b32.xlu0 %v881_v34, %s5148_s1 }
 0x262   : > { %1043 = vrot.lane.b32.xlu0 %v882_v25, %s5148_s1  ;;  %v984_v25 = vld [vmem:[%s5082_s9 + $0x8] sm:$0xff] }
 0x2ac   : > { %v930_v39 = vpop.permute.xlu1 %929  ;;  %v928_v40 = vpop.permute.xlu0 %927 }
 0x2ad   : > { %1069 = vrot.lane.b32.xlu1 %v928_v40, %s5148_s1  ;;  %v3272_v40 = vld [vmem:[%s5084_s11 + $0x20] sm:$0xff] }
 0x2b0   : > { %v900_v41 = vpop.permute.xlu1 %899  ;;  %v936_v42 = vpop.permute.xlu0 %935 }
 0x2b1   : > { %1071 = vrot.lane.b32.xlu1 %v930_v39, %s5148_s1  ;;  %1073 = vrot.lane.b32.xlu0 %v936_v42, %s5148_s1  ;;  %v905_v54 = vsel %vm555_vm0, %v3667_v52, %v900_v41  ;;  %v943_v57 = vsel %vm577_vm4, %v936_v42, %v3662_v55  ;;  %v3269_v39 = vld [vmem:[%s5083_s10 + $0x28] sm:$0xff]  ;;  %v3270_v42 = vld [vmem:[%s5083_s10 + $0x30] sm:$0xff] }
 0x2b4   : > { %v904_v43 = vpop.permute.xlu1 %903  ;;  %v940_v44 = vpop.permute.xlu0 %939 }
 0x2b5   : > { %1047 = vrot.lane.b32.xlu1 %v900_v41, %s5148_s1  ;;  %1077 = vrot.lane.b32.xlu0 %v940_v44, %s5148_s1  ;;  %v906_v58 = vsel %vm555_vm0, %v3668_v56, %v904_v43  ;;  %v944_v61 = vsel %vm577_vm4, %v940_v44, %v3663_v59  ;;  %v3273_v41 = vld [vmem:[%s5084_s11 + $0x28] sm:$0xff]  ;;  %v3274_v44 = vld [vmem:[%s5084_s11 + $0x30] sm:$0xff] }
 0x2b8   : > { %v910_v45 = vpop.permute.xlu1 %909  ;;  %v946_v46 = vpop.permute.xlu0 %945 }
 0x2b9   : > { %1051 = vrot.lane.b32.xlu1 %v904_v43, %s5148_s1  ;;  %1081 = vrot.lane.b32.xlu0 %v946_v46, %s5148_s1  ;;  %v915_v62 = vsel %vm561_vm3, %v3677_v60, %v910_v45  ;;  %v953_v2 = vsel %vm583_vm6, %v946_v46, %v3672_v63  ;;  %v3271_v43 = vld [vmem:[%s5083_s10 + $0x38] sm:$0xff] }
 0x2bc   : > { %v914_v47 = vpop.permute.xlu1 %913  ;;  %v950_v48 = vpop.permute.xlu0 %949 }
 0x2bd   : > { %1055 = vrot.lane.b32.xlu1 %v910_v45, %s5148_s1  ;;  %1085 = vrot.lane.b32.xlu0 %v950_v48, %s5148_s1  ;;  %v916_v3 = vsel %vm561_vm3, %v3678_v1, %v914_v47  ;;  %v954_v7 = vsel %vm583_vm6, %v950_v48, %v3673_v4  ;;  %v3275_v45 = vld [vmem:[%s5084_s11 + $0x38] sm:$0xff] }
 0x2c0   : > { %v956_v49 = vpop.permute.xlu0 %955  ;;  %v920_v50 = vpop.permute.xlu1 %919 }
 0x2c1   : > { %1059 = vrot.lane.b32.xlu1 %v914_v47, %s5148_s1  ;;  %1089 = vrot.lane.b32.xlu0 %v956_v49, %s5148_s1  ;;  %v925_v8 = vsel %vm567_vm2, %v3687_v5, %v920_v50  ;;  %v963_v11 = vsel %vm589_vm7, %v956_v49, %v3682_v9 }
 0x2c4   : > { %v960_v51 = vpop.permute.xlu0 %959  ;;  %v924_v53 = vpop.permute.xlu1 %923 }
 0x2c5   : > { %1063 = vrot.lane.b32.xlu1 %v920_v50, %s5148_s1  ;;  %1093 = vrot.lane.b32.xlu0 %v960_v51, %s5148_s1  ;;  %v926_v12 = vsel %vm567_vm2, %v3688_v10, %v924_v53  ;;  %v964_v18 = vsel %vm589_vm7, %v960_v51, %v3683_v13 }
 0x2c8   : > { %v966_v14 = vpop.permute.xlu0 %965  ;;  %v3696_v46 = vpop.permute.xlu1 %3695 }
 0x2c9   : > { %1067 = vrot.lane.b32.xlu1 %v924_v53, %s5148_s1  ;;  %1045 = vrot.lane.b32.xlu0 %v905_v54, %s5148_s1  ;;  %v973_v28 = vsel %vm595_vm8, %v966_v14, %v3692_v19  ;;  %v3697_v48 = vunpack.i.l.bf16 %v3696_v46  ;;  %v3698_v51 = vunpack.i.h.bf16 %v3696_v46 }
 0x2cc   : > { %v970_v21 = vpop.permute.xlu0 %969 }
 0x2cd   : > { %1075 = vrot.lane.b32.xlu1 %v943_v57, %s5148_s1  ;;  %1049 = vrot.lane.b32.xlu0 %v906_v58, %s5148_s1  ;;  %v974_v34 = vsel %vm595_vm8, %v970_v21, %v3693_v31 }
 0x2d0   : > { %v1040_v47 = vpop.permute.xlu0 %1039 }
 0x2d1   : > { %1079 = vrot.lane.b32.xlu1 %v944_v61, %s5148_s1  ;;  %1053 = vrot.lane.b32.xlu0 %v915_v62, %s5148_s1  ;;  %v1105_v52 = vsel %vm687_vm9, %v3697_v48, %v1040_v47 }
 0x2d4   : > { %v1044_v49 = vpop.permute.xlu0 %1043 }
 0x2d5   : > { %1083 = vrot.lane.b32.xlu1 %v953_v2, %s5148_s1  ;;  %1057 = vrot.lane.b32.xlu0 %v916_v3, %s5148_s1  ;;  %v1106_v55 = vsel %vm687_vm9, %v3698_v51, %v1044_v49 }
 0x2d9   : > { %1087 = vrot.lane.b32.xlu1 %v954_v7, %s5148_s1  ;;  %1061 = vrot.lane.b32.xlu0 %v925_v8, %s5148_s1 }
 0x2dd   : > { %1091 = vrot.lane.b32.xlu1 %v963_v11, %s5148_s1  ;;  %1065 = vrot.lane.b32.xlu0 %v926_v12, %s5148_s1 }
 0x2e1   : > { %1095 = vrot.lane.b32.xlu1 %v964_v18, %s5148_s1  ;;  %1097 = vrot.lane.b32.xlu0 %v966_v14, %s5148_s1 }
 0x2e5   : > { %1099 = vrot.lane.b32.xlu1 %v973_v28, %s5148_s1  ;;  %1101 = vrot.lane.b32.xlu0 %v970_v21, %s5148_s1 }
 0x2e9   : > { %1103 = vrot.lane.b32.xlu1 %v974_v34, %s5148_s1  ;;  %989 = vperm.xlu0 %3658, %v983_v32  }
 0x2ed   : > { %994 = vperm.xlu1 %3657, %v984_v25   ;;  %999 = vperm.xlu0 %3658, %v985_v29  }
 0x2f1   : > { %1004 = vperm.xlu1 %3657, %v986_v30   ;;  %1259 = vperm.xlu0 %3658, %v3264_v33  }
 0x2f5   : > { %1264 = vperm.xlu1 %3657, %v3265_v35   ;;  %1269 = vperm.xlu0 %3658, %v3266_v36  }
 0x2f9   : > { %1274 = vperm.xlu1 %3657, %v3267_v37   ;;  %1324 = vperm.xlu0 %3658, %v3268_v38   ;;  %v3811_v37 = vld [vmem:[%s5077_s4] ss:$12 sps:$4 sm:$0xff]   ;;  %v3814_v38 = vld [vmem:[%s5077_s4 + $0x1c] ss:$12 sps:$4 sm:$0xff]  }
 0x2fd   : > { %1329 = vperm.xlu1 %3657, %v3269_v39   ;;  %1353 = vperm.xlu0 %3658, %v3272_v40  }
 0x301   : > { %1358 = vperm.xlu1 %3657, %v3273_v41   ;;  %1334 = vperm.xlu0 %3658, %v3270_v42  }
 0x305   : > { %1339 = vperm.xlu1 %3657, %v3271_v43   ;;  %1363 = vperm.xlu0 %3658, %v3274_v44   ;;  %v3817_v44 = vld [vmem:[%s5077_s4 + $0x18] ss:$12 sps:$4 sm:$0xff]  }
 0x309   : > { %1368 = vperm.xlu1 %3657, %v3275_v45   ;;  %3705 = vrot.lane.b32.xlu0 %v3923_v0, %s5141_s17  ;;  %v3818_v45 = vld [vmem:[%s5077_s4 + $0x20] ss:$12 sps:$4 sm:$0xff]  }
 0x30d   : > { %3700 = vrot.lane.b32.xlu1 %v3923_v0, %s5140_s30  ;;  %3715 = vrot.lane.b32.xlu0 %v3923_v0, %s5143_s20 }
 0x311   : > { %3710 = vrot.lane.b32.xlu1 %v3923_v0, %s5142_s23  ;;  %3725 = vrot.lane.b32.xlu0 %v3923_v0, %s5145_s29 }
 0x315   : > { %3720 = vrot.lane.b32.xlu1 %v3923_v0, %s5144_s26 }
 0x319   : > { %3730 = vrot.lane.b32.xlu1 %v3923_v0, %s5146_s19 }
 0x31f   : > { %v1070_v50 = vpop.permute.xlu1 %1069 }
 0x320   : > { %3372 = vmatprep.subr.bf16.mxu1 %v1070_v50 }
 0x321   : > { %3373 = vmatpush3.bf16.msra.mxu1 %v1105_v52 }
 0x323   : > { %v1072_v53 = vpop.permute.xlu1 %1071  ;;  %v1074_v54 = vpop.permute.xlu0 %1073 }
 0x324   : > { %3374 = vmatprep.subr.bf16.mxu1 %v1072_v53 }
 0x325   : > { %3375 = vmatpush3.bf16.msra.mxu1 %v1106_v55 }
 0x327   : > { %v1048_v56 = vpop.permute.xlu1 %1047  ;;  %v1078_v57 = vpop.permute.xlu0 %1077 }
 0x32b   : > { %v1052_v58 = vpop.permute.xlu1 %1051  ;;  %v1082_v59 = vpop.permute.xlu0 %1081 }
 0x32f   : > { %v1056_v60 = vpop.permute.xlu1 %1055  ;;  %v1086_v61 = vpop.permute.xlu0 %1085 }
 0x333   : > { %v1060_v62 = vpop.permute.xlu1 %1059  ;;  %v1090_v63 = vpop.permute.xlu0 %1089 }
 0x337   : > { %v1064_v1 = vpop.permute.xlu1 %1063  ;;  %v1094_v2 = vpop.permute.xlu0 %1093 }
 0x33b   : > { %v1068_v3 = vpop.permute.xlu1 %1067  ;;  %v1046_v4 = vpop.permute.xlu0 %1045 }
 0x33c   : > { %v1107_v8 = vsel %vm687_vm9, %v1046_v4, %v1048_v56 }
 0x33f   : > { %v1076_v5 = vpop.permute.xlu1 %1075  ;;  %v1050_v6 = vpop.permute.xlu0 %1049 }
 0x340   : > { %v1113_v7 = vsel %vm687_vm9, %v1074_v54, %v1076_v5  ;;  %v1108_v12 = vsel %vm687_vm9, %v1050_v6, %v1052_v58 }
 0x341   : > { %3376 = vmatprep.subr.bf16.mxu1 %v1113_v7 }
 0x342   : > { %3377 = vmatpush3.bf16.msra.mxu1 %v1107_v8 }
 0x343   : > { %v1080_v9 = vpop.permute.xlu1 %1079  ;;  %v1054_v10 = vpop.permute.xlu0 %1053 }
 0x344   : > { %v1114_v11 = vsel %vm687_vm9, %v1078_v57, %v1080_v9  ;;  %v1109_v18 = vsel %vm687_vm9, %v1054_v10, %v1056_v60 }
 0x345   : > { %3378 = vmatprep.subr.bf16.mxu1 %v1114_v11 }
 0x346   : > { %3379 = vmatpush3.bf16.msra.mxu1 %v1108_v12 }
 0x347   : > { %v1084_v13 = vpop.permute.xlu1 %1083  ;;  %v1058_v14 = vpop.permute.xlu0 %1057 }
 0x348   : > { %v1115_v16 = vsel %vm687_vm9, %v1082_v59, %v1084_v13  ;;  %v1110_v31 = vsel %vm687_vm9, %v1058_v14, %v1060_v62 }
 0x349   : > { %3380 = vmatprep.subr.bf16.mxu1 %v1115_v16 }
 0x34a   : > { %3381 = vmatpush3.bf16.msra.mxu1 %v1109_v18 }
 0x34b   : > { %v1088_v19 = vpop.permute.xlu1 %1087  ;;  %v1062_v21 = vpop.permute.xlu0 %1061 }
 0x34c   : > { %v1116_v28 = vsel %vm687_vm9, %v1086_v61, %v1088_v19  ;;  %v1111_v29 = vsel %vm687_vm9, %v1062_v21, %v1064_v1 }
 0x34d   : > { %3382 = vmatprep.subr.bf16.mxu1 %v1116_v28 }
 0x34e   : > { %3383 = vmatpush3.bf16.msra.mxu1 %v1110_v31 }
 0x34f   : > { %v1092_v32 = vpop.permute.xlu1 %1091  ;;  %v1066_v34 = vpop.permute.xlu0 %1065 }
 0x350   : > { %v1117_v25 = vsel %vm687_vm9, %v1090_v63, %v1092_v32  ;;  %v1112_v36 = vsel %vm687_vm9, %v1066_v34, %v1068_v3 }
 0x351   : > { %3384 = vmatprep.subr.bf16.mxu1 %v1117_v25 }
 0x352   : > { %3385 = vmatpush3.bf16.msra.mxu1 %v1111_v29 }
 0x353   : > { %v1096_v30 = vpop.permute.xlu1 %1095  ;;  %v1098_v35 = vpop.permute.xlu0 %1097 }
 0x354   : > { %v1118_v33 = vsel %vm687_vm9, %v1094_v2, %v1096_v30 }
 0x355   : > { %3386 = vmatprep.subr.bf16.mxu1 %v1118_v33 }
 0x356   : > { %3387 = vmatpush3.bf16.msra.mxu1 %v1112_v36 }
 0x357   : > { %v1100_v39 = vpop.permute.xlu1 %1099  ;;  %v1102_v41 = vpop.permute.xlu0 %1101 }
 0x358   : > { %v1119_v40 = vsel %vm687_vm9, %v1098_v35, %v1100_v39 }
 0x359   : > { %1179 = vmatmul.mubr.bf16.vlgmr.msra.gmra.mrb[0].mxu1 %v3811_v37  ;;  %3529 = vmatprep.subr.bf16.mxu0 %v1119_v40 }
 0x35a   : > { %3530 = vmatpush3.bf16.msra.mxu0 %v1119_v40  ;;  %1186 = vmatprep.mubr.bf16.mxu1 %v3814_v38 }
 0x35b   : > { %v1104_v42 = vpop.permute.xlu1 %1103 }
 0x35c   : > { %v1120_v43 = vsel %vm687_vm9, %v1102_v41, %v1104_v42 }
 0x35d   : > { %3531 = vmatprep.subr.bf16.mxu0 %v1120_v43 }
 0x35e   : > { %3532 = vmatpush3.bf16.msra.mxu0 %v1120_v43 }
 0x361   : > { %1187 = vmatmul.mubr.bf16.gmra.mrb[4].mxu1 %v3817_v44  ;;  %3534 = vmatmul.mubr.msk.bf16.vlgmr.msra.gmra.mrb[4].mxu0 %vm1139_vm10, %v3818_v45 }
 0x368   : > { %v990_v46 = vpop.permute.xlu0 %989 }
 0x36c   : > { %v995_v48 = vpop.permute.xlu1 %994  ;;  %v1000_v54 = vpop.permute.xlu0 %999 }
 0x370   : > { %v1005_v55 = vpop.permute.xlu1 %1004  ;;  %v1260_v9 = vpop.permute.xlu0 %1259 }
 0x374   : > { %v1265_v14 = vpop.permute.xlu1 %1264 }
 0x378   : > { %v1275_v24 = vpop.permute.xlu1 %1274 }
 0x42c   : > { %v3388_v47 = vpop.f32.mrb[0].mxu1 }
 0x42d   : > { %v3389_v49 = vpop.f32.mrb[1].mxu1 }
 0x42e   : > { %v3390_v50 = vadd.f32 %v3389_v49, %v3388_v47  ;;  %v3391_v51 = vpop.f32.mrb[2].mxu1 }
 0x42f   : > { %v3392_v52 = vpop.f32.mrb[3].mxu1 }
 0x430   : > { %v3393_v53 = vadd.f32 %v3392_v52, %v3391_v51  ;;  %v1181_v58 = vadd.f32 %v3390_v50, %v990_v46 }
 0x432   : > { %v1184_v2 = vadd.f32 %v3393_v53, %v995_v48  ;;  %v1330_v53 = vpop.permute.xlu1 %1329 }
 0x434   : > { %v3394_v56 = vpop.f32.mrb[4].mxu1  ;;  %v3535_v57 = vpop.f32.mrb[4].mxu0 }
 0x435   : > { %v3395_v59 = vpop.f32.mrb[5].mxu1  ;;  %v1229_v60 = vpop.f32.mrb[5].mxu0 }
 0x436   : > { %v3396_v61 = vadd.f32 %v3395_v59, %v3394_v56  ;;  %v1230_v62 = vadd.f32 %v1229_v60, %v1181_v58  ;;  %v3397_v63 = vpop.f32.mrb[6].mxu1  ;;  %v3536_v1 = vpop.f32.mrb[6].mxu0 }
 0x437   : > { %v3398_v3 = vpop.f32.mrb[7].mxu1  ;;  %v1232_v4 = vpop.f32.mrb[7].mxu0 }
 0x438   : > { %v1189_v5 = vadd.f32 %v3396_v61, %v1000_v54  ;;  %v1244_v6 = vmax.f32 %v1230_v62, 0.0  ;;  %v3399_v7 = vadd.f32 %v3398_v3, %v3397_v63  ;;  %v1233_v8 = vadd.f32 %v1232_v4, %v1184_v2 }
 0x43a   : > { %v1238_v10 = vadd.f32 %v3535_v57, %v1189_v5  ;;  %v4395_v11 = vadd.f32 %v1244_v6, %v756_v23  ;;  %v1192_v12 = vadd.f32 %v3399_v7, %v1005_v55  ;;  %v1245_v13 = vmax.f32 %v1233_v8, 0.0  ;;  %v1270_v23 = vpop.permute.xlu0 %1269  ;;  %v1359_v57 = vpop.permute.xlu1 %1358 }
 0x43c   : > { %v1246_v16 = vmax.f32 %v1238_v10, 0.0  ;;  %v1277_v18 = vadd.f32 %v1260_v9, %v4395_v11  ;;  %v1241_v19 = vadd.f32 %v3536_v1, %v1192_v12  ;;  %v4400_v21 = vadd.f32 %v1245_v13, %v757_v27 }
 0x43e   : > { %v4404_v28 = vadd.f32 %v1246_v16, %v758_v22  ;;  %v1247_v31 = vmax.f32 %v1241_v19, 0.0  ;;  %v1278_v17 = vadd.f32 %v1265_v14, %v4400_v21  ;;  %v1291_v32 = vmul.f32 %v1277_v18, %v1277_v18  ;;  %v1325_v52 = vpop.permute.xlu0 %1324  ;;  %v1340_v59 = vpop.permute.xlu1 %1339 }
 0x440   : > { %v1279_v34 = vadd.f32 %v1270_v23, %v4404_v28  ;;  %v4410_v25 = vadd.f32 %v1247_v31, %v759_v26  ;;  %v1281_v29 = vadd.f32 %v1278_v17, %v1277_v18  ;;  %v1292_v30 = vmul.f32 %v1278_v17, %v1278_v17 }
 0x442   : > { %v1293_v27 = vmul.f32 %v1279_v34, %v1279_v34  ;;  %v1280_v33 = vadd.f32 %v1275_v24, %v4410_v25  ;;  %v1282_v15 = vadd.f32 %v1281_v29, %v1279_v34  ;;  %v1295_v22 = vadd.f32 %v1292_v30, %v1291_v32  ;;  %v1354_v56 = vpop.permute.xlu0 %1353  ;;  %v1369_v12 = vpop.permute.xlu1 %1368 }
 0x444   : > { %v1294_v35 = vmul.f32 %v1280_v33, %v1280_v33  ;;  %v1283_v36 = vadd.f32 %v1282_v15, %v1280_v33  ;;  %v1296_v37 = vadd.f32 %v1295_v22, %v1293_v27 }
 0x446   : > { %v1284_v38 = vrot.slane %v1283_v36, 4  ;;  %v1297_v39 = vadd.f32 %v1296_v37, %v1294_v35  ;;  %v1335_v58 = vpop.permute.xlu0 %1334 }
 0x448   : > { %v1285_v40 = vadd.f32 %v1284_v38, %v1283_v36  ;;  %v1298_v41 = vrot.slane %v1297_v39, 4 }
 0x44a   : > { %v1286_v42 = vrot.slane %v1285_v40, 2  ;;  %v1299_v43 = vadd.f32 %v1298_v41, %v1297_v39  ;;  %v1364_v10 = vpop.permute.xlu0 %1363 }
 0x44c   : > { %v1287_v20 = vadd.f32 %v1286_v42, %v1285_v40  ;;  %v1300_v26 = vrot.slane %v1299_v43, 2 }
 0x44e   : > { %v1288_v44 = vrot.slane %v1287_v20, 1  ;;  %v1301_v45 = vadd.f32 %v1300_v26, %v1299_v43  ;;  %v3706_v32 = vpop.permute.xlu0 %3705 }
 0x44f   : > { %v3707_v43 = vunpack.i.l.bf16 %v3706_v32 }
 0x450   : > { %v1289_v46 = vadd.f32 %v1288_v44, %v1287_v20  ;;  %v1302_v47 = vrot.slane %v1301_v45, 1 }
 0x452   : > { %v1290_v48 = vmul.f32 0.03125, %v1289_v46  ;;  %v1303_v49 = vadd.f32 %v1302_v47, %v1301_v45  ;;  %v3716_v29 = vpop.permute.xlu0 %3715  ;;  %v3708_v45 = vunpack.i.h.bf16 %v3706_v32  ;;  %v3293_v32 = vld [vmem:[%s5083_s10 + $0x48] sm:$0xff] }
 0x454   : > { %v1304_v50 = vmul.f32 0.03125, %v1303_v49  ;;  %v1309_v51 = vmul.f32 %v1290_v48, %v1290_v48  ;;  %v1305_v60 = vsub.f32 %v1277_v18, %v1290_v48  ;;  %v1306_v61 = vsub.f32 %v1278_v17, %v1290_v48  ;;  %v3701_v17 = vpop.permute.xlu1 %3700 }
 0x455   : > { %v1307_v62 = vsub.f32 %v1279_v34, %v1290_v48  ;;  %v1308_v63 = vsub.f32 %v1280_v33, %v1290_v48  ;;  %v3702_v44 = vunpack.i.l.bf16 %v3701_v17  ;;  %v3703_v48 = vunpack.i.h.bf16 %v3701_v17  ;;  %v3291_v17 = vld [vmem:[%s4146_s27 + $0x58] sm:$0xff] }
 0x456   : > { %v1310_v54 = vsub.f32 %v1304_v50, %v1309_v51  ;;  %v4437_v24 = vpop.permute.xlu0 %3725  ;;  %v3717_v49 = vunpack.i.l.bf16 %v3716_v29 }
 0x458   : > { %v1311_v55 = vadd.f32 1e-05, %v1310_v54  ;;  %v3711_v23 = vpop.permute.xlu1 %3710 }
 0x45a   : > { %3849 = vrsqrt.f32 %v1311_v55 }
 0x45c   : > { %v4433_v34 = vpop.permute.xlu1 %3720 }
 0x460   : > { %v4435_v30 = vpop.permute.xlu1 %3730 }
 0x464   : > { %v3850_v1 = vpop.eup %3849 }
 0x465   : > { %v1313_v2 = vmul.f32 %v3850_v1, %v1305_v60  ;;  %v1314_v3 = vmul.f32 %v3850_v1, %v1306_v61  ;;  %v1315_v4 = vmul.f32 %v3850_v1, %v1307_v62  ;;  %v1316_v5 = vmul.f32 %v3850_v1, %v1308_v63 }
 0x466   : > { %v3722_v61 = vunpack.i.l.bf16 %v4433_v34  ;;  %v3728_v62 = vunpack.i.h.bf16 %v4437_v24 }
 0x467   : > { %v1342_v6 = vmul.f32 %v1325_v52, %v1313_v2  ;;  %v1343_v7 = vmul.f32 %v1330_v53, %v1314_v3  ;;  %v1344_v8 = vmul.f32 %v1335_v58, %v1315_v4  ;;  %v1345_v9 = vmul.f32 %v1340_v59, %v1316_v5  ;;  %v3821_v58 = vld [vmem:[%s5078_s5 + $0x4] ss:$12 sps:$4 sm:$0xff]   ;;  %v3824_v4 = vld [vmem:[%s5078_s5 + $0x8] ss:$12 sps:$4 sm:$0xff]  }
 0x468   : > { %v3712_v52 = vunpack.i.l.bf16 %v3711_v23  ;;  %v3718_v53 = vunpack.i.h.bf16 %v3716_v29  ;;  %1672 = vmatprep.mubr.bf16.mxu0 %v3821_v58  ;;  %v3723_v2 = vunpack.i.h.bf16 %v4433_v34  ;;  %3541 = vmatprep.mubr.msk.bf16.mxu1 %vm1139_vm10, %v3824_v4  ;;  %v3296_v34 = vld [vmem:[%s5084_s11 + $0x40] sm:$0xff]  ;;  %v3297_v29 = vld [vmem:[%s5084_s11 + $0x48] sm:$0xff] }
 0x469   : > { %v1371_v13 = vadd.f32 %v1354_v56, %v1342_v6  ;;  %v1372_v14 = vadd.f32 %v1359_v57, %v1343_v7  ;;  %v1373_v16 = vadd.f32 %v1364_v10, %v1344_v8  ;;  %v1374_v19 = vadd.f32 %v1369_v12, %v1345_v9  ;;  %v3276_v10 = vld [vmem:[%s5082_s9 + $0x20] sm:$0xff] }
 0x46a   : > { %v3713_v56 = vunpack.i.h.bf16 %v3711_v23  ;;  %v3727_v57 = vunpack.i.l.bf16 %v4437_v24  ;;  %v3732_v6 = vunpack.i.l.bf16 %v4435_v30  ;;  %v3733_v9 = vunpack.i.h.bf16 %v4435_v30  ;;  %v3292_v23 = vld [vmem:[%s5083_s10 + $0x40] sm:$0xff]  ;;  %v3294_v30 = vld [vmem:[%s5083_s10 + $0x50] sm:$0xff]  ;;  %v3295_v24 = vld [vmem:[%s5083_s10 + $0x58] sm:$0xff] }
 0x46b   : > { %v1375_v31 = vpack.c.bf16 %v1372_v14, %v1371_v13  ;;  %v1376_v18 = vpack.c.bf16 %v1374_v19, %v1373_v16  ;;  %v3277_v13 = vld [vmem:[%s5082_s9 + $0x28] sm:$0xff]  ;;  %v3278_v14 = vld [vmem:[%s5082_s9 + $0x30] sm:$0xff]  ;;  %v3279_v16 = vld [vmem:[%s5082_s9 + $0x38] sm:$0xff] }
 0x46c   : > { %v3288_v19 = vld [vmem:[%s4146_s27 + $0x40] sm:$0xff] }
 0x46d   : > { %1421 = vrot.lane.b32.xlu0 %v1375_v31, %s5147_s28  ;;  %1423 = vrot.lane.b32.xlu1 %v1376_v18, %s5147_s28 }
 0x471   : > { %1429 = vrot.lane.b32.xlu0 %v1375_v31, %s5140_s30  ;;  %1393 = vrot.lane.b32.xlu1 %v1375_v31, %s5141_s17 }
 0x475   : > { %1433 = vrot.lane.b32.xlu0 %v1376_v18, %s5140_s30  ;;  %1397 = vrot.lane.b32.xlu1 %v1376_v18, %s5141_s17  ;;  %s5150_s30 = sld [smem:[#allocation10_spill]] }
 0x479   : > { %1439 = vrot.lane.b32.xlu0 %v1375_v31, %s5142_s23  ;;  %1403 = vrot.lane.b32.xlu1 %v1375_v31, %s5143_s20 }
 0x47d   : > { %1443 = vrot.lane.b32.xlu0 %v1376_v18, %s5142_s23  ;;  %1407 = vrot.lane.b32.xlu1 %v1376_v18, %s5143_s20  ;;  %s3933_s23 = smov 108   ;;  %s3934_s20 = smov 104  }
 0x481   : > { %1449 = vrot.lane.b32.xlu0 %v1375_v31, %s5144_s26  ;;  %1413 = vrot.lane.b32.xlu1 %v1375_v31, %s5145_s29 }
 0x485   : > { %1453 = vrot.lane.b32.xlu0 %v1376_v18, %s5144_s26  ;;  %1417 = vrot.lane.b32.xlu1 %v1376_v18, %s5145_s29  ;;  %s3935_s26 = smov 100   ;;  %s3936_s29 = smov 96  }
 0x489   : > { %1459 = vrot.lane.b32.xlu0 %v1375_v31, %s5146_s19  ;;  %3735 = vrot.lane.b32.xlu1 %v3923_v0, %s5148_s1 }
 0x48d   : > { %1463 = vrot.lane.b32.xlu0 %v1376_v18, %s5146_s19 }
 0x491   : > { %1534 = vrot.lane.b32.xlu0 %v1375_v31, %s5148_s1  ;;  %v3289_v31 = vld [vmem:[%s4146_s27 + $0x48] sm:$0xff] }
 0x495   : > { %1538 = vrot.lane.b32.xlu0 %v1376_v18, %s5148_s1  ;;  %v3290_v18 = vld [vmem:[%s4146_s27 + $0x50] sm:$0xff] }
 0x4df   : > { %v1424_v27 = vpop.permute.xlu1 %1423  ;;  %v1422_v33 = vpop.permute.xlu0 %1421 }
 0x4e0   : > { %1564 = vrot.lane.b32.xlu1 %v1422_v33, %s5148_s1  ;;  %v3299_v33 = vld [vmem:[%s5084_s11 + $0x58] sm:$0xff] }
 0x4e3   : > { %v1394_v0 = vpop.permute.xlu1 %1393  ;;  %v1430_v15 = vpop.permute.xlu0 %1429 }
 0x4e4   : > { %1566 = vrot.lane.b32.xlu1 %v1424_v27, %s5148_s1  ;;  %1568 = vrot.lane.b32.xlu0 %v1430_v15, %s5148_s1  ;;  %v1399_v26 = vsel %vm555_vm0, %v3707_v43, %v1394_v0  ;;  %v1437_v46 = vsel %vm577_vm4, %v1430_v15, %v3702_v44  ;;  %v3298_v27 = vld [vmem:[%s5084_s11 + $0x50] sm:$0xff] }
 0x4e7   : > { %v1398_v22 = vpop.permute.xlu1 %1397  ;;  %v1434_v35 = vpop.permute.xlu0 %1433 }
 0x4e8   : > { %1542 = vrot.lane.b32.xlu1 %v1394_v0, %s5148_s1  ;;  %1572 = vrot.lane.b32.xlu0 %v1434_v35, %s5148_s1  ;;  %v1400_v47 = vsel %vm555_vm0, %v3708_v45, %v1398_v22  ;;  %v1438_v50 = vsel %vm577_vm4, %v1434_v35, %v3703_v48  ;;  %vm1966_vm0 = vcmask 785408   ;;  %vm2415_vm4 = vcmask 654336  }
 0x4eb   : > { %v1404_v36 = vpop.permute.xlu1 %1403  ;;  %v1440_v37 = vpop.permute.xlu0 %1439 }
 0x4ec   : > { %1546 = vrot.lane.b32.xlu1 %v1398_v22, %s5148_s1  ;;  %1576 = vrot.lane.b32.xlu0 %v1440_v37, %s5148_s1  ;;  %v1409_v51 = vsel %vm561_vm3, %v3717_v49, %v1404_v36  ;;  %v1447_v54 = vsel %vm583_vm6, %v1440_v37, %v3712_v52 }
 0x4ef   : > { %v1408_v38 = vpop.permute.xlu1 %1407  ;;  %v1444_v39 = vpop.permute.xlu0 %1443 }
 0x4f0   : > { %1550 = vrot.lane.b32.xlu1 %v1404_v36, %s5148_s1  ;;  %1580 = vrot.lane.b32.xlu0 %v1444_v39, %s5148_s1  ;;  %v1410_v55 = vsel %vm561_vm3, %v3718_v53, %v1408_v38  ;;  %v1448_v59 = vsel %vm583_vm6, %v1444_v39, %v3713_v56  ;;  %vm2434_vm3 = vcmask 392192   ;;  %vm3945_vm6 = vmmov 0  }
 0x4f3   : > { %v1450_v40 = vpop.permute.xlu0 %1449  ;;  %v1414_v41 = vpop.permute.xlu1 %1413 }
 0x4f4   : > { %1554 = vrot.lane.b32.xlu1 %v1408_v38, %s5148_s1  ;;  %1584 = vrot.lane.b32.xlu0 %v1450_v40, %s5148_s1  ;;  %v1419_v60 = vsel %vm567_vm2, %v3727_v57, %v1414_v41  ;;  %v1457_v63 = vsel %vm589_vm7, %v1450_v40, %v3722_v61 }
 0x4f7   : > { %v1454_v42 = vpop.permute.xlu0 %1453  ;;  %v1418_v20 = vpop.permute.xlu1 %1417 }
 0x4f8   : > { %1558 = vrot.lane.b32.xlu1 %v1414_v41, %s5148_s1  ;;  %1588 = vrot.lane.b32.xlu0 %v1454_v42, %s5148_s1  ;;  %v1420_v1 = vsel %vm567_vm2, %v3728_v62, %v1418_v20  ;;  %v1458_v5 = vsel %vm589_vm7, %v1454_v42, %v3723_v2  ;;  %vm2394_vm2 = vcmask 916480  }
 0x4fb   : > { %v1460_v3 = vpop.permute.xlu0 %1459  ;;  %v3736_v0 = vpop.permute.xlu1 %3735 }
 0x4fc   : > { %1562 = vrot.lane.b32.xlu1 %v1418_v20, %s5148_s1  ;;  %1540 = vrot.lane.b32.xlu0 %v1399_v26, %s5148_s1  ;;  %v1467_v8 = vsel %vm595_vm8, %v1460_v3, %v3732_v6  ;;  %v3737_v22 = vunpack.i.l.bf16 %v3736_v0  ;;  %v3738_v37 = vunpack.i.h.bf16 %v3736_v0 }
 0x4ff   : > { %v1464_v7 = vpop.permute.xlu0 %1463 }
 0x500   : > { %1570 = vrot.lane.b32.xlu1 %v1437_v46, %s5148_s1  ;;  %1544 = vrot.lane.b32.xlu0 %v1400_v47, %s5148_s1  ;;  %v1468_v12 = vsel %vm595_vm8, %v1464_v7, %v3733_v9 }
 0x503   : > { %v1535_v15 = vpop.permute.xlu0 %1534 }
 0x504   : > { %1574 = vrot.lane.b32.xlu1 %v1438_v50, %s5148_s1  ;;  %1548 = vrot.lane.b32.xlu0 %v1409_v51, %s5148_s1  ;;  %v1600_v38 = vsel %vm687_vm9, %v3737_v22, %v1535_v15 }
 0x507   : > { %v1539_v35 = vpop.permute.xlu0 %1538 }
 0x508   : > { %1578 = vrot.lane.b32.xlu1 %v1447_v54, %s5148_s1  ;;  %1552 = vrot.lane.b32.xlu0 %v1410_v55, %s5148_s1  ;;  %v1601_v41 = vsel %vm687_vm9, %v3738_v37, %v1539_v35 }
 0x50c   : > { %1582 = vrot.lane.b32.xlu1 %v1448_v59, %s5148_s1  ;;  %1556 = vrot.lane.b32.xlu0 %v1419_v60, %s5148_s1 }
 0x510   : > { %1586 = vrot.lane.b32.xlu1 %v1457_v63, %s5148_s1  ;;  %1560 = vrot.lane.b32.xlu0 %v1420_v1, %s5148_s1 }
 0x514   : > { %1590 = vrot.lane.b32.xlu1 %v1458_v5, %s5148_s1  ;;  %1592 = vrot.lane.b32.xlu0 %v1460_v3, %s5148_s1 }
 0x518   : > { %1594 = vrot.lane.b32.xlu1 %v1467_v8, %s5148_s1  ;;  %1596 = vrot.lane.b32.xlu0 %v1464_v7, %s5148_s1 }
 0x51c   : > { %1598 = vrot.lane.b32.xlu1 %v1468_v12, %s5148_s1  ;;  %1484 = vperm.xlu0 %3658, %v3276_v10   ;;  %s3941_s1 = smov 32  }
 0x520   : > { %1489 = vperm.xlu1 %3657, %v3277_v13   ;;  %1494 = vperm.xlu0 %3658, %v3278_v14   ;;  %v3819_v14 = vld [vmem:[%s5078_s5] ss:$12 sps:$4 sm:$0xff]  }
 0x524   : > { %1499 = vperm.xlu1 %3657, %v3279_v16   ;;  %1753 = vperm.xlu0 %3658, %v3288_v19   ;;  %v3822_v16 = vld [vmem:[%s5078_s5 + $0x1c] ss:$12 sps:$4 sm:$0xff]  }
 0x528   : > { %1758 = vperm.xlu1 %3657, %v3289_v31   ;;  %1763 = vperm.xlu0 %3658, %v3290_v18  }
 0x52c   : > { %1768 = vperm.xlu1 %3657, %v3291_v17   ;;  %1818 = vperm.xlu0 %3658, %v3292_v23  }
 0x530   : > { %1823 = vperm.xlu1 %3657, %v3293_v32   ;;  %1847 = vperm.xlu0 %3658, %v3296_v34   ;;  %v3825_v32 = vld [vmem:[%s5078_s5 + $0x18] ss:$12 sps:$4 sm:$0xff]   ;;  %v3826_v34 = vld [vmem:[%s5078_s5 + $0x20] ss:$12 sps:$4 sm:$0xff]  }
 0x534   : > { %1852 = vperm.xlu1 %3657, %v3297_v29   ;;  %1828 = vperm.xlu0 %3658, %v3294_v30   ;;  %v4565_v29 = vld [vmem:[#allocation2] sm:$0xff] }
 0x535   : > { %v4569_v30 = vpack.i.bf16 %v4565_v29, %v4565_v29 }
 0x538   : > { %1833 = vperm.xlu1 %3657, %v3295_v24   ;;  %1857 = vperm.xlu0 %3658, %v3298_v27  }
 0x53c   : > { %1862 = vperm.xlu1 %3657, %v3299_v33   ;;  %3745 = vrot.lane.b32.xlu0 %v4569_v30, %s5147_s28 }
 0x540   : > { %3740 = vrot.lane.b32.xlu1 %v4569_v30, %s3933_s23  ;;  %3755 = vrot.lane.b32.xlu0 %v4569_v30, %s5146_s19 }
 0x544   : > { %3750 = vrot.lane.b32.xlu1 %v4569_v30, %s3934_s20  ;;  %3765 = vrot.lane.b32.xlu0 %v4569_v30, %s3937_s14 }
 0x548   : > { %3760 = vrot.lane.b32.xlu1 %v4569_v30, %s3935_s26 }
 0x54c   : > { %3770 = vrot.lane.b32.xlu1 %v4569_v30, %s3936_s29 }
 0x552   : > { %v1565_v36 = vpop.permute.xlu1 %1564 }
 0x553   : > { %3404 = vmatprep.subr.bf16.mxu0 %v1565_v36 }
 0x554   : > { %3405 = vmatpush3.bf16.msra.mxu0 %v1600_v38 }
 0x556   : > { %v1567_v39 = vpop.permute.xlu1 %1566  ;;  %v1569_v40 = vpop.permute.xlu0 %1568 }
 0x557   : > { %3406 = vmatprep.subr.bf16.mxu0 %v1567_v39 }
 0x558   : > { %3407 = vmatpush3.bf16.msra.mxu0 %v1601_v41 }
 0x55a   : > { %v1543_v42 = vpop.permute.xlu1 %1542  ;;  %v1573_v43 = vpop.permute.xlu0 %1572 }
 0x55e   : > { %v1547_v20 = vpop.permute.xlu1 %1546  ;;  %v1577_v26 = vpop.permute.xlu0 %1576 }
 0x562   : > { %v1551_v44 = vpop.permute.xlu1 %1550  ;;  %v1581_v45 = vpop.permute.xlu0 %1580 }
 0x566   : > { %v1555_v46 = vpop.permute.xlu1 %1554  ;;  %v1585_v47 = vpop.permute.xlu0 %1584 }
 0x56a   : > { %v1559_v48 = vpop.permute.xlu1 %1558  ;;  %v1589_v49 = vpop.permute.xlu0 %1588 }
 0x56e   : > { %v1563_v50 = vpop.permute.xlu1 %1562  ;;  %v1541_v51 = vpop.permute.xlu0 %1540 }
 0x56f   : > { %v1602_v55 = vsel %vm687_vm9, %v1541_v51, %v1543_v42 }
 0x572   : > { %v1571_v52 = vpop.permute.xlu1 %1570  ;;  %v1545_v53 = vpop.permute.xlu0 %1544 }
 0x573   : > { %v1608_v54 = vsel %vm687_vm9, %v1569_v40, %v1571_v52  ;;  %v1603_v59 = vsel %vm687_vm9, %v1545_v53, %v1547_v20 }
 0x574   : > { %3408 = vmatprep.subr.bf16.mxu0 %v1608_v54 }
 0x575   : > { %3409 = vmatpush3.bf16.msra.mxu0 %v1602_v55 }
 0x576   : > { %v1575_v56 = vpop.permute.xlu1 %1574  ;;  %v1549_v57 = vpop.permute.xlu0 %1548 }
 0x577   : > { %v1609_v58 = vsel %vm687_vm9, %v1573_v43, %v1575_v56  ;;  %v1604_v63 = vsel %vm687_vm9, %v1549_v57, %v1551_v44 }
 0x578   : > { %3410 = vmatprep.subr.bf16.mxu0 %v1609_v58 }
 0x579   : > { %3411 = vmatpush3.bf16.msra.mxu0 %v1603_v59 }
 0x57a   : > { %v1579_v60 = vpop.permute.xlu1 %1578  ;;  %v1553_v61 = vpop.permute.xlu0 %1552 }
 0x57b   : > { %v1610_v62 = vsel %vm687_vm9, %v1577_v26, %v1579_v60  ;;  %v1605_v4 = vsel %vm687_vm9, %v1553_v61, %v1555_v46 }
 0x57c   : > { %3412 = vmatprep.subr.bf16.mxu0 %v1610_v62 }
 0x57d   : > { %3413 = vmatpush3.bf16.msra.mxu0 %v1604_v63 }
 0x57e   : > { %v1583_v1 = vpop.permute.xlu1 %1582  ;;  %v1557_v2 = vpop.permute.xlu0 %1556 }
 0x57f   : > { %v1611_v3 = vsel %vm687_vm9, %v1581_v45, %v1583_v1  ;;  %v1606_v8 = vsel %vm687_vm9, %v1557_v2, %v1559_v48 }
 0x580   : > { %3414 = vmatprep.subr.bf16.mxu0 %v1611_v3 }
 0x581   : > { %3415 = vmatpush3.bf16.msra.mxu0 %v1605_v4 }
 0x582   : > { %v1587_v5 = vpop.permute.xlu1 %1586  ;;  %v1561_v6 = vpop.permute.xlu0 %1560 }
 0x583   : > { %v1612_v7 = vsel %vm687_vm9, %v1585_v47, %v1587_v5  ;;  %v1607_v12 = vsel %vm687_vm9, %v1561_v6, %v1563_v50 }
 0x584   : > { %3416 = vmatprep.subr.bf16.mxu0 %v1612_v7 }
 0x585   : > { %3417 = vmatpush3.bf16.msra.mxu0 %v1606_v8 }
 0x586   : > { %v1591_v9 = vpop.permute.xlu1 %1590  ;;  %v1593_v13 = vpop.permute.xlu0 %1592 }
 0x587   : > { %v1613_v10 = vsel %vm687_vm9, %v1589_v49, %v1591_v9 }
 0x588   : > { %3418 = vmatprep.subr.bf16.mxu0 %v1613_v10 }
 0x589   : > { %3419 = vmatpush3.bf16.msra.mxu0 %v1607_v12 }
 0x58a   : > { %v1595_v19 = vpop.permute.xlu1 %1594  ;;  %v1597_v18 = vpop.permute.xlu0 %1596 }
 0x58b   : > { %v1614_v31 = vsel %vm687_vm9, %v1593_v13, %v1595_v19 }
 0x58c   : > { %1673 = vmatmul.mubr.bf16.vlgmr.msra.gmra.mrb[8].mxu0 %v3819_v14  ;;  %3537 = vmatprep.subr.bf16.mxu1 %v1614_v31 }
 0x58d   : > { %3538 = vmatpush3.bf16.msra.mxu1 %v1614_v31  ;;  %1680 = vmatprep.mubr.bf16.mxu0 %v3822_v16 }
 0x58e   : > { %v1599_v17 = vpop.permute.xlu1 %1598 }
 0x58f   : > { %v1615_v23 = vsel %vm687_vm9, %v1597_v18, %v1599_v17 }
 0x590   : > { %3539 = vmatprep.subr.bf16.mxu1 %v1615_v23 }
 0x591   : > { %3540 = vmatpush3.bf16.msra.mxu1 %v1615_v23 }
 0x594   : > { %1681 = vmatmul.mubr.bf16.gmra.mrb[12].mxu0 %v3825_v32  ;;  %3542 = vmatmul.mubr.msk.bf16.vlgmr.msra.gmra.mrb[8].mxu1 %vm1139_vm10, %v3826_v34 }
 0x59b   : > { %v1485_v24 = vpop.permute.xlu0 %1484 }
 0x59f   : > { %v1490_v33 = vpop.permute.xlu1 %1489  ;;  %v1495_v37 = vpop.permute.xlu0 %1494 }
 0x5a3   : > { %v1500_v38 = vpop.permute.xlu1 %1499  ;;  %v1754_v53 = vpop.permute.xlu0 %1753 }
 0x5a7   : > { %v1759_v58 = vpop.permute.xlu1 %1758  ;;  %v1764_v3 = vpop.permute.xlu0 %1763 }
 0x5ab   : > { %v1769_v8 = vpop.permute.xlu1 %1768 }
 0x65f   : > { %v3420_v27 = vpop.f32.mrb[8].mxu0 }
 0x660   : > { %v3421_v0 = vpop.f32.mrb[9].mxu0 }
 0x661   : > { %v3422_v15 = vadd.f32 %v3421_v0, %v3420_v27  ;;  %v3423_v22 = vpop.f32.mrb[10].mxu0 }
 0x662   : > { %v3424_v35 = vpop.f32.mrb[11].mxu0 }
 0x663   : > { %v3425_v36 = vadd.f32 %v3424_v35, %v3423_v22  ;;  %v1675_v41 = vadd.f32 %v3422_v15, %v1485_v24 }
 0x665   : > { %v1678_v46 = vadd.f32 %v3425_v36, %v1490_v33  ;;  %v1819_v36 = vpop.permute.xlu0 %1818 }
 0x667   : > { %v3426_v39 = vpop.f32.mrb[12].mxu0  ;;  %v3543_v40 = vpop.f32.mrb[8].mxu1 }
 0x668   : > { %v3427_v42 = vpop.f32.mrb[13].mxu0  ;;  %v1723_v43 = vpop.f32.mrb[9].mxu1 }
 0x669   : > { %v3428_v20 = vadd.f32 %v3427_v42, %v3426_v39  ;;  %v1724_v26 = vadd.f32 %v1723_v43, %v1675_v41  ;;  %v3429_v44 = vpop.f32.mrb[14].mxu0  ;;  %v3544_v45 = vpop.f32.mrb[10].mxu1 }
 0x66a   : > { %v3430_v47 = vpop.f32.mrb[15].mxu0  ;;  %v1726_v48 = vpop.f32.mrb[11].mxu1 }
 0x66b   : > { %v1683_v49 = vadd.f32 %v3428_v20, %v1495_v37  ;;  %v1738_v50 = vmax.f32 %v1724_v26, 0.0  ;;  %v3431_v51 = vadd.f32 %v3430_v47, %v3429_v44  ;;  %v1727_v52 = vadd.f32 %v1726_v48, %v1678_v46  ;;  %v1824_v37 = vpop.permute.xlu1 %1823 }
 0x66d   : > { %v1732_v54 = vadd.f32 %v3543_v40, %v1683_v49  ;;  %v4586_v55 = vadd.f32 %v1738_v50, %v4395_v11  ;;  %v1686_v56 = vadd.f32 %v3431_v51, %v1500_v38  ;;  %v1739_v57 = vmax.f32 %v1727_v52, 0.0  ;;  %v1848_v40 = vpop.permute.xlu0 %1847 }
 0x66f   : > { %v1740_v59 = vmax.f32 %v1732_v54, 0.0  ;;  %v1771_v60 = vadd.f32 %v1754_v53, %v4586_v55  ;;  %v1735_v61 = vadd.f32 %v3544_v45, %v1686_v56  ;;  %v4590_v62 = vadd.f32 %v1739_v57, %v4400_v21  ;;  %v1853_v41 = vpop.permute.xlu1 %1852 }
 0x671   : > { %v4593_v63 = vadd.f32 %v1740_v59, %v4404_v28  ;;  %v1741_v1 = vmax.f32 %v1735_v61, 0.0  ;;  %v1772_v2 = vadd.f32 %v1759_v58, %v4590_v62  ;;  %v1785_v4 = vmul.f32 %v1771_v60, %v1771_v60  ;;  %v1829_v42 = vpop.permute.xlu0 %1828 }
 0x673   : > { %v1773_v11 = vadd.f32 %v1764_v3, %v4593_v63  ;;  %v4598_v5 = vadd.f32 %v1741_v1, %v4410_v25  ;;  %v1775_v6 = vadd.f32 %v1772_v2, %v1771_v60  ;;  %v1786_v7 = vmul.f32 %v1772_v2, %v1772_v2  ;;  %v1834_v43 = vpop.permute.xlu1 %1833 }
 0x675   : > { %v1787_v9 = vmul.f32 %v1773_v11, %v1773_v11  ;;  %v1774_v21 = vadd.f32 %v1769_v8, %v4598_v5  ;;  %v1776_v10 = vadd.f32 %v1775_v6, %v1773_v11  ;;  %v1789_v12 = vadd.f32 %v1786_v7, %v1785_v4  ;;  %v1858_v56 = vpop.permute.xlu0 %1857 }
 0x677   : > { %v1788_v28 = vmul.f32 %v1774_v21, %v1774_v21  ;;  %v1777_v13 = vadd.f32 %v1776_v10, %v1774_v21  ;;  %v1790_v14 = vadd.f32 %v1789_v12, %v1787_v9  ;;  %v1863_v57 = vpop.permute.xlu1 %1862 }
 0x679   : > { %v1778_v16 = vrot.slane %v1777_v13, 4  ;;  %v1791_v19 = vadd.f32 %v1790_v14, %v1788_v28 }
 0x67b   : > { %v1779_v31 = vadd.f32 %v1778_v16, %v1777_v13  ;;  %v1792_v18 = vrot.slane %v1791_v19, 4 }
 0x67d   : > { %v1780_v17 = vrot.slane %v1779_v31, 2  ;;  %v1793_v23 = vadd.f32 %v1792_v18, %v1791_v19 }
 0x67f   : > { %v1781_v32 = vadd.f32 %v1780_v17, %v1779_v31  ;;  %v1794_v25 = vrot.slane %v1793_v23, 2 }
 0x681   : > { %v1782_v34 = vrot.slane %v1781_v32, 1  ;;  %v1795_v24 = vadd.f32 %v1794_v25, %v1793_v23 }
 0x683   : > { %v1783_v27 = vadd.f32 %v1782_v34, %v1781_v32  ;;  %v1796_v33 = vrot.slane %v1795_v24, 1 }
 0x685   : > { %v1784_v0 = vmul.f32 0.03125, %v1783_v27  ;;  %v1797_v15 = vadd.f32 %v1796_v33, %v1795_v24 }
 0x687   : > { %v1798_v22 = vmul.f32 0.03125, %v1797_v15  ;;  %v1803_v35 = vmul.f32 %v1784_v0, %v1784_v0  ;;  %v1799_v20 = vsub.f32 %v1771_v60, %v1784_v0  ;;  %v1800_v26 = vsub.f32 %v1772_v2, %v1784_v0  ;;  %v3741_v2 = vpop.permute.xlu1 %3740 }
 0x688   : > { %v1801_v44 = vsub.f32 %v1773_v11, %v1784_v0  ;;  %v1802_v45 = vsub.f32 %v1774_v21, %v1784_v0  ;;  %v3746_v11 = vpop.permute.xlu0 %3745  ;;  %v3742_v27 = vunpack.i.l.bf16 %v3741_v2 }
 0x689   : > { %v1804_v38 = vsub.f32 %v1798_v22, %v1803_v35  ;;  %v3747_v25 = vunpack.i.l.bf16 %v3746_v11  ;;  %v3748_v33 = vunpack.i.h.bf16 %v3746_v11  ;;  %v3743_v22 = vunpack.i.h.bf16 %v3741_v2  ;;  %v3313_v2 = vld [vmem:[%s4146_s27 + $0x68] sm:$0xff]  ;;  %v3315_v11 = vld [vmem:[%s4146_s27 + $0x78] sm:$0xff] }
 0x68b   : > { %v1805_v39 = vadd.f32 1e-05, %v1804_v38  ;;  %v4621_v4 = vpop.permute.xlu1 %3750 }
 0x68c   : > { %v3756_v7 = vpop.permute.xlu0 %3755  ;;  %v3752_v38 = vunpack.i.l.bf16 %v4621_v4 }
 0x68d   : > { %3851 = vrsqrt.f32 %v1805_v39  ;;  %v3757_v35 = vunpack.i.l.bf16 %v3756_v7  ;;  %v3758_v39 = vunpack.i.h.bf16 %v3756_v7  ;;  %v3317_v7 = vld [vmem:[%s5083_s10 + $0x68] sm:$0xff] }
 0x68f   : > { %v4623_v6 = vpop.permute.xlu1 %3760 }
 0x690   : > { %v4627_v9 = vpop.permute.xlu0 %3765 }
 0x693   : > { %v4625_v8 = vpop.permute.xlu1 %3770 }
 0x697   : > { %v3852_v46 = vpop.eup %3851 }
 0x698   : > { %v1807_v47 = vmul.f32 %v3852_v46, %v1799_v20  ;;  %v1808_v48 = vmul.f32 %v3852_v46, %v1800_v26  ;;  %v1809_v49 = vmul.f32 %v3852_v46, %v1801_v44  ;;  %v1810_v50 = vmul.f32 %v3852_v46, %v1802_v45  ;;  %v3829_v20 = vld [vmem:[%s5079_s6 + $0x4] ss:$12 sps:$4 sm:$0xff]  }
 0x699   : > { %2173 = vmatprep.mubr.bf16.mxu1 %v3829_v20  ;;  %v3762_v45 = vunpack.i.l.bf16 %v4623_v6  ;;  %v3768_v46 = vunpack.i.h.bf16 %v4627_v9 }
 0x69a   : > { %v1836_v51 = vmul.f32 %v1819_v36, %v1807_v47  ;;  %v1837_v52 = vmul.f32 %v1824_v37, %v1808_v48  ;;  %v1838_v53 = vmul.f32 %v1829_v42, %v1809_v49  ;;  %v1839_v54 = vmul.f32 %v1834_v43, %v1810_v50 }
 0x69b   : > { %v3753_v42 = vunpack.i.h.bf16 %v4621_v4  ;;  %v3767_v43 = vunpack.i.l.bf16 %v4627_v9  ;;  %v3763_v49 = vunpack.i.h.bf16 %v4623_v6  ;;  %v3314_v4 = vld [vmem:[%s4146_s27 + $0x70] sm:$0xff]  ;;  %v3316_v6 = vld [vmem:[%s5083_s10 + $0x60] sm:$0xff]  ;;  %v3321_v9 = vld [vmem:[%s5084_s11 + $0x68] sm:$0xff] }
 0x69c   : > { %v1865_v58 = vadd.f32 %v1848_v40, %v1836_v51  ;;  %v1866_v59 = vadd.f32 %v1853_v41, %v1837_v52  ;;  %v1867_v61 = vadd.f32 %v1858_v56, %v1838_v53  ;;  %v1868_v1 = vadd.f32 %v1863_v57, %v1839_v54  ;;  %v3832_v51 = vld [vmem:[%s5079_s6 + $0x8] ss:$12 sps:$4 sm:$0xff]  }
 0x69d   : > { %3549 = vmatprep.mubr.msk.bf16.mxu0 %vm1139_vm10, %v3832_v51  ;;  %v3772_v53 = vunpack.i.l.bf16 %v4625_v8  ;;  %v3773_v57 = vunpack.i.h.bf16 %v4625_v8  ;;  %v3320_v8 = vld [vmem:[%s5084_s11 + $0x60] sm:$0xff] }
 0x69e   : > { %v1869_v3 = vpack.c.bf16 %v1866_v59, %v1865_v58  ;;  %v1870_v60 = vpack.c.bf16 %v1868_v1, %v1867_v61  ;;  %v3300_v58 = vld [vmem:[%s5082_s9 + $0x40] sm:$0xff]  ;;  %v3301_v61 = vld [vmem:[%s5082_s9 + $0x48] sm:$0xff]  ;;  %v3302_v1 = vld [vmem:[%s5082_s9 + $0x50] sm:$0xff] }
 0x6a0   : > { %1917 = vrot.lane.b32.xlu0 %v1869_v3, %s3938_s0  ;;  %1919 = vrot.lane.b32.xlu1 %v1870_v60, %s3938_s0 }
 0x6a4   : > { %1925 = vrot.lane.b32.xlu0 %v1869_v3, %s3933_s23  ;;  %1887 = vrot.lane.b32.xlu1 %v1869_v3, %s5147_s28 }
 0x6a8   : > { %1929 = vrot.lane.b32.xlu0 %v1870_v60, %s3933_s23  ;;  %1891 = vrot.lane.b32.xlu1 %v1870_v60, %s5147_s28 }
 0x6ac   : > { %1936 = vrot.lane.b32.xlu0 %v1869_v3, %s3934_s20  ;;  %1898 = vrot.lane.b32.xlu1 %v1869_v3, %s5146_s19 }
 0x6b0   : > { %1940 = vrot.lane.b32.xlu0 %v1870_v60, %s3934_s20  ;;  %1902 = vrot.lane.b32.xlu1 %v1870_v60, %s5146_s19  ;;  %s525_s20 = sand.u32 1, %s5149_s24   ;;  %s3362_s19 = sshll.u32 %s5150_s30, 6 }
 0x6b4   : > { %1947 = vrot.lane.b32.xlu0 %v1869_v3, %s3935_s26  ;;  %1908 = vrot.lane.b32.xlu1 %v1869_v3, %s3937_s14 }
 0x6b8   : > { %1951 = vrot.lane.b32.xlu0 %v1870_v60, %s3935_s26  ;;  %1912 = vrot.lane.b32.xlu1 %v1870_v60, %s3937_s14  ;;  %s3249_s26 = sshll.u32 %s525_s20, 2 }
 0x6b9   : > { %s527_s28 = scalar_lea.vmem [#allocation3], %s3249_s26 }
 0x6ba   : > { %s3174_s25 = sshll.u32 %s527_s28, 4  ;;  %s5033_s25 = int_to_ptr.vmem [resolvable:$true] %s3174_s25 }
 0x6bc   : > { %1958 = vrot.lane.b32.xlu0 %v1869_v3, %s3936_s29  ;;  %3775 = vrot.lane.b32.xlu1 %v4569_v30, %s3939_s22 }
 0x6c0   : > { %1962 = vrot.lane.b32.xlu0 %v1870_v60, %s3936_s29 }
 0x6c4   : > { %2034 = vrot.lane.b32.xlu0 %v1869_v3, %s3939_s22  ;;  %v3303_v3 = vld [vmem:[%s5082_s9 + $0x58] sm:$0xff] }
 0x6c8   : > { %2038 = vrot.lane.b32.xlu0 %v1870_v60, %s3939_s22  ;;  %v3312_v60 = vld [vmem:[%s4146_s27 + $0x60] sm:$0xff] }
 0x712   : > { %v1920_v21 = vpop.permute.xlu1 %1919  ;;  %v1918_v10 = vpop.permute.xlu0 %1917 }
 0x713   : > { %2064 = vrot.lane.b32.xlu1 %v1918_v10, %s3939_s22  ;;  %v3319_v10 = vld [vmem:[%s5083_s10 + $0x78] sm:$0xff] }
 0x716   : > { %v1888_v12 = vpop.permute.xlu1 %1887  ;;  %v1926_v28 = vpop.permute.xlu0 %1925 }
 0x717   : > { %2066 = vrot.lane.b32.xlu1 %v1920_v21, %s3939_s22  ;;  %2068 = vrot.lane.b32.xlu0 %v1926_v28, %s3939_s22  ;;  %v1894_v24 = vsel %vm1893_vm11, %v3747_v25, %v1888_v12  ;;  %v1934_v0 = vsel %vm1933_vm12, %v1926_v28, %v3742_v27  ;;  %v3318_v21 = vld [vmem:[%s5083_s10 + $0x70] sm:$0xff]  ;;  %v3323_v28 = vld [vmem:[%s5084_s11 + $0x78] sm:$0xff] }
 0x71a   : > { %v1892_v13 = vpop.permute.xlu1 %1891  ;;  %v1930_v14 = vpop.permute.xlu0 %1929 }
 0x71b   : > { %2042 = vrot.lane.b32.xlu1 %v1888_v12, %s3939_s22  ;;  %2072 = vrot.lane.b32.xlu0 %v1930_v14, %s3939_s22  ;;  %v1895_v15 = vsel %vm1893_vm11, %v3748_v33, %v1892_v13  ;;  %v1935_v36 = vsel %vm1933_vm12, %v1930_v14, %v3743_v22  ;;  %v3322_v12 = vld [vmem:[%s5084_s11 + $0x70] sm:$0xff] }
 0x71e   : > { %v1899_v16 = vpop.permute.xlu1 %1898  ;;  %v1937_v19 = vpop.permute.xlu0 %1936 }
 0x71f   : > { %2046 = vrot.lane.b32.xlu1 %v1892_v13, %s3939_s22  ;;  %2076 = vrot.lane.b32.xlu0 %v1937_v19, %s3939_s22  ;;  %v1904_v37 = vsel %vm595_vm8, %v3757_v35, %v1899_v16  ;;  %v1945_v40 = vsel %vm1944_vm13, %v1937_v19, %v3752_v38 }
 0x722   : > { %v1903_v31 = vpop.permute.xlu1 %1902  ;;  %v1941_v18 = vpop.permute.xlu0 %1940 }
 0x723   : > { %2050 = vrot.lane.b32.xlu1 %v1899_v16, %s3939_s22  ;;  %2080 = vrot.lane.b32.xlu0 %v1941_v18, %s3939_s22  ;;  %v1905_v41 = vsel %vm595_vm8, %v3758_v39, %v1903_v31  ;;  %v1946_v26 = vsel %vm1944_vm13, %v1941_v18, %v3753_v42 }
 0x726   : > { %v1948_v17 = vpop.permute.xlu0 %1947  ;;  %v1909_v23 = vpop.permute.xlu1 %1908 }
 0x727   : > { %2054 = vrot.lane.b32.xlu1 %v1903_v31, %s3939_s22  ;;  %2084 = vrot.lane.b32.xlu0 %v1948_v17, %s3939_s22  ;;  %v1915_v44 = vsel %vm1914_vm14, %v3767_v43, %v1909_v23  ;;  %v1956_v47 = vsel %vm1955_vm15, %v1948_v17, %v3762_v45 }
 0x72a   : > { %v1952_v32 = vpop.permute.xlu0 %1951  ;;  %v1913_v34 = vpop.permute.xlu1 %1912 }
 0x72b   : > { %2058 = vrot.lane.b32.xlu1 %v1909_v23, %s3939_s22  ;;  %2088 = vrot.lane.b32.xlu0 %v1952_v32, %s3939_s22  ;;  %v1916_v48 = vsel %vm1914_vm14, %v3768_v46, %v1913_v34  ;;  %v1957_v52 = vsel %vm1955_vm15, %v1952_v32, %v3763_v49 }
 0x72e   : > { %v1959_v50 = vpop.permute.xlu0 %1958  ;;  %v3776_v13 = vpop.permute.xlu1 %3775 }
 0x72f   : > { %2062 = vrot.lane.b32.xlu1 %v1913_v34, %s3939_s22  ;;  %2040 = vrot.lane.b32.xlu0 %v1894_v24, %s3939_s22  ;;  %v1967_v56 = vsel %vm1966_vm0, %v1959_v50, %v3772_v53  ;;  %v3777_v16 = vunpack.i.l.bf16 %v3776_v13  ;;  %v3778_v18 = vunpack.i.h.bf16 %v3776_v13 }
 0x732   : > { %v1963_v54 = vpop.permute.xlu0 %1962 }
 0x733   : > { %2070 = vrot.lane.b32.xlu1 %v1934_v0, %s3939_s22  ;;  %2044 = vrot.lane.b32.xlu0 %v1895_v15, %s3939_s22  ;;  %v1968_v59 = vsel %vm1966_vm0, %v1963_v54, %v3773_v57 }
 0x736   : > { %v2035_v14 = vpop.permute.xlu0 %2034 }
 0x737   : > { %2074 = vrot.lane.b32.xlu1 %v1935_v36, %s3939_s22  ;;  %2048 = vrot.lane.b32.xlu0 %v1904_v37, %s3939_s22  ;;  %v2101_v17 = vsel %vm2100_vm1, %v3777_v16, %v2035_v14 }
 0x73a   : > { %v2039_v19 = vpop.permute.xlu0 %2038 }
 0x73b   : > { %2078 = vrot.lane.b32.xlu1 %v1945_v40, %s3939_s22  ;;  %2052 = vrot.lane.b32.xlu0 %v1905_v41, %s3939_s22  ;;  %v2102_v25 = vsel %vm2100_vm1, %v3778_v18, %v2039_v19 }
 0x73f   : > { %2082 = vrot.lane.b32.xlu1 %v1946_v26, %s3939_s22  ;;  %2056 = vrot.lane.b32.xlu0 %v1915_v44, %s3939_s22 }
 0x743   : > { %2086 = vrot.lane.b32.xlu1 %v1956_v47, %s3939_s22  ;;  %2060 = vrot.lane.b32.xlu0 %v1916_v48, %s3939_s22 }
 0x747   : > { %2090 = vrot.lane.b32.xlu1 %v1957_v52, %s3939_s22  ;;  %2092 = vrot.lane.b32.xlu0 %v1959_v50, %s3939_s22 }
 0x74b   : > { %2094 = vrot.lane.b32.xlu1 %v1967_v56, %s3939_s22  ;;  %2096 = vrot.lane.b32.xlu0 %v1963_v54, %s3939_s22 }
 0x74f   : > { %2098 = vrot.lane.b32.xlu1 %v1968_v59, %s3939_s22  ;;  %1984 = vperm.xlu0 %3658, %v3300_v58  }
 0x753   : > { %1989 = vperm.xlu1 %3657, %v3301_v61   ;;  %1994 = vperm.xlu0 %3658, %v3302_v1  }
 0x757   : > { %1999 = vperm.xlu1 %3657, %v3303_v3   ;;  %2254 = vperm.xlu0 %3658, %v3312_v60   ;;  %v3827_v60 = vld [vmem:[%s5079_s6] ss:$12 sps:$4 sm:$0xff]  }
 0x75b   : > { %2259 = vperm.xlu1 %3657, %v3313_v2   ;;  %2264 = vperm.xlu0 %3658, %v3314_v4   ;;  %v3830_v2 = vld [vmem:[%s5079_s6 + $0x1c] ss:$12 sps:$4 sm:$0xff]  }
 0x75f   : > { %2269 = vperm.xlu1 %3657, %v3315_v11   ;;  %2319 = vperm.xlu0 %3658, %v3316_v6  }
 0x763   : > { %2324 = vperm.xlu1 %3657, %v3317_v7   ;;  %2348 = vperm.xlu0 %3658, %v3320_v8  }
 0x767   : > { %2353 = vperm.xlu1 %3657, %v3321_v9   ;;  %2329 = vperm.xlu0 %3658, %v3318_v21   ;;  %v3833_v9 = vld [vmem:[%s5079_s6 + $0x18] ss:$12 sps:$4 sm:$0xff]   ;;  %v3834_v21 = vld [vmem:[%s5079_s6 + $0x20] ss:$12 sps:$4 sm:$0xff]  }
 0x76b   : > { %2334 = vperm.xlu1 %3657, %v3319_v10   ;;  %2358 = vperm.xlu0 %3658, %v3322_v12  }
 0x76f   : > { %2363 = vperm.xlu1 %3657, %v3323_v28   ;;  %3785 = vrot.lane.b32.xlu0 %v4569_v30, %s3938_s0 }
 0x773   : > { %3795 = vrot.lane.b32.xlu0 %v4569_v30, %s3936_s29  ;;  %3780 = vrot.lane.b32.xlu1 %v4569_v30, %s3940_s18 }
 0x777   : > { %3790 = vrot.lane.b32.xlu1 %v4569_v30, %s3941_s1  ;;  %2407 = vrot.lane.b32.xlu0 %v4565_v29, %s3942_s3 }
 0x77b   : > { %3800 = vrot.lane.b32.xlu1 %v4569_v30, %s3939_s22 }
 0x785   : > { %v2065_v31 = vpop.permute.xlu1 %2064 }
 0x786   : > { %3436 = vmatprep.subr.bf16.mxu1 %v2065_v31 }
 0x787   : > { %3437 = vmatpush3.bf16.msra.mxu1 %v2101_v17 }
 0x789   : > { %v2067_v23 = vpop.permute.xlu1 %2066  ;;  %v2069_v32 = vpop.permute.xlu0 %2068 }
 0x78a   : > { %3438 = vmatprep.subr.bf16.mxu1 %v2067_v23 }
 0x78b   : > { %3439 = vmatpush3.bf16.msra.mxu1 %v2102_v25 }
 0x78d   : > { %v2043_v34 = vpop.permute.xlu1 %2042  ;;  %v2073_v24 = vpop.permute.xlu0 %2072 }
 0x791   : > { %v2047_v27 = vpop.permute.xlu1 %2046  ;;  %v2077_v33 = vpop.permute.xlu0 %2076 }
 0x795   : > { %v2051_v0 = vpop.permute.xlu1 %2050  ;;  %v2081_v15 = vpop.permute.xlu0 %2080 }
 0x799   : > { %v2055_v22 = vpop.permute.xlu1 %2054  ;;  %v2085_v35 = vpop.permute.xlu0 %2084 }
 0x79d   : > { %v2059_v36 = vpop.permute.xlu1 %2058  ;;  %v2089_v37 = vpop.permute.xlu0 %2088 }
 0x7a1   : > { %v2063_v38 = vpop.permute.xlu1 %2062  ;;  %v2041_v39 = vpop.permute.xlu0 %2040 }
 0x7a2   : > { %v2103_v43 = vsel %vm2100_vm1, %v2041_v39, %v2043_v34 }
 0x7a5   : > { %v2071_v40 = vpop.permute.xlu1 %2070  ;;  %v2045_v41 = vpop.permute.xlu0 %2044 }
 0x7a6   : > { %v2109_v42 = vsel %vm2100_vm1, %v2069_v32, %v2071_v40  ;;  %v2104_v45 = vsel %vm2100_vm1, %v2045_v41, %v2047_v27 }
 0x7a7   : > { %3440 = vmatprep.subr.bf16.mxu1 %v2109_v42 }
 0x7a8   : > { %3441 = vmatpush3.bf16.msra.mxu1 %v2103_v43 }
 0x7a9   : > { %v2075_v20 = vpop.permute.xlu1 %2074  ;;  %v2049_v26 = vpop.permute.xlu0 %2048 }
 0x7aa   : > { %v2110_v44 = vsel %vm2100_vm1, %v2073_v24, %v2075_v20  ;;  %v2105_v49 = vsel %vm2100_vm1, %v2049_v26, %v2051_v0 }
 0x7ab   : > { %3442 = vmatprep.subr.bf16.mxu1 %v2110_v44 }
 0x7ac   : > { %3443 = vmatpush3.bf16.msra.mxu1 %v2104_v45 }
 0x7ad   : > { %v2079_v46 = vpop.permute.xlu1 %2078  ;;  %v2053_v47 = vpop.permute.xlu0 %2052 }
 0x7ae   : > { %v2111_v48 = vsel %vm2100_vm1, %v2077_v33, %v2079_v46  ;;  %v2106_v53 = vsel %vm2100_vm1, %v2053_v47, %v2055_v22 }
 0x7af   : > { %3444 = vmatprep.subr.bf16.mxu1 %v2111_v48 }
 0x7b0   : > { %3445 = vmatpush3.bf16.msra.mxu1 %v2105_v49 }
 0x7b1   : > { %v2083_v50 = vpop.permute.xlu1 %2082  ;;  %v2057_v51 = vpop.permute.xlu0 %2056 }
 0x7b2   : > { %v2112_v52 = vsel %vm2100_vm1, %v2081_v15, %v2083_v50  ;;  %v2107_v58 = vsel %vm2100_vm1, %v2057_v51, %v2059_v36 }
 0x7b3   : > { %3446 = vmatprep.subr.bf16.mxu1 %v2112_v52 }
 0x7b4   : > { %3447 = vmatpush3.bf16.msra.mxu1 %v2106_v53 }
 0x7b5   : > { %v2087_v54 = vpop.permute.xlu1 %2086  ;;  %v2061_v56 = vpop.permute.xlu0 %2060 }
 0x7b6   : > { %v2113_v57 = vsel %vm2100_vm1, %v2085_v35, %v2087_v54  ;;  %v2108_v1 = vsel %vm2100_vm1, %v2061_v56, %v2063_v38 }
 0x7b7   : > { %3448 = vmatprep.subr.bf16.mxu1 %v2113_v57 }
 0x7b8   : > { %3449 = vmatpush3.bf16.msra.mxu1 %v2107_v58 }
 0x7b9   : > { %v2091_v59 = vpop.permute.xlu1 %2090  ;;  %v2093_v3 = vpop.permute.xlu0 %2092 }
 0x7ba   : > { %v2114_v61 = vsel %vm2100_vm1, %v2089_v37, %v2091_v59 }
 0x7bb   : > { %3450 = vmatprep.subr.bf16.mxu1 %v2114_v61 }
 0x7bc   : > { %3451 = vmatpush3.bf16.msra.mxu1 %v2108_v1 }
 0x7bd   : > { %v2095_v4 = vpop.permute.xlu1 %2094  ;;  %v2097_v6 = vpop.permute.xlu0 %2096 }
 0x7be   : > { %v2115_v11 = vsel %vm2100_vm1, %v2093_v3, %v2095_v4 }
 0x7bf   : > { %2174 = vmatmul.mubr.bf16.vlgmr.msra.gmra.mrb[12].mxu1 %v3827_v60  ;;  %3545 = vmatprep.subr.bf16.mxu0 %v2115_v11 }
 0x7c0   : > { %3546 = vmatpush3.bf16.msra.mxu0 %v2115_v11  ;;  %2181 = vmatprep.mubr.bf16.mxu1 %v3830_v2 }
 0x7c1   : > { %v2099_v7 = vpop.permute.xlu1 %2098 }
 0x7c2   : > { %v2116_v8 = vsel %vm2100_vm1, %v2097_v6, %v2099_v7 }
 0x7c3   : > { %3547 = vmatprep.subr.bf16.mxu0 %v2116_v8 }
 0x7c4   : > { %3548 = vmatpush3.bf16.msra.mxu0 %v2116_v8 }
 0x7c7   : > { %2182 = vmatmul.mubr.bf16.gmra.mrb[16].mxu1 %v3833_v9  ;;  %3550 = vmatmul.mubr.msk.bf16.vlgmr.msra.gmra.mrb[16].mxu0 %vm1139_vm10, %v3834_v21 }
 0x7ce   : > { %v1985_v10 = vpop.permute.xlu0 %1984 }
 0x7d2   : > { %v1990_v28 = vpop.permute.xlu1 %1989  ;;  %v1995_v18 = vpop.permute.xlu0 %1994 }
 0x7d6   : > { %v2000_v17 = vpop.permute.xlu1 %1999  ;;  %v2255_v41 = vpop.permute.xlu0 %2254 }
 0x7da   : > { %v2260_v44 = vpop.permute.xlu1 %2259  ;;  %v2265_v52 = vpop.permute.xlu0 %2264 }
 0x7de   : > { %v2270_v58 = vpop.permute.xlu1 %2269 }
 0x892   : > { %v3452_v12 = vpop.f32.mrb[12].mxu1 }
 0x893   : > { %v3453_v13 = vpop.f32.mrb[13].mxu1 }
 0x894   : > { %v3454_v14 = vadd.f32 %v3453_v13, %v3452_v12  ;;  %v3455_v16 = vpop.f32.mrb[14].mxu1 }
 0x895   : > { %v3456_v19 = vpop.f32.mrb[15].mxu1 }
 0x896   : > { %v3457_v31 = vadd.f32 %v3456_v19, %v3455_v16  ;;  %v2176_v25 = vadd.f32 %v3454_v14, %v1985_v10 }
 0x898   : > { %v2179_v22 = vadd.f32 %v3457_v31, %v1990_v28  ;;  %v2320_v31 = vpop.permute.xlu0 %2319 }
 0x89a   : > { %v3458_v23 = vpop.f32.mrb[16].mxu1  ;;  %v3551_v32 = vpop.f32.mrb[16].mxu0 }
 0x89b   : > { %v3459_v34 = vpop.f32.mrb[17].mxu1  ;;  %v2224_v24 = vpop.f32.mrb[17].mxu0 }
 0x89c   : > { %v3460_v27 = vadd.f32 %v3459_v34, %v3458_v23  ;;  %v2225_v33 = vadd.f32 %v2224_v24, %v2176_v25  ;;  %v3461_v0 = vpop.f32.mrb[18].mxu1  ;;  %v3552_v15 = vpop.f32.mrb[18].mxu0 }
 0x89d   : > { %v3462_v35 = vpop.f32.mrb[19].mxu1  ;;  %v2227_v36 = vpop.f32.mrb[19].mxu0 }
 0x89e   : > { %v2184_v37 = vadd.f32 %v3460_v27, %v1995_v18  ;;  %v2239_v38 = vmax.f32 %v2225_v33, 0.0  ;;  %v3463_v39 = vadd.f32 %v3462_v35, %v3461_v0  ;;  %v2228_v40 = vadd.f32 %v2227_v36, %v2179_v22  ;;  %v2325_v18 = vpop.permute.xlu1 %2324 }
 0x8a0   : > { %v2233_v42 = vadd.f32 %v3551_v32, %v2184_v37  ;;  %v4760_v43 = vadd.f32 %v2239_v38, %v4586_v55  ;;  %v2187_v20 = vadd.f32 %v3463_v39, %v2000_v17  ;;  %v2240_v26 = vmax.f32 %v2228_v40, 0.0  ;;  %v2349_v32 = vpop.permute.xlu0 %2348 }
 0x8a2   : > { %v2241_v45 = vmax.f32 %v2233_v42, 0.0  ;;  %v2272_v46 = vadd.f32 %v2255_v41, %v4760_v43  ;;  %v2236_v47 = vadd.f32 %v3552_v15, %v2187_v20  ;;  %v4764_v48 = vadd.f32 %v2240_v26, %v4590_v62  ;;  %v2354_v25 = vpop.permute.xlu1 %2353 }
 0x8a4   : > { %v4767_v49 = vadd.f32 %v2241_v45, %v4593_v63  ;;  %v2242_v50 = vmax.f32 %v2236_v47, 0.0  ;;  %v2273_v51 = vadd.f32 %v2260_v44, %v4764_v48  ;;  %v2286_v53 = vmul.f32 %v2272_v46, %v2272_v46  ;;  %v2330_v34 = vpop.permute.xlu0 %2329 }
 0x8a6   : > { %v2274_v55 = vadd.f32 %v2265_v52, %v4767_v49  ;;  %v4772_v54 = vadd.f32 %v2242_v50, %v4598_v5  ;;  %v2276_v56 = vadd.f32 %v2273_v51, %v2272_v46  ;;  %v2287_v57 = vmul.f32 %v2273_v51, %v2273_v51  ;;  %v2335_v24 = vpop.permute.xlu1 %2334 }
 0x8a8   : > { %v2288_v59 = vmul.f32 %v2274_v55, %v2274_v55  ;;  %v2275_v62 = vadd.f32 %v2270_v58, %v4772_v54  ;;  %v2277_v61 = vadd.f32 %v2276_v56, %v2274_v55  ;;  %v2290_v1 = vadd.f32 %v2287_v57, %v2286_v53  ;;  %v2359_v20 = vpop.permute.xlu0 %2358 }
 0x8aa   : > { %v2289_v63 = vmul.f32 %v2275_v62, %v2275_v62  ;;  %v2278_v3 = vadd.f32 %v2277_v61, %v2275_v62  ;;  %v2291_v60 = vadd.f32 %v2290_v1, %v2288_v59  ;;  %v2364_v26 = vpop.permute.xlu1 %2363 }
 0x8ac   : > { %v2279_v2 = vrot.slane %v2278_v3, 4  ;;  %v2292_v4 = vadd.f32 %v2291_v60, %v2289_v63  ;;  %v3786_v53 = vpop.permute.xlu0 %3785 }
 0x8ae   : > { %v2280_v11 = vadd.f32 %v2279_v2, %v2278_v3  ;;  %v2293_v6 = vrot.slane %v2292_v4, 4 }
 0x8b0   : > { %v2281_v7 = vrot.slane %v2280_v11, 2  ;;  %v2294_v8 = vadd.f32 %v2293_v6, %v2292_v4  ;;  %v3796_v56 = vpop.permute.xlu0 %3795 }
 0x8b2   : > { %v2282_v9 = vadd.f32 %v2281_v7, %v2280_v11  ;;  %v2295_v5 = vrot.slane %v2294_v8, 2  ;;  %v3787_v7 = vunpack.i.l.bf16 %v3786_v53 }
 0x8b4   : > { %v2283_v21 = vrot.slane %v2282_v9, 1  ;;  %v2296_v10 = vadd.f32 %v2295_v5, %v2294_v8  ;;  %v2408_v58 = vpop.permute.xlu0 %2407 }
 0x8b6   : > { %v2284_v12 = vadd.f32 %v2283_v21, %v2282_v9  ;;  %v2297_v28 = vrot.slane %v2296_v10, 1  ;;  %v3788_v21 = vunpack.i.h.bf16 %v3786_v53  ;;  %v3347_v53 = vld [vmem:[%s5084_s11 + $0x98] sm:$0xff] }
 0x8b8   : > { %v2285_v13 = vmul.f32 0.03125, %v2284_v12  ;;  %v2298_v14 = vadd.f32 %v2297_v28, %v2296_v10 }
 0x8ba   : > { %v2299_v16 = vmul.f32 0.03125, %v2298_v14  ;;  %v2304_v19 = vmul.f32 %v2285_v13, %v2285_v13  ;;  %v2300_v27 = vsub.f32 %v2272_v46, %v2285_v13  ;;  %v2301_v33 = vsub.f32 %v2273_v51, %v2285_v13  ;;  %v3781_v51 = vpop.permute.xlu1 %3780 }
 0x8bb   : > { %v2302_v0 = vsub.f32 %v2274_v55, %v2285_v13  ;;  %v2303_v15 = vsub.f32 %v2275_v62, %v2285_v13  ;;  %v3782_v5 = vunpack.i.l.bf16 %v3781_v51  ;;  %v3783_v28 = vunpack.i.h.bf16 %v3781_v51  ;;  %v3346_v51 = vld [vmem:[%s5084_s11 + $0x90] sm:$0xff] }
 0x8bc   : > { %v2305_v17 = vsub.f32 %v2299_v16, %v2304_v19  ;;  %v3797_v13 = vunpack.i.l.bf16 %v3796_v56 }
 0x8be   : > { %v2306_v23 = vadd.f32 1e-05, %v2305_v17  ;;  %v3791_v55 = vpop.permute.xlu1 %3790 }
 0x8bf   : > { %v3792_v19 = vunpack.i.l.bf16 %v3791_v55 }
 0x8c0   : > { %3853 = vrsqrt.f32 %v2306_v23  ;;  %v3793_v23 = vunpack.i.h.bf16 %v3791_v55 }
 0x8c2   : > { %v4811_v57 = vpop.permute.xlu1 %3800 }
 0x8ca   : > { %v3854_v22 = vpop.eup %3853 }
 0x8cb   : > { %v2308_v35 = vmul.f32 %v3854_v22, %v2300_v27  ;;  %v2309_v36 = vmul.f32 %v3854_v22, %v2301_v33  ;;  %v2310_v37 = vmul.f32 %v3854_v22, %v2302_v0  ;;  %v2311_v38 = vmul.f32 %v3854_v22, %v2303_v15  ;;  %v3840_v22 = vld [vmem:[%s5080_s7 + $0x8] ss:$12 sps:$4 sm:$0xff]  }
 0x8cc   : > { %v3803_v15 = vunpack.i.h.bf16 %v4811_v57  ;;  %3557 = vmatprep.mubr.msk.bf16.mxu1 %vm1139_vm10, %v3840_v22 }
 0x8cd   : > { %v2337_v39 = vmul.f32 %v2320_v31, %v2308_v35  ;;  %v2338_v40 = vmul.f32 %v2325_v18, %v2309_v36  ;;  %v2339_v41 = vmul.f32 %v2330_v34, %v2310_v37  ;;  %v2340_v42 = vmul.f32 %v2335_v24, %v2311_v38  ;;  %v4862_v36 = vld [vmem:[#allocation2] sm:$0xff]  ;;  %v3325_v38 = vld [vmem:[%s5082_s9 + $0x68] sm:$0xff] }
 0x8ce   : > { %v3798_v31 = vunpack.i.h.bf16 %v3796_v56  ;;  %v3802_v24 = vunpack.i.l.bf16 %v4811_v57  ;;  %v3324_v37 = vld [vmem:[%s5082_s9 + $0x60] sm:$0xff] }
 0x8cf   : > { %v2366_v44 = vadd.f32 %v2349_v32, %v2337_v39  ;;  %v2367_v45 = vadd.f32 %v2354_v25, %v2338_v40  ;;  %v2368_v47 = vadd.f32 %v2359_v20, %v2339_v41  ;;  %v2369_v50 = vadd.f32 %v2364_v26, %v2340_v42  ;;  %v3837_v32 = vld [vmem:[%s5080_s7 + $0x4] ss:$12 sps:$4 sm:$0xff]   ;;  %v3327_v40 = vld [vmem:[%s5082_s9 + $0x78] sm:$0xff]  ;;  %v3337_v42 = vld [vmem:[%s4146_s27 + $0x88] sm:$0xff] }
 0x8d0   : > { %2658 = vmatprep.mubr.bf16.mxu0 %v3837_v32  ;;  %v3326_v39 = vld [vmem:[%s5082_s9 + $0x70] sm:$0xff]  ;;  %v3336_v41 = vld [vmem:[%s4146_s27 + $0x80] sm:$0xff]  ;;  %v3339_v26 = vld [vmem:[%s4146_s27 + $0x98] sm:$0xff] }
 0x8d1   : > { %v4775_v52 = vpack.c.bf16 %v2367_v45, %v2366_v44  ;;  %v4777_v46 = vpack.c.bf16 %v2369_v50, %v2368_v47  ;;  %v3338_v20 = vld [vmem:[%s4146_s27 + $0x90] sm:$0xff]  ;;  %v3340_v44 = vld [vmem:[%s5083_s10 + $0x80] sm:$0xff]  ;;  %v3341_v45 = vld [vmem:[%s5083_s10 + $0x88] sm:$0xff]  ;;  %s3946_s27 = smov [#allocation3]  }
 0x8d2   : > { %v3344_v47 = vld [vmem:[%s5084_s11 + $0x80] sm:$0xff]  ;;  %v3345_v50 = vld [vmem:[%s5084_s11 + $0x88] sm:$0xff] }
 0x8d3   : > { %2418 = vrot.lane.b32.xlu0 %v4775_v52, %s3943_s21  ;;  %2420 = vrot.lane.b32.xlu1 %v4777_v46, %s3943_s21 }
 0x8d7   : > { %2426 = vrot.lane.b32.xlu0 %v4775_v52, %s3940_s18  ;;  %2388 = vrot.lane.b32.xlu1 %v4775_v52, %s3938_s0 }
 0x8db   : > { %2430 = vrot.lane.b32.xlu0 %v4777_v46, %s3940_s18  ;;  %2392 = vrot.lane.b32.xlu1 %v4777_v46, %s3938_s0  ;;  %s3859_s0 = scalar_lea.vmem %s5033_s25, 64 }
 0x8dc   : > { %p3860_p11 = scmp.ne.s32.totalorder %s5033_s25, %s3859_s0 }
 0x8de   : > { %p3861_p12 = pnand %p3860_p11, %p4070_p5 }
 0x8df   : > { %2437 = vrot.lane.b32.xlu0 %v4775_v52, %s3941_s1  ;;  %2399 = vrot.lane.b32.xlu1 %v4775_v52, %s3936_s29 }
 0x8e0   : > { %p3862_p13 = pneg %p3861_p12 }
 0x8e3   : > { %2441 = vrot.lane.b32.xlu0 %v4777_v46, %s3941_s1  ;;  %2403 = vrot.lane.b32.xlu1 %v4777_v46, %s3936_s29  ;;  %s5153_s1 = sld [smem:[#allocation20_spill]]  ;;  %s3161_s29 = scalar_lea.sflag [#allocation4], %s525_s20 }
 0x8e7   : > { %2448 = vrot.lane.b32.xlu0 %v4775_v52, %s3939_s22  ;;  %2409 = vrot.lane.b32.xlu1 %v4775_v52, %s3942_s3 }
 0x8eb   : > { %2452 = vrot.lane.b32.xlu0 %v4777_v46, %s3939_s22  ;;  %2411 = vrot.lane.b32.xlu1 %v4565_v29, %s3942_s3  ;;  %s3863_s22 = sshll.u32 %s3946_s27, 4  ;;  %s3864_s22 = int_to_ptr.vmem [resolvable:$false] %s3863_s22 }
 0x8ec   : > { %s3865_s16 = scalar_lea.vmem %s3864_s22, 128  ;;  %p3866_p0 = scmp.lt.s32.totalorder %s5033_s25, %s3864_s22 }
 0x8ed   : > { %p3867_p1 = scmp.lt.s32.totalorder %s3865_s16, %s3859_s0 }
 0x8ef   : > { %2413 = vrot.lane.b32.xlu0 %v4777_v46, %s3942_s3  ;;  %3805 = vrot.lane.b32.xlu1 %v4569_v30, %s3943_s21  ;;  %s5031_s3 = scalar_lea.hbm %s5153_s1, %s3362_s19  ;;  %p3868_p2 = por %p3867_p1, %p3866_p0 }
 0x8f1   : > { %p3869_p3 = pnand %p3868_p2, %p3862_p13 }
 0x945   : > { %v4813_v59 = vpop.permute.xlu1 %2420  ;;  %v4815_v62 = vpop.permute.xlu0 %2418 }
 0x946   : > { %2551 = vrot.lane.b32.xlu1 %v4813_v59, %s3943_s21  ;;  %2549 = vrot.lane.b32.xlu0 %v4815_v62, %s3943_s21 }
 0x949   : > { %v2389_v29 = vpop.permute.xlu1 %2388  ;;  %v2427_v61 = vpop.permute.xlu0 %2426 }
 0x94a   : > { %2527 = vrot.lane.b32.xlu1 %v2389_v29, %s3943_s21  ;;  %2553 = vrot.lane.b32.xlu0 %v2427_v61, %s3943_s21  ;;  %v2395_v8 = vsel %vm2394_vm2, %v3787_v7, %v2389_v29  ;;  %v2435_v10 = vsel %vm2434_vm3, %v2427_v61, %v3782_v5 }
 0x94d   : > { %v2393_v30 = vpop.permute.xlu1 %2392  ;;  %v2431_v1 = vpop.permute.xlu0 %2430 }
 0x94e   : > { %2531 = vrot.lane.b32.xlu1 %v2393_v30, %s3943_s21  ;;  %2557 = vrot.lane.b32.xlu0 %v2431_v1, %s3943_s21  ;;  %v2396_v12 = vsel %vm2394_vm2, %v3788_v21, %v2393_v30  ;;  %v2436_v14 = vsel %vm2434_vm3, %v2431_v1, %v3783_v28 }
 0x951   : > { %v2400_v63 = vpop.permute.xlu1 %2399  ;;  %v2438_v3 = vpop.permute.xlu0 %2437 }
 0x952   : > { %2535 = vrot.lane.b32.xlu1 %v2400_v63, %s3943_s21  ;;  %2561 = vrot.lane.b32.xlu0 %v2438_v3, %s3943_s21  ;;  %v2405_v16 = vsel %vm1966_vm0, %v3797_v13, %v2400_v63  ;;  %v2446_v18 = vsel %vm1139_vm10, %v2438_v3, %v3792_v19 }
 0x955   : > { %v2404_v60 = vpop.permute.xlu1 %2403  ;;  %v2442_v2 = vpop.permute.xlu0 %2441 }
 0x956   : > { %2539 = vrot.lane.b32.xlu1 %v2404_v60, %s3943_s21  ;;  %2565 = vrot.lane.b32.xlu0 %v2442_v2, %s3943_s21  ;;  %v2406_v17 = vsel %vm1966_vm0, %v3798_v31, %v2404_v60  ;;  %v2447_v25 = vsel %vm1139_vm10, %v2442_v2, %v3793_v23 }
 0x959   : > { %v2410_v4 = vpop.permute.xlu1 %2409  ;;  %v2449_v11 = vpop.permute.xlu0 %2448 }
 0x95a   : > { %2543 = vrot.lane.b32.xlu1 %v2410_v4, %s3943_s21  ;;  %2569 = vrot.lane.b32.xlu0 %v2449_v11, %s3943_s21  ;;  %v2416_v34 = vsel %vm2415_vm4, %v2408_v58, %v2410_v4  ;;  %v2456_v33 = vsel %vm2100_vm1, %v2449_v11, %v3802_v24 }
 0x95d   : > { %v2453_v6 = vpop.permute.xlu0 %2452  ;;  %v2412_v27 = vpop.permute.xlu1 %2411 }
 0x95e   : > { %2573 = vrot.lane.b32.xlu0 %v2453_v6, %s3943_s21  ;;  %v2457_v35 = vsel %vm2100_vm1, %v2453_v6, %v3803_v15 }
 0x961   : > { %v2414_v9 = vpop.permute.xlu0 %2413  ;;  %v3806_v55 = vpop.permute.xlu1 %3805 }
 0x962   : > { %2547 = vrot.lane.b32.xlu1 %v2414_v9, %s3943_s21  ;;  %2525 = vrot.lane.b32.xlu0 %v2395_v8, %s3943_s21  ;;  %v2417_v0 = vsel %vm2415_vm4, %v2412_v27, %v2414_v9  ;;  %v3807_v56 = vunpack.i.l.bf16 %v3806_v55  ;;  %v3808_v29 = vunpack.i.h.bf16 %v3806_v55 }
 0x964   : > { %v2586_v61 = vsel %vm2585_vm5, %v3807_v56, %v4815_v62  ;;  %v2587_v63 = vsel %vm2585_vm5, %v3808_v29, %v4813_v59 }
 0x966   : > { %2555 = vrot.lane.b32.xlu1 %v2435_v10, %s3943_s21  ;;  %2529 = vrot.lane.b32.xlu0 %v2396_v12, %s3943_s21 }
 0x96a   : > { %2559 = vrot.lane.b32.xlu1 %v2436_v14, %s3943_s21  ;;  %2533 = vrot.lane.b32.xlu0 %v2405_v16, %s3943_s21 }
 0x96e   : > { %2563 = vrot.lane.b32.xlu1 %v2446_v18, %s3943_s21  ;;  %2537 = vrot.lane.b32.xlu0 %v2406_v17, %s3943_s21 }
 0x972   : > { %2567 = vrot.lane.b32.xlu1 %v2447_v25, %s3943_s21  ;;  %2541 = vrot.lane.b32.xlu0 %v2416_v34, %s3943_s21 }
 0x976   : > { %2571 = vrot.lane.b32.xlu1 %v2456_v33, %s3943_s21  ;;  %2545 = vrot.lane.b32.xlu0 %v2417_v0, %s3943_s21 }
 0x97a   : > { %2575 = vrot.lane.b32.xlu1 %v2457_v35, %s3943_s21  ;;  %2577 = vrot.lane.b32.xlu0 %v4775_v52, %s3943_s21  ;;  %v3342_v52 = vld [vmem:[%s5083_s10 + $0x90] sm:$0xff] }
 0x97e   : > { %2579 = vrot.lane.b32.xlu1 %v4862_v36, %s3943_s21  ;;  %2581 = vrot.lane.b32.xlu0 %v4777_v46, %s3943_s21  ;;  %v3343_v46 = vld [vmem:[%s5083_s10 + $0x98] sm:$0xff] }
 0x982   : > { %2583 = vrot.lane.b32.xlu1 %v4862_v36, %s3943_s21  ;;  %2473 = vperm.xlu0 %3658, %v3324_v37  }
 0x986   : > { %2478 = vperm.xlu1 %3657, %v3325_v38   ;;  %2483 = vperm.xlu0 %3658, %v3326_v39   ;;  %v3835_v38 = vld [vmem:[%s5080_s7] ss:$12 sps:$4 sm:$0xff]   ;;  %v3838_v39 = vld [vmem:[%s5080_s7 + $0x1c] ss:$12 sps:$4 sm:$0xff]  }
 0x98a   : > { %2488 = vperm.xlu1 %3657, %v3327_v40   ;;  %2739 = vperm.xlu0 %3658, %v3336_v41  }
 0x98e   : > { %2744 = vperm.xlu1 %3657, %v3337_v42   ;;  %2749 = vperm.xlu0 %3658, %v3338_v20  }
 0x992   : > { %2754 = vperm.xlu1 %3657, %v3339_v26   ;;  %2804 = vperm.xlu0 %3658, %v3340_v44   ;;  %v3841_v44 = vld [vmem:[%s5080_s7 + $0x18] ss:$12 sps:$4 sm:$0xff]  }
 0x996   : > { %2809 = vperm.xlu1 %3657, %v3341_v45   ;;  %2833 = vperm.xlu0 %3658, %v3344_v47   ;;  %v3842_v45 = vld [vmem:[%s5080_s7 + $0x20] ss:$12 sps:$4 sm:$0xff]  }
 0x99a   : > { %2838 = vperm.xlu1 %3657, %v3345_v50   ;;  %2814 = vperm.xlu0 %3658, %v3342_v52  }
 0x99e   : > { %2819 = vperm.xlu1 %3657, %v3343_v46   ;;  %2843 = vperm.xlu0 %3658, %v3346_v51  }
 0x9a2   : > { %2848 = vperm.xlu1 %3657, %v3347_v53  }
 0x9b8   : > { %v2552_v57 = vpop.permute.xlu1 %2551  ;;  %v2550_v58 = vpop.permute.xlu0 %2549 }
 0x9b9   : > { %3468 = vmatprep.subr.bf16.mxu0 %v2550_v58 }
 0x9ba   : > { %3469 = vmatpush3.bf16.msra.mxu0 %v2586_v61 }
 0x9bb   : > { %3470 = vmatprep.subr.bf16.mxu0 %v2552_v57 }
 0x9bc   : > { %v2528_v30 = vpop.permute.xlu1 %2527  ;;  %v2554_v1 = vpop.permute.xlu0 %2553 }
 0x9be   : > { %3471 = vmatpush3.bf16.msra.mxu0 %v2587_v63 }
 0x9c0   : > { %v2532_v3 = vpop.permute.xlu1 %2531  ;;  %v2558_v60 = vpop.permute.xlu0 %2557 }
 0x9c4   : > { %v2536_v2 = vpop.permute.xlu1 %2535  ;;  %v2562_v4 = vpop.permute.xlu0 %2561 }
 0x9c8   : > { %v2566_v11 = vpop.permute.xlu0 %2565  ;;  %v2540_v6 = vpop.permute.xlu1 %2539 }
 0x9cc   : > { %v2570_v7 = vpop.permute.xlu0 %2569  ;;  %v2544_v8 = vpop.permute.xlu1 %2543 }
 0x9d0   : > { %v2574_v9 = vpop.permute.xlu0 %2573 }
 0x9d4   : > { %v2548_v5 = vpop.permute.xlu1 %2547  ;;  %v2526_v21 = vpop.permute.xlu0 %2525 }
 0x9d5   : > { %v2588_v28 = vsel %vm2585_vm5, %v2526_v21, %v2528_v30 }
 0x9d8   : > { %v2556_v62 = vpop.permute.xlu1 %2555  ;;  %v2530_v10 = vpop.permute.xlu0 %2529 }
 0x9d9   : > { %v2594_v12 = vsel %vm2585_vm5, %v2554_v1, %v2556_v62  ;;  %v2589_v16 = vsel %vm2585_vm5, %v2530_v10, %v2532_v3 }
 0x9da   : > { %3472 = vmatprep.subr.bf16.mxu0 %v2594_v12 }
 0x9db   : > { %3473 = vmatpush3.bf16.msra.mxu0 %v2588_v28 }
 0x9dc   : > { %v2560_v59 = vpop.permute.xlu1 %2559  ;;  %v2534_v13 = vpop.permute.xlu0 %2533 }
 0x9dd   : > { %v2595_v14 = vsel %vm2585_vm5, %v2558_v60, %v2560_v59  ;;  %v2590_v17 = vsel %vm2585_vm5, %v2534_v13, %v2536_v2 }
 0x9de   : > { %3474 = vmatprep.subr.bf16.mxu0 %v2595_v14 }
 0x9df   : > { %3475 = vmatpush3.bf16.msra.mxu0 %v2589_v16 }
 0x9e0   : > { %v2564_v19 = vpop.permute.xlu1 %2563  ;;  %v2538_v31 = vpop.permute.xlu0 %2537 }
 0x9e1   : > { %v2596_v18 = vsel %vm2585_vm5, %v2562_v4, %v2564_v19  ;;  %v2591_v34 = vsel %vm2585_vm5, %v2538_v31, %v2540_v6 }
 0x9e2   : > { %3476 = vmatprep.subr.bf16.mxu0 %v2596_v18 }
 0x9e3   : > { %3477 = vmatpush3.bf16.msra.mxu0 %v2590_v17 }
 0x9e4   : > { %v2568_v23 = vpop.permute.xlu1 %2567  ;;  %v2542_v32 = vpop.permute.xlu0 %2541 }
 0x9e5   : > { %v2597_v25 = vsel %vm2585_vm5, %v2566_v11, %v2568_v23  ;;  %v2592_v0 = vsel %vm2585_vm5, %v2542_v32, %v2544_v8 }
 0x9e6   : > { %3478 = vmatprep.subr.bf16.mxu0 %v2597_v25 }
 0x9e7   : > { %3479 = vmatpush3.bf16.msra.mxu0 %v2591_v34 }
 0x9e8   : > { %v2572_v24 = vpop.permute.xlu1 %2571  ;;  %v2546_v27 = vpop.permute.xlu0 %2545 }
 0x9e9   : > { %v2598_v33 = vsel %vm2585_vm5, %v2570_v7, %v2572_v24  ;;  %v2593_v35 = vsel %vm2585_vm5, %v2546_v27, %v2548_v5 }
 0x9ea   : > { %3480 = vmatprep.subr.bf16.mxu0 %v2598_v33 }
 0x9eb   : > { %3481 = vmatpush3.bf16.msra.mxu0 %v2592_v0 }
 0x9ec   : > { %v2576_v15 = vpop.permute.xlu1 %2575  ;;  %v2578_v37 = vpop.permute.xlu0 %2577 }
 0x9ed   : > { %v2599_v22 = vsel %vm2585_vm5, %v2574_v9, %v2576_v15 }
 0x9ee   : > { %3482 = vmatprep.subr.bf16.mxu0 %v2599_v22 }
 0x9ef   : > { %3483 = vmatpush3.bf16.msra.mxu0 %v2593_v35 }
 0x9f0   : > { %v2580_v40 = vpop.permute.xlu1 %2579  ;;  %v2582_v42 = vpop.permute.xlu0 %2581 }
 0x9f1   : > { %v2600_v41 = vsel %vm2585_vm5, %v2578_v37, %v2580_v40 }
 0x9f2   : > { %2659 = vmatmul.mubr.bf16.vlgmr.msra.gmra.mrb[20].mxu0 %v3835_v38  ;;  %3553 = vmatprep.subr.bf16.mxu1 %v2600_v41 }
 0x9f3   : > { %3554 = vmatpush3.bf16.msra.mxu1 %v2600_v41  ;;  %2666 = vmatprep.mubr.bf16.mxu0 %v3838_v39 }
 0x9f4   : > { %v2584_v20 = vpop.permute.xlu1 %2583 }
 0x9f5   : > { %v2601_v26 = vsel %vm2585_vm5, %v2582_v42, %v2584_v20 }
 0x9f6   : > { %3555 = vmatprep.subr.bf16.mxu1 %v2601_v26 }
 0x9f7   : > { %3556 = vmatpush3.bf16.msra.mxu1 %v2601_v26 }
 0x9fa   : > { %2667 = vmatmul.mubr.bf16.gmra.mrb[24].mxu0 %v3841_v44  ;;  %3558 = vmatmul.mubr.msk.bf16.vlgmr.msra.gmra.mrb[20].mxu1 %vm1139_vm10, %v3842_v45 }
 0xa01   : > { %v2474_v47 = vpop.permute.xlu0 %2473 }
 0xa05   : > { %v2479_v52 = vpop.permute.xlu1 %2478  ;;  %v2484_v57 = vpop.permute.xlu0 %2483 }
 0xa09   : > { %v2489_v58 = vpop.permute.xlu1 %2488  ;;  %v2740_v62 = vpop.permute.xlu0 %2739 }
 0xa0d   : > { %v2745_v13 = vpop.permute.xlu1 %2744  ;;  %v2750_v32 = vpop.permute.xlu0 %2749 }
 0xa11   : > { %v2755_v33 = vpop.permute.xlu1 %2754 }
 0xac5   : > { %v3484_v50 = vpop.f32.mrb[20].mxu0 }
 0xac6   : > { %v3485_v46 = vpop.f32.mrb[21].mxu0 }
 0xac7   : > { %v3486_v51 = vadd.f32 %v3485_v46, %v3484_v50  ;;  %v3487_v53 = vpop.f32.mrb[22].mxu0 }
 0xac8   : > { %v3488_v55 = vpop.f32.mrb[23].mxu0 }
 0xac9   : > { %v3489_v56 = vadd.f32 %v3488_v55, %v3487_v53  ;;  %v2661_v30 = vadd.f32 %v3486_v51, %v2474_v47  ;;  %v2805_v55 = vpop.permute.xlu0 %2804 }
 0xacb   : > { %v2664_v11 = vadd.f32 %v3489_v56, %v2479_v52  ;;  %v2810_v56 = vpop.permute.xlu1 %2809 }
 0xacd   : > { %v3490_v29 = vpop.f32.mrb[24].mxu0  ;;  %v3559_v61 = vpop.f32.mrb[20].mxu1 }
 0xace   : > { %v3491_v1 = vpop.f32.mrb[25].mxu0  ;;  %v2709_v63 = vpop.f32.mrb[21].mxu1 }
 0xacf   : > { %v3492_v3 = vadd.f32 %v3491_v1, %v3490_v29  ;;  %v2710_v60 = vadd.f32 %v2709_v63, %v2661_v30  ;;  %v3493_v2 = vpop.f32.mrb[26].mxu0  ;;  %v3560_v4 = vpop.f32.mrb[22].mxu1 }
 0xad0   : > { %v3494_v6 = vpop.f32.mrb[27].mxu0  ;;  %v2712_v7 = vpop.f32.mrb[23].mxu1 }
 0xad1   : > { %v2669_v8 = vadd.f32 %v3492_v3, %v2484_v57  ;;  %v2724_v9 = vmax.f32 %v2710_v60, 0.0  ;;  %v3495_v5 = vadd.f32 %v3494_v6, %v3493_v2  ;;  %v2713_v21 = vadd.f32 %v2712_v7, %v2664_v11  ;;  %v2834_v29 = vpop.permute.xlu0 %2833 }
 0xad3   : > { %v2718_v10 = vadd.f32 %v3559_v61, %v2669_v8  ;;  %v4942_v12 = vadd.f32 %v2724_v9, %v4760_v43  ;;  %v2672_v28 = vadd.f32 %v3495_v5, %v2489_v58  ;;  %v2725_v59 = vmax.f32 %v2713_v21, 0.0  ;;  %v2839_v61 = vpop.permute.xlu1 %2838 }
 0xad5   : > { %v2726_v14 = vmax.f32 %v2718_v10, 0.0  ;;  %v2757_v16 = vadd.f32 %v2740_v62, %v4942_v12  ;;  %v2721_v19 = vadd.f32 %v3560_v4, %v2672_v28  ;;  %v4946_v31 = vadd.f32 %v2725_v59, %v4764_v48  ;;  %v2815_v30 = vpop.permute.xlu0 %2814 }
 0xad7   : > { %v4949_v18 = vadd.f32 %v2726_v14, %v4767_v49  ;;  %v2727_v17 = vmax.f32 %v2721_v19, 0.0  ;;  %v2758_v23 = vadd.f32 %v2745_v13, %v4946_v31  ;;  %v2771_v25 = vmul.f32 %v2757_v16, %v2757_v16  ;;  %v2820_v1 = vpop.permute.xlu1 %2819 }
 0xad9   : > { %v2759_v43 = vadd.f32 %v2750_v32, %v4949_v18  ;;  %v4954_v34 = vadd.f32 %v2727_v17, %v4772_v54  ;;  %v2761_v24 = vadd.f32 %v2758_v23, %v2757_v16  ;;  %v2772_v27 = vmul.f32 %v2758_v23, %v2758_v23  ;;  %v2844_v10 = vpop.permute.xlu0 %2843 }
 0xadb   : > { %v2773_v0 = vmul.f32 %v2759_v43, %v2759_v43  ;;  %v2760_v48 = vadd.f32 %v2755_v33, %v4954_v34  ;;  %v2762_v15 = vadd.f32 %v2761_v24, %v2759_v43  ;;  %v2775_v22 = vadd.f32 %v2772_v27, %v2771_v25  ;;  %v2849_v28 = vpop.permute.xlu1 %2848  ;;  %v3843_v25 = vld [vmem:[%s5081_s8] sm:$0xff]  }
 0xadc   : > { %3573 = vmatprep.mubr.msk.bf16.mxu1 %vm1966_vm0, %v3843_v25 }
 0xadd   : > { %v2774_v49 = vmul.f32 %v2760_v48, %v2760_v48  ;;  %v2763_v35 = vadd.f32 %v2762_v15, %v2760_v48  ;;  %v2776_v37 = vadd.f32 %v2775_v22, %v2773_v0  ;;  %v3349_v0 = vld [vmem:[%s5082_s9 + $0x88] sm:$0xff]  ;;  %v3351_v15 = vld [vmem:[%s5082_s9 + $0x98] sm:$0xff] }
 0xade   : > { %v3015_v22 = vld [vmem:[%s5086_s13 + $0x8] sm:$0xff] }
 0xadf   : > { %v2764_v38 = vrot.slane %v2763_v35, 4  ;;  %v2777_v39 = vadd.f32 %v2776_v37, %v2774_v49  ;;  %v3014_v49 = vld [vmem:[%s5086_s13] sm:$0xff]  ;;  %v3016_v37 = vld [vmem:[%s5086_s13 + $0x10] sm:$0xff] }
 0xae1   : > { %v2765_v40 = vadd.f32 %v2764_v38, %v2763_v35  ;;  %v2778_v41 = vrot.slane %v2777_v39, 4  ;;  %v3017_v35 = vld [vmem:[%s5086_s13 + $0x18] sm:$0xff]  ;;  %v3110_v38 = vld [vmem:[%s5088_s15] sm:$0xf] }
 0xae3   : > { %v2766_v42 = vrot.slane %v2765_v40, 2  ;;  %v2779_v20 = vadd.f32 %v2778_v41, %v2777_v39 }
 0xae5   : > { %v2767_v26 = vadd.f32 %v2766_v42, %v2765_v40  ;;  %v2780_v54 = vrot.slane %v2779_v20, 2 }
 0xae7   : > { %v2768_v44 = vrot.slane %v2767_v26, 1  ;;  %v2781_v45 = vadd.f32 %v2780_v54, %v2779_v20 }
 0xae9   : > { %v2769_v47 = vadd.f32 %v2768_v44, %v2767_v26  ;;  %v2782_v50 = vrot.slane %v2781_v45, 1 }
 0xaeb   : > { %v2770_v52 = vmul.f32 0.03125, %v2769_v47  ;;  %v2783_v46 = vadd.f32 %v2782_v50, %v2781_v45  ;;  %v3844_v45 = vld [vmem:[%s5081_s8 + $0x8] sm:$0xff]   ;;  %v3845_v47 = vld [vmem:[%s5085_s12] sm:$0xff]  }
 0xaec   : > { %3581 = vmatprep.mubr.msk.bf16.mxu0 %vm1139_vm10, %v3845_v47 }
 0xaed   : > { %v2784_v51 = vmul.f32 0.03125, %v2783_v46  ;;  %v2789_v53 = vmul.f32 %v2770_v52, %v2770_v52  ;;  %v2785_v63 = vsub.f32 %v2757_v16, %v2770_v52  ;;  %v2786_v3 = vsub.f32 %v2758_v23, %v2770_v52 }
 0xaee   : > { %v2787_v60 = vsub.f32 %v2759_v43, %v2770_v52  ;;  %v2788_v2 = vsub.f32 %v2760_v48, %v2770_v52  ;;  %v3348_v48 = vld [vmem:[%s5082_s9 + $0x80] sm:$0xff] }
 0xaef   : > { %v2790_v57 = vsub.f32 %v2784_v51, %v2789_v53 }
 0xaf1   : > { %v2791_v58 = vadd.f32 1e-05, %v2790_v57 }
 0xaf3   : > { %3855 = vrsqrt.f32 %v2791_v58 }
 0xafd   : > { %v3856_v4 = vpop.eup %3855 }
 0xafe   : > { %v2793_v11 = vmul.f32 %v3856_v4, %v2785_v63  ;;  %v2794_v6 = vmul.f32 %v3856_v4, %v2786_v3  ;;  %v2795_v7 = vmul.f32 %v3856_v4, %v2787_v60  ;;  %v2796_v8 = vmul.f32 %v3856_v4, %v2788_v2 }
 0xb00   : > { %v2822_v9 = vmul.f32 %v2805_v55, %v2793_v11  ;;  %v2823_v5 = vmul.f32 %v2810_v56, %v2794_v6  ;;  %v2824_v21 = vmul.f32 %v2815_v30, %v2795_v7  ;;  %v2825_v62 = vmul.f32 %v2820_v1, %v2796_v8 }
 0xb02   : > { %v2851_v59 = vadd.f32 %v2834_v29, %v2822_v9  ;;  %v2852_v13 = vadd.f32 %v2839_v61, %v2823_v5  ;;  %v2853_v14 = vadd.f32 %v2844_v10, %v2824_v21  ;;  %v2854_v19 = vadd.f32 %v2849_v28, %v2825_v62  ;;  %v3846_v9 = vld [vmem:[%s5085_s12 + $0x8] sm:$0xff]  }
 0xb03   : > { %v3944_v5 = vmov 0.0  }
 0xb04   : > { %v2855_v17 = vpack.c.bf16 %v2852_v13, %v2851_v59  ;;  %v2856_v16 = vpack.c.bf16 %v2854_v19, %v2853_v14 }
 0xb06   : > { %2857 = vst [vmem:[#allocation2 + $0x8] sm:$0xff] %v2855_v17  ;;  %2869 = vrot.lane.b32.xlu0 %v2855_v17, %s3943_s21  ;;  %2871 = vrot.lane.b32.xlu1 %v2856_v16, %s3943_s21 }
 0xb0a   : > { %2918 = vrot.lane.b32.xlu0 %v4862_v36, %s3943_s21  ;;  %2920 = vrot.lane.b32.xlu1 %v4862_v36, %s3943_s21 }
 0xb78   : > { %v2872_v23 = vpop.permute.xlu1 %2871  ;;  %v2870_v32 = vpop.permute.xlu0 %2869 }
 0xb79   : > { %2924 = vrot.lane.b32.xlu1 %v2872_v23, %s3943_s21  ;;  %2922 = vrot.lane.b32.xlu0 %v2870_v32, %s3943_s21 }
 0xb7c   : > { %v2921_v43 = vpop.permute.xlu1 %2920  ;;  %v2919_v24 = vpop.permute.xlu0 %2918 }
 0xb7d   : > { %2928 = vrot.lane.b32.xlu1 %v4862_v36, %s3943_s21  ;;  %2926 = vrot.lane.b32.xlu0 %v2855_v17, %s3943_s21  ;;  %v2934_v27 = vsel %vm2585_vm5, %v2919_v24, %v2870_v32  ;;  %v2935_v33 = vsel %vm2585_vm5, %v2921_v43, %v2872_v23 }
 0xb7e   : > { %3561 = vmatprep.subr.bf16.mxu1 %v2934_v27 }
 0xb7f   : > { %3562 = vmatpush3.bf16.msra.mxu1 %v2934_v27 }
 0xb80   : > { %3563 = vmatprep.subr.bf16.mxu1 %v2935_v33 }
 0xb81   : > { %2932 = vrot.lane.b32.xlu1 %v4862_v36, %s3943_s21  ;;  %2930 = vrot.lane.b32.xlu0 %v2856_v16, %s3943_s21  ;;  %v3350_v36 = vld [vmem:[%s5082_s9 + $0x90] sm:$0xff]  ;;  %s5151_s21 = sld [smem:[#allocation19_spill]] }
 0xb83   : > { %3564 = vmatpush3.bf16.msra.mxu1 %v2935_v33 }
 0xb85   : > { %2889 = vperm.xlu1 %3657, %v3349_v0   ;;  %2884 = vperm.xlu0 %3658, %v3348_v48  }
 0xb87   : > { %v3107_v24 = vld [vmem:[%s5151_s21] sm:$0x3] }
 0xb89   : > { %2899 = vperm.xlu1 %3657, %v3351_v15   ;;  %2894 = vperm.xlu0 %3658, %v3350_v36  }
 0xb8d   : > { %3025 = vperm.xlu1 %3657, %v3015_v22   ;;  %3020 = vperm.xlu0 %3658, %v3014_v49  }
 0xb91   : > { %3035 = vperm.xlu1 %3657, %v3017_v35   ;;  %3030 = vperm.xlu0 %3658, %v3016_v37  }
 0xb95   : > { %3113 = vperm.xlu0 %3658, %v3110_v38  }
 0xbeb   : > { %v2925_v39 = vpop.permute.xlu1 %2924  ;;  %v2923_v40 = vpop.permute.xlu0 %2922 }
 0xbec   : > { %3565 = vmatprep.subr.bf16.mxu1 %v2923_v40 }
 0xbed   : > { %3566 = vmatpush3.bf16.msra.mxu1 %v2923_v40 }
 0xbee   : > { %3567 = vmatprep.subr.bf16.mxu1 %v2925_v39 }
 0xbef   : > { %v2929_v41 = vpop.permute.xlu1 %2928  ;;  %v2927_v42 = vpop.permute.xlu0 %2926 }
 0xbf0   : > { %v2936_v20 = vsel %vm2585_vm5, %v2927_v42, %v2929_v41 }
 0xbf1   : > { %3568 = vmatpush3.bf16.msra.mxu1 %v2925_v39 }
 0xbf2   : > { %3569 = vmatprep.subr.bf16.mxu1 %v2936_v20 }
 0xbf3   : > { %v2933_v26 = vpop.permute.xlu1 %2932  ;;  %v2931_v54 = vpop.permute.xlu0 %2930 }
 0xbf4   : > { %v2937_v44 = vsel %vm2585_vm5, %v2931_v54, %v2933_v26 }
 0xbf5   : > { %3570 = vmatpush3.bf16.msra.mxu1 %v2936_v20 }
 0xbf6   : > { %3571 = vmatprep.subr.bf16.mxu1 %v2937_v44 }
 0xbf9   : > { %3572 = vmatpush3.bf16.msra.mxu1 %v2937_v44 }
 0xbfa   : > { %3585 = vmatprep.subr.bf16.mxu1 %v3944_v5 }
 0xbfc   : > { %3574 = vmatmul.mubr.msk.bf16.vlgmr.msra.gmra.mrb[24].mxu1 %vm1966_vm0, %v3844_v45 }
 0xbfd   : > { %3589 = vmatprep.mubr.msk.bf16.mxu1 %vm3945_vm6, %v3944_v5 }
 0xc04   : > { %v2885_v50 = vpop.permute.xlu0 %2884  ;;  %v2890_v52 = vpop.permute.xlu1 %2889 }
 0xc08   : > { %v2895_v46 = vpop.permute.xlu0 %2894  ;;  %v2900_v56 = vpop.permute.xlu1 %2899 }
 0xccf   : > { %v3575_v51 = vpop.f32.mrb[24].mxu1 }
 0xcd0   : > { %v2994_v53 = vadd.f32 %v3575_v51, %v2895_v46  ;;  %v2985_v55 = vpop.f32.mrb[25].mxu1 }
 0xcd1   : > { %v2986_v57 = vadd.f32 %v2985_v55, %v2885_v50  ;;  %v3576_v58 = vpop.f32.mrb[26].mxu1 }
 0xcd2   : > { %v3002_v29 = vmax.f32 %v2994_v53, 0.0  ;;  %v2997_v61 = vadd.f32 %v3576_v58, %v2900_v56  ;;  %v2988_v30 = vpop.f32.mrb[27].mxu1 }
 0xcd3   : > { %v3000_v1 = vmax.f32 %v2986_v57, 0.0  ;;  %v2989_v63 = vadd.f32 %v2988_v30, %v2890_v52 }
 0xcd4   : > { %v3003_v3 = vmax.f32 %v2997_v61, 0.0  ;;  %v3006_v2 = vadd.f32 %v3002_v29, %v4949_v18  ;;  %v3021_v18 = vpop.permute.xlu0 %3020 }
 0xcd5   : > { %v3001_v60 = vmax.f32 %v2989_v63, 0.0  ;;  %v3004_v11 = vadd.f32 %v3000_v1, %v4942_v12  ;;  %v3026_v12 = vpop.permute.xlu1 %3025 }
 0xcd6   : > { %v3007_v4 = vadd.f32 %v3003_v3, %v4954_v34 }
 0xcd7   : > { %v3005_v6 = vadd.f32 %v3001_v60, %v4946_v31 }
 0xcd8   : > { %v3013_v7 = vpack.c.bf16 %v3007_v4, %v3006_v2  ;;  %v3031_v34 = vpop.permute.xlu0 %3030 }
 0xcd9   : > { %v3012_v8 = vpack.c.bf16 %v3005_v6, %v3004_v11  ;;  %v3036_v10 = vpop.permute.xlu1 %3035 }
 0xcdb   : > { %3577 = vmatprep.subr.bf16.mxu0 %v3012_v8 }
 0xcdc   : > { %3578 = vmatpush3.bf16.msra.mxu0 %v3012_v8  ;;  %v3114_v27 = vpop.permute.xlu0 %3113 }
 0xcdd   : > { %3579 = vmatprep.subr.bf16.mxu0 %v3013_v7 }
 0xce0   : > { %3580 = vmatpush3.bf16.msra.mxu0 %v3013_v7 }
 0xce3   : > { %3582 = vmatmul.mubr.msk.bf16.vlgmr.msra.gmra.mrb[28].mxu0 %vm1139_vm10, %v3846_v9 }
 0xdb6   : > { %v3583_v31 = vpop.f32.mrb[28].mxu0 }
 0xdb7   : > { %v3097_v21 = vadd.f32 %v3583_v31, %v3031_v34  ;;  %v3088_v62 = vpop.f32.mrb[29].mxu0 }
 0xdb8   : > { %v3089_v28 = vadd.f32 %v3088_v62, %v3021_v18  ;;  %v3584_v59 = vpop.f32.mrb[30].mxu0 }
 0xdb9   : > { %v3100_v13 = vadd.f32 %v3584_v59, %v3036_v10  ;;  %v3091_v14 = vpop.f32.mrb[31].mxu0  ;;  %v3105_v17 = vmax.f32 %v3097_v21, 0.0 }
 0xdba   : > { %v3092_v19 = vadd.f32 %v3091_v14, %v3026_v12  ;;  %v3103_v23 = vmax.f32 %v3089_v28, 0.0 }
 0xdbb   : > { %v3106_v16 = vmax.f32 %v3100_v13, 0.0 }
 0xdbc   : > { %v3104_v32 = vmax.f32 %v3092_v19, 0.0 }
 0xdbd   : > { %v3109_v25 = vpack.c.bf16 %v3106_v16, %v3105_v17 }
 0xdbe   : > { %v3108_v43 = vpack.c.bf16 %v3104_v32, %v3103_v23 }
 0xdc0   : > { %3586 = vmatpush3.bf16.msra.mxu1 %v3108_v43 }
 0xdc1   : > { %3587 = vmatprep.subr.bf16.mxu1 %v3944_v5 }
 0xdc4   : > { %3588 = vmatpush3.bf16.msra.mxu1 %v3109_v25 }
 0xdc7   : > { %3590 = vmatmul.mubr.msk.bf16.vlgmr.msra.gmra.mrb[28].mxu1 %vm1139_vm10, %v3107_v24 }
 0xe9a   : > { %v3153_v33 = vpop.f32.mrb[28].mxu1 }
 0xe9b   : > { %v3154_v0 = vadd.f32 %v3153_v33, %v3114_v27  ;;  %v3591_v48 = vpop.f32.mrb[29].mxu1 }
 0xe9c   : > { %v3156_v15 = vpop.f32.mrb[30].mxu1 }
 0xe9d   : > { %3159 = vst [vmem:[%s527_s28] sm:$0xf] %v3154_v0  ;;  %v3592_v36 = vpop.f32.mrb[31].mxu1 }
 0xe9e   : > { %3872 = shalt.err (!%p3869_p3)
}
 0xe9f   : > { %s3873_s24 = scalar_lea.hbm %s5031_s3, 64  ;;  %s3877_s23 = scalar_lea.hbm %s5153_s1, 128 }
 0xea0   : > { %p3874_p4 = scmp.ne.s32.totalorder %s5031_s3, %s3873_s24  ;;  %p3878_p9 = scmp.lt.u32.totalorder %s5031_s3, %s5153_s1 }
 0xea1   : > { %p3879_p10 = scmp.lt.u32.totalorder %s3877_s23, %s3873_s24  ;;  %p3881_p12 = scmp.lt.u32.totalorder %s3873_s24, %s5031_s3 }
 0xea2   : > { %p3875_p7 = pnand %p3874_p4, %p4070_p5 }
 0xea3   : > { %p3880_p11 = por %p3879_p10, %p3878_p9 }
 0xea4   : > { %p3876_p8 = pneg %p3875_p7 }
 0xea5   : > { %p3882_p13 = por %p3881_p12, %p3880_p11 }
 0xea7   : > { %p3883_p0 = pnand %p3882_p13, %p3876_p8 }
 0xea9   : > { %3886 = shalt.err (!%p3883_p0)
}
 0xeaa   : > { %3595 = dma.vmem_to_hbm [thread:$0]  (%p4070_p5), %s5033_s25, 64, %s5031_s3, %s3161_s29  }
 0xeab PF: > { %s5154_s26 = sld [smem:[#allocation9_spill]]  ;;  %s5155_s19 = sld [smem:[#allocation6_spill]] }
 0xeb1   : > { %p3601_p1 = scmp.ge.s32.totalorder %s5154_s26, 2  ;;  %s3186_s2 = sand.u32 1, %s5155_s19  }
 0xeb2   : > { %s3187_s18 = scalar_lea.sflag [#allocation4], %s3186_s2 }
 0xeb3   : > { %p3598_p2 = pnand %p3601_p1, %p4074_p6 }
 0xeb5   : > { %3904 = dma.done.wait (!%p3598_p2), %s3187_s18, 64  }
 0xeb6   : > { %3906 = vsyncadd (!%p3598_p2), %s3187_s18, 4294967232  ;;  %s5157_s24 = sld [smem:[#allocation11_spill]]  ;;  %s5158_s21 = sld [smem:[#allocation7_spill]] }
 0xeb7   : > { %s5159_s22 = sld [smem:[#allocation8_spill]]  ;;  %s5160_s23 = sld [smem:[#allocation12_spill]] }
 0xebc   : > { %p26_p3 = scmp.ge.s32.totalorder %s5157_s24, 4  }
 0xebe   :  { %28 = sbr.rel (!%p26_p3) target bundleno = 10 (0xa), region = 138 }
 0xec5   :  { %3192 = vsyncpa [#allocation4], 1 }
 0xec6   :  { %3194 = vsyncpa [#allocation4 + $0x1], 1 }

</bundles_post_ra>
